<compile_context>
chip_gen: v6e
topology: v6e:2x2x1
jax: 0.10.0
libtpu: 0.0.40
codegen_flags: <defaults>
</compile_context>

<pallas_src>
import functools

import jax
import jax.numpy as jnp
from jax.experimental import pallas as pl
from jax.experimental.pallas import tpu as pltpu


# ----------------------------------------------------------------------------
# Kernels
# ----------------------------------------------------------------------------
def _layernorm(x, g, b, eps=1e-5):
    mu = jnp.mean(x, axis=-1, keepdims=True)
    var = jnp.mean(jnp.square(x - mu), axis=-1, keepdims=True)
    return (x - mu) * jax.lax.rsqrt(var + eps) * g + b


def _mm(a, w):
    """bf16 x bf16 matmul with f32 accumulation on the MXU."""
    return jnp.dot(a.astype(jnp.bfloat16), w, preferred_element_type=jnp.float32)


def branch_kernel(x_ref, w_cnn_ref, wq_ref, wk_ref, wv_ref, wo_ref,
                  w_ff1_ref, w_ff2_ref, w_fc_ref, w_ih_ref,
                  b_d_ref, b_qkv_ref, b_ff1_ref, b_gate_ref,
                  cnn0_ref, norm_ref, final_ref,
                  *, num_heads, head_dim, hidden, d_model, b_real):
    D, H = d_model, hidden
    x = x_ref[0]                                   # (Bp, D) f32, grid step g
    Bp = x.shape[0]
    xb = x.astype(jnp.bfloat16)
    b_d = b_d_ref[...]                             # (10, D) f32 packed biases / LN params

    # ---- CNN residual block: Conv1d over L == 1 collapses to center-tap matmuls
    residual = _mm(xb, w_cnn_ref[0]) + b_d[0:1]
    h = jnp.maximum(_mm(xb, w_cnn_ref[1]) + b_d[1:2], 0.0)
    h = _mm(h, w_cnn_ref[2]) + b_d[2:3]
    out_cnn0 = h + residual                        # squeeze(2), pre-ReLU
    cnn0_ref[0] = out_cnn0
    final_ref[0, :, 0:D] = jnp.maximum(out_cnn0, 0.0)   # mean over seq length 1

    # ---- multi-head self-attention (batch_first=False => seq axis == batch rows)
    b_qkv = b_qkv_ref[...]                         # (3*nh, hd) f32
    col = jax.lax.broadcasted_iota(jnp.int32, (Bp, Bp), 1)
    key_mask = jnp.where(col < b_real, 0.0, -1e30) # padded rows never act as keys
    scale = 1.0 / (head_dim ** 0.5)
    attn = jnp.zeros((Bp, D), jnp.float32)
    for hh in range(num_heads):                    # per-head weights pre-split wrapper-side
        qh = _mm(xb, wq_ref[hh]) + b_qkv[hh:hh + 1]
        kh = _mm(xb, wk_ref[hh]) + b_qkv[num_heads + hh:num_heads + hh + 1]
        vh = _mm(xb, wv_ref[hh]) + b_qkv[2 * num_heads + hh:2 * num_heads + hh + 1]
        s = jnp.dot(qh * scale, kh.T, preferred_element_type=jnp.float32) + key_mask
        s = s - jnp.max(s, axis=-1, keepdims=True)
        p = jnp.exp(s)
        p = p * pl.reciprocal(jnp.sum(p, axis=-1, keepdims=True), approx=True)
        ctx = jnp.dot(p, vh, preferred_element_type=jnp.float32)
        attn = attn + _mm(ctx, wo_ref[hh])         # == concat(heads) @ Wo (accumulated)
    attn = attn + b_d[3:4]

    # ---- transformer block (dropout == identity in eval mode)
    res1 = x + attn
    n1 = _layernorm(res1, b_d[4:5], b_d[5:6])
    ff = jnp.maximum(_mm(n1, w_ff1_ref[...]) + b_ff1_ref[...], 0.0)
    ff = _mm(ff, w_ff2_ref[...]) + b_d[6:7]
    n2 = _layernorm(n1 + ff, b_d[7:8], b_d[8:9])
    norm_ref[0] = n2                               # "x_trans" output
    final_ref[0, :, D:2 * D] = _mm(n2, w_fc_ref[...]) + b_d[9:10]

    # ---- BiLSTM, seq len 1, h0 = c0 = 0 (both directions in one matmul)
    gates = _mm(xb, w_ih_ref[...]) + b_gate_ref[...]    # (Bp, 8H): [fwd 4H | bwd 4H]

    def cell(g):                                   # PyTorch gate order i,f,g,o; c0==0
        i = jax.nn.sigmoid(g[:, 0:H])
        gg = jnp.tanh(g[:, 2 * H:3 * H])
        o = jax.nn.sigmoid(g[:, 3 * H:4 * H])
        return o * jnp.tanh(i * gg)

    final_ref[0, :, 2 * D:2 * D + H] = cell(gates[:, 0:4 * H])
    final_ref[0, :, 2 * D + H:2 * D + 2 * H] = cell(gates[:, 4 * H:8 * H])


def head_kernel(f1_ref, f23_ref, w1a_ref, w1b_ref, b1_ref, w2_ref, b2_ref, o_ref):
    # fc_final1 applied as per-branch row-blocks of W1 (avoids a 3-way concat);
    # the reference module has no activation between fc_final1 and fc_final2.
    h = (_mm(f1_ref[0], w1a_ref[...])
         + _mm(f23_ref[0], w1b_ref[0])
         + _mm(f23_ref[1], w1b_ref[1])
         + b1_ref[...])
    o_ref[...] = _mm(h, w2_ref[...]) + b2_ref[...]   # lane-padded (Bp, 128) output


# ----------------------------------------------------------------------------
# Wrappers
# ----------------------------------------------------------------------------
def _resident_spec(shape):
    n = len(shape)
    return pl.BlockSpec(shape, lambda g, _n=n: (0,) * _n)   # same block every step


def run_branch(x_stacked, p, *, num_heads, hidden, d_model, b_real):
    S, Bp, D = x_stacked.shape
    H = hidden
    FW = 2 * D + 2 * H
    kernel = functools.partial(branch_kernel, num_heads=num_heads,
                               head_dim=D // num_heads, hidden=H,
                               d_model=D, b_real=b_real)
    in_specs = ([pl.BlockSpec((1, Bp, D), lambda g: (g, 0, 0))]
                + [_resident_spec(a.shape) for a in p])
    out_specs = (pl.BlockSpec((1, Bp, D), lambda g: (g, 0, 0)),
                 pl.BlockSpec((1, Bp, D), lambda g: (g, 0, 0)),
                 pl.BlockSpec((1, Bp, FW), lambda g: (g, 0, 0)))
    out_shape = (jax.ShapeDtypeStruct((S, Bp, D), jnp.float32),   # out_cnn0 (pre-ReLU)
                 jax.ShapeDtypeStruct((S, Bp, D), jnp.float32),   # norm2 -> x_trans
                 jax.ShapeDtypeStruct((S, Bp, FW), jnp.float32))  # [cnn|fc|h_f|h_b] slab
    return pl.pallas_call(
        kernel,
        grid=(S,),
        in_specs=in_specs,
        out_specs=out_specs,
        out_shape=out_shape,
        compiler_params=pltpu.CompilerParams(dimension_semantics=("parallel",)),
    )(x_stacked, *p)


def run_head(fin1, fin23, head_params):
    w1a, w1b, b1, w2p, b2p = head_params
    Bp = fin1.shape[1]
    vm = pl.BlockSpec(memory_space=pltpu.MemorySpace.VMEM)
    return pl.pallas_call(
        head_kernel,
        out_shape=jax.ShapeDtypeStruct((Bp, w2p.shape[1]), jnp.float32),
        in_specs=[vm] * 7,
        out_specs=vm,
    )(fin1, fin23, w1a, w1b, b1, w2p, b2p)


def _pad_stack(xs, Bp):
    out = []
    for x in xs:
        B, L, D = x.shape
        assert L == 1, "module forward requires seq length 1 (squeeze/cat force it)"
        x2d = x.reshape(B, D).astype(jnp.float32)
        out.append(jnp.pad(x2d, ((0, Bp - B), (0, 0))))
    return jnp.stack(out, axis=0)


def cnn_transformer_bilstm_forward(x1, x2, x3, params, *, num_heads=4, hidden=128):
    B, L, D1 = x1.shape
    D2 = x2.shape[2]
    assert x3.shape == x2.shape
    H = hidden
    Bp = ((B + 7) // 8) * 8                          # pad batch to f32 sublane multiple

    x1s = _pad_stack([x1], Bp)                       # (1, Bp, D1) prott5 branch
    x23 = _pad_stack([x2, x3], Bp)                   # (2, Bp, D2) esm branch (shared W)

    cnn1, nrm1, fin1 = run_branch(x1s, params["branch1"], num_heads=num_heads,
                                  hidden=H, d_model=D1, b_real=B)
    cnn23, nrm23, fin23 = run_branch(x23, params["branch2"], num_heads=num_heads,
                                     hidden=H, d_model=D2, b_real=B)

    out_pad = run_head(fin1, fin23, params["head"])  # (Bp, 128)
    out = out_pad[:B, :params["num_classes"]]

    def pick(cnn, nrm, fin, idx, D):
        return (cnn[idx, :B], nrm[idx, :B], fin[idx, :B, 2 * D:2 * D + 2 * H])

    x1_cnn, x1_trans, x1_bi = pick(cnn1, nrm1, fin1, 0, D1)
    x2_cnn, x2_trans, x2_bi = pick(cnn23, nrm23, fin23, 0, D2)
    x3_cnn, x3_trans, x3_bi = pick(cnn23, nrm23, fin23, 1, D2)
    return (x1_cnn, x1_trans, x1_bi,
            x2_cnn, x2_trans, x2_bi,
            x3_cnn, x3_trans, x3_bi, out)


# ----------------------------------------------------------------------------
# Deterministic synthetic parameters (shapes mirror the nn.Module __init__)
# ----------------------------------------------------------------------------
def make_branch_params(key, D, H, num_heads):
    hd = D // num_heads
    ks = iter(jax.random.split(key, 24))

    def wf(shape, scale=0.05):
        return scale * jax.random.normal(next(ks), shape, dtype=jnp.float32)

    def wb(shape):
        return wf(shape).astype(jnp.bfloat16)

    w_cnn = wb((3, D, D))          # [residual k=1, conv*1 center, conv*2 center] (in,out)
    wq = wb((num_heads, D, hd))    # per-head in_proj slices, pre-transposed
    wk = wb((num_heads, D, hd))
    wv = wb((num_heads, D, hd))
    wo = wb((num_heads, hd, D))    # per-head rows of out_proj^T
    w_ff1 = wb((D, 4 * D))
    w_ff2 = wb((4 * D, D))
    w_fc = wb((D, D))
    w_ih = wb((D, 8 * H))          # [W_ih_fwd^T | W_ih_bwd^T]

    # packed (row, D) biases / LN params:
    # 0 residual_conv b, 1 conv*1 b, 2 conv*2 b, 3 attn out_proj b,
    # 4 LN1 gamma, 5 LN1 beta, 6 ff2 b, 7 LN2 gamma, 8 LN2 beta, 9 fc b
    rows = [wf((D,)), wf((D,)), wf((D,)), wf((D,)),
            jnp.ones((D,), jnp.float32), jnp.zeros((D,), jnp.float32),
            wf((D,)),
            jnp.ones((D,), jnp.float32), jnp.zeros((D,), jnp.float32),
            wf((D,))]
    b_d = jnp.stack(rows, axis=0)                  # (10, D) f32
    b_qkv = wf((3 * num_heads, hd))                # q rows | k rows | v rows
    b_ff1 = wf((1, 4 * D))
    b_gate = wf((1, 8 * H))                        # (b_ih + b_hh), fwd || bwd
    return [w_cnn, wq, wk, wv, wo, w_ff1, w_ff2, w_fc, w_ih,
            b_d, b_qkv, b_ff1, b_gate]


def make_head_params(key, fw1, fw2, head_hidden, num_classes, nc_pad=128):
    k1, k2, k3, k4, k5 = jax.random.split(key, 5)
    w1a = (0.05 * jax.random.normal(k1, (fw1, head_hidden), jnp.float32)).astype(jnp.bfloat16)
    w1b = (0.05 * jax.random.normal(k2, (2, fw2, head_hidden), jnp.float32)).astype(jnp.bfloat16)
    b1 = 0.05 * jax.random.normal(k3, (1, head_hidden), jnp.float32)
    w2 = 0.05 * jax.random.normal(k4, (head_hidden, num_classes), jnp.float32)
    w2p = jnp.pad(w2, ((0, 0), (0, nc_pad - num_classes))).astype(jnp.bfloat16)
    b2 = 0.05 * jax.random.normal(k5, (1, num_classes), jnp.float32)
    b2p = jnp.pad(b2, ((0, 0), (0, nc_pad - num_classes)))
    return [w1a, w1b, b1, w2p, b2p]


def make_params(key, D1, D2, H, num_classes, head_hidden, num_heads):
    k1, k2, k3 = jax.random.split(key, 3)
    fw1 = 2 * D1 + 2 * H
    fw2 = 2 * D2 + 2 * H
    return {
        "branch1": make_branch_params(k1, D1, H, num_heads),
        "branch2": make_branch_params(k2, D2, H, num_heads),
        "head": make_head_params(k3, fw1, fw2, head_hidden, num_classes),
        "num_classes": num_classes,
    }


# ----------------------------------------------------------------------------
if __name__ == "__main__":
    B = 2
    D1, D2 = 128, 256          # scaled stand-ins for input_dim1=1024 / input_dim2=1280
    HIDDEN = 128               # scaled stand-in for the hard-coded LSTM hidden 512
    NUM_CLASSES = 8
    HEAD_HIDDEN = 256          # scaled stand-in for fc_final1's 1024
    NUM_HEADS = 4

    key = jax.random.PRNGKey(0)
    kx1, kx2, kx3, kp = jax.random.split(key, 4)
    x1 = jax.random.normal(kx1, (B, 1, D1), dtype=jnp.float32)
    x2 = jax.random.normal(kx2, (B, 1, D2), dtype=jnp.float32)
    x3 = jax.random.normal(kx3, (B, 1, D2), dtype=jnp.float32)

    params = make_params(kp, D1, D2, HIDDEN, NUM_CLASSES, HEAD_HIDDEN, NUM_HEADS)

    outs = cnn_transformer_bilstm_forward(x1, x2, x3, params,
                                          num_heads=NUM_HEADS, hidden=HIDDEN)
    outs = jax.block_until_ready(outs)

    expected = [
        (B, D1), (B, D1), (B, 2 * HIDDEN),
        (B, D2), (B, D2), (B, 2 * HIDDEN),
        (B, D2), (B, D2), (B, 2 * HIDDEN),
        (B, NUM_CLASSES),
    ]
    assert [tuple(o.shape) for o in outs] == expected, [o.shape for o in outs]
    assert all(bool(jnp.all(jnp.isfinite(o))) for o in outs)
    print("KERNEL_OK")
</pallas_src>

<mosaic_0001>
module attributes {stable_mosaic.version = 11 : i64} {
  func.func @branch_kernel(%arg0: i32, %arg1: memref<1x8x128xf32, #tpu.memory_space<vmem>>, %arg2: memref<3x128x128xbf16, #tpu.memory_space<vmem>>, %arg3: memref<4x128x32xbf16, #tpu.memory_space<vmem>>, %arg4: memref<4x128x32xbf16, #tpu.memory_space<vmem>>, %arg5: memref<4x128x32xbf16, #tpu.memory_space<vmem>>, %arg6: memref<4x32x128xbf16, #tpu.memory_space<vmem>>, %arg7: memref<128x512xbf16, #tpu.memory_space<vmem>>, %arg8: memref<512x128xbf16, #tpu.memory_space<vmem>>, %arg9: memref<128x128xbf16, #tpu.memory_space<vmem>>, %arg10: memref<128x1024xbf16, #tpu.memory_space<vmem>>, %arg11: memref<10x128xf32, #tpu.memory_space<vmem>>, %arg12: memref<12x32xf32, #tpu.memory_space<vmem>>, %arg13: memref<1x512xf32, #tpu.memory_space<vmem>>, %arg14: memref<1x1024xf32, #tpu.memory_space<vmem>>, %arg15: memref<1x8x128xf32, #tpu.memory_space<vmem>>, %arg16: memref<1x8x128xf32, #tpu.memory_space<vmem>>, %arg17: memref<1x8x512xf32, #tpu.memory_space<vmem>>) attributes {dimension_semantics = [#tpu.dimension_semantics<parallel>], iteration_bounds = array<i64: 1>, scalar_prefetch = 0 : i64, scratch_operands = 0 : i64, tpu.core_type = #tpu.core_type<tc>, window_params = [{transform_indices = @transform_0, window_bounds = array<i64: 1, 8, 128>}, {pipeline_mode = #tpu.pipeline_mode<synchronous>, transform_indices = @transform_1, window_bounds = array<i64: 3, 128, 128>}, {pipeline_mode = #tpu.pipeline_mode<synchronous>, transform_indices = @transform_2, window_bounds = array<i64: 4, 128, 32>}, {pipeline_mode = #tpu.pipeline_mode<synchronous>, transform_indices = @transform_3, window_bounds = array<i64: 4, 128, 32>}, {pipeline_mode = #tpu.pipeline_mode<synchronous>, transform_indices = @transform_4, window_bounds = array<i64: 4, 128, 32>}, {pipeline_mode = #tpu.pipeline_mode<synchronous>, transform_indices = @transform_5, window_bounds = array<i64: 4, 32, 128>}, {pipeline_mode = #tpu.pipeline_mode<synchronous>, transform_indices = @transform_6, window_bounds = array<i64: 128, 512>}, {pipeline_mode = #tpu.pipeline_mode<synchronous>, transform_indices = @transform_7, window_bounds = array<i64: 512, 128>}, {pipeline_mode = #tpu.pipeline_mode<synchronous>, transform_indices = @transform_8, window_bounds = array<i64: 128, 128>}, {pipeline_mode = #tpu.pipeline_mode<synchronous>, transform_indices = @transform_9, window_bounds = array<i64: 128, 1024>}, {pipeline_mode = #tpu.pipeline_mode<synchronous>, transform_indices = @transform_10, window_bounds = array<i64: 10, 128>}, {pipeline_mode = #tpu.pipeline_mode<synchronous>, transform_indices = @transform_11, window_bounds = array<i64: 12, 32>}, {pipeline_mode = #tpu.pipeline_mode<synchronous>, transform_indices = @transform_12, window_bounds = array<i64: 1, 512>}, {pipeline_mode = #tpu.pipeline_mode<synchronous>, transform_indices = @transform_13, window_bounds = array<i64: 1, 1024>}, {transform_indices = @transform_14, window_bounds = array<i64: 1, 8, 128>}, {transform_indices = @transform_15, window_bounds = array<i64: 1, 8, 128>}, {transform_indices = @transform_16, window_bounds = array<i64: 1, 8, 512>}]} {
    %c0 = arith.constant 0 : index
    %c0_0 = arith.constant 0 : index
    %c0_1 = arith.constant 0 : index
    %0 = vector.load %arg1[%c0, %c0_0, %c0_1] : memref<1x8x128xf32, #tpu.memory_space<vmem>>, vector<1x8x128xf32>
    %1 = vector.shape_cast %0 : vector<1x8x128xf32> to vector<8x128xf32>
    %2 = arith.truncf %1 : vector<8x128xf32> to vector<8x128xbf16>
    %c0_2 = arith.constant 0 : index
    %c0_3 = arith.constant 0 : index
    %3 = vector.load %arg11[%c0_2, %c0_3] : memref<10x128xf32, #tpu.memory_space<vmem>>, vector<10x128xf32>
    %c0_4 = arith.constant 0 : index
    %c0_5 = arith.constant 0 : index
    %c0_6 = arith.constant 0 : index
    %4 = vector.load %arg2[%c0_4, %c0_5, %c0_6] : memref<3x128x128xbf16, #tpu.memory_space<vmem>>, vector<1x128x128xbf16>
    %5 = vector.shape_cast %4 : vector<1x128x128xbf16> to vector<128x128xbf16>
    %cst = arith.constant dense<0.000000e+00> : vector<8x128xf32>
    %6 = tpu.matmul %2, %5, %cst {dimension_numbers = #tpu.dot_dimension_numbers<[1], [0], [0], [1], [0, 0, 1, 1], [], []>} : vector<8x128xbf16>, vector<128x128xbf16>, vector<8x128xf32> -> vector<8x128xf32>
    %7 = vector.extract_strided_slice %3 {offsets = [0, 0], sizes = [1, 128], strides = [1, 1]} : vector<10x128xf32> to vector<1x128xf32>
    %8 = vector.broadcast %7 : vector<1x128xf32> to vector<8x128xf32>
    %9 = arith.addf %6, %8 : vector<8x128xf32>
    %c1 = arith.constant 1 : index
    %c0_7 = arith.constant 0 : index
    %c0_8 = arith.constant 0 : index
    %10 = vector.load %arg2[%c1, %c0_7, %c0_8] : memref<3x128x128xbf16, #tpu.memory_space<vmem>>, vector<1x128x128xbf16>
    %11 = vector.shape_cast %10 : vector<1x128x128xbf16> to vector<128x128xbf16>
    %cst_9 = arith.constant dense<0.000000e+00> : vector<8x128xf32>
    %12 = tpu.matmul %2, %11, %cst_9 {dimension_numbers = #tpu.dot_dimension_numbers<[1], [0], [0], [1], [0, 0, 1, 1], [], []>} : vector<8x128xbf16>, vector<128x128xbf16>, vector<8x128xf32> -> vector<8x128xf32>
    %13 = vector.extract_strided_slice %3 {offsets = [1, 0], sizes = [1, 128], strides = [1, 1]} : vector<10x128xf32> to vector<1x128xf32>
    %14 = vector.broadcast %13 : vector<1x128xf32> to vector<8x128xf32>
    %15 = arith.addf %12, %14 : vector<8x128xf32>
    %cst_10 = arith.constant 0.000000e+00 : f32
    %16 = vector.broadcast %cst_10 : f32 to vector<8x128xf32>
    %17 = arith.maximumf %15, %16 : vector<8x128xf32>
    %c2 = arith.constant 2 : index
    %c0_11 = arith.constant 0 : index
    %c0_12 = arith.constant 0 : index
    %18 = vector.load %arg2[%c2, %c0_11, %c0_12] : memref<3x128x128xbf16, #tpu.memory_space<vmem>>, vector<1x128x128xbf16>
    %19 = vector.shape_cast %18 : vector<1x128x128xbf16> to vector<128x128xbf16>
    %20 = arith.truncf %17 : vector<8x128xf32> to vector<8x128xbf16>
    %cst_13 = arith.constant dense<0.000000e+00> : vector<8x128xf32>
    %21 = tpu.matmul %20, %19, %cst_13 {dimension_numbers = #tpu.dot_dimension_numbers<[1], [0], [0], [1], [0, 0, 1, 1], [], []>} : vector<8x128xbf16>, vector<128x128xbf16>, vector<8x128xf32> -> vector<8x128xf32>
    %22 = vector.extract_strided_slice %3 {offsets = [2, 0], sizes = [1, 128], strides = [1, 1]} : vector<10x128xf32> to vector<1x128xf32>
    %23 = vector.broadcast %22 : vector<1x128xf32> to vector<8x128xf32>
    %24 = arith.addf %21, %23 : vector<8x128xf32>
    %25 = arith.addf %24, %9 : vector<8x128xf32>
    %c0_14 = arith.constant 0 : index
    %c0_15 = arith.constant 0 : index
    %c0_16 = arith.constant 0 : index
    %26 = vector.load %arg15[%c0_14, %c0_15, %c0_16] : memref<1x8x128xf32, #tpu.memory_space<vmem>>, vector<1x8x128xf32>
    %27 = vector.shape_cast %26 : vector<1x8x128xf32> to vector<8x128xf32>
    %28 = vector.shape_cast %25 : vector<8x128xf32> to vector<1x8x128xf32>
    tpu.vector_store %arg15[%c0_14, %c0_15, %c0_16], %28 {strides = array<i32>} : memref<1x8x128xf32, #tpu.memory_space<vmem>>, vector<1x8x128xf32>,
    %cst_17 = arith.constant 0.000000e+00 : f32
    %29 = vector.broadcast %cst_17 : f32 to vector<8x128xf32>
    %30 = arith.maximumf %25, %29 : vector<8x128xf32>
    %c0_18 = arith.constant 0 : index
    %c0_19 = arith.constant 0 : index
    %c0_20 = arith.constant 0 : index
    %31 = vector.load %arg17[%c0_18, %c0_19, %c0_20] : memref<1x8x512xf32, #tpu.memory_space<vmem>>, vector<1x8x128xf32>
    %32 = vector.shape_cast %31 : vector<1x8x128xf32> to vector<8x128xf32>
    %33 = vector.shape_cast %30 : vector<8x128xf32> to vector<1x8x128xf32>
    tpu.vector_store %arg17[%c0_18, %c0_19, %c0_20], %33 {strides = array<i32>} : memref<1x8x512xf32, #tpu.memory_space<vmem>>, vector<1x8x128xf32>,
    %c0_21 = arith.constant 0 : index
    %c0_22 = arith.constant 0 : index
    %34 = vector.load %arg12[%c0_21, %c0_22] : memref<12x32xf32, #tpu.memory_space<vmem>>, vector<12x32xf32>
    %35 = tpu.iota {dimensions = array<i32: 1>} : vector<8x8xi32>
    %c2_i32 = arith.constant 2 : i32
    %36 = vector.broadcast %c2_i32 : i32 to vector<8x8xi32>
    %37 = arith.cmpi slt, %35, %36 : vector<8x8xi32>
    %cst_23 = arith.constant 0.000000e+00 : f32
    %cst_24 = arith.constant -1.000000e+30 : f32
    %38 = vector.broadcast %cst_23 : f32 to vector<8x8xf32>
    %39 = vector.broadcast %cst_24 : f32 to vector<8x8xf32>
    %40 = arith.select %37, %38, %39 : vector<8x8xi1>, vector<8x8xf32>
    %cst_25 = arith.constant 0.000000e+00 : f32
    %41 = vector.broadcast %cst_25 : f32 to vector<8x128xf32>
    %c0_26 = arith.constant 0 : index
    %c0_27 = arith.constant 0 : index
    %c0_28 = arith.constant 0 : index
    %42 = vector.load %arg3[%c0_26, %c0_27, %c0_28] : memref<4x128x32xbf16, #tpu.memory_space<vmem>>, vector<1x128x32xbf16>
    %43 = vector.shape_cast %42 : vector<1x128x32xbf16> to vector<128x32xbf16>
    %cst_29 = arith.constant dense<0.000000e+00> : vector<8x32xf32>
    %44 = tpu.matmul %2, %43, %cst_29 {dimension_numbers = #tpu.dot_dimension_numbers<[1], [0], [0], [1], [0, 0, 1, 1], [], []>} : vector<8x128xbf16>, vector<128x32xbf16>, vector<8x32xf32> -> vector<8x32xf32>
    %45 = vector.extract_strided_slice %34 {offsets = [0, 0], sizes = [1, 32], strides = [1, 1]} : vector<12x32xf32> to vector<1x32xf32>
    %46 = vector.broadcast %45 : vector<1x32xf32> to vector<8x32xf32>
    %47 = arith.addf %44, %46 : vector<8x32xf32>
    %c0_30 = arith.constant 0 : index
    %c0_31 = arith.constant 0 : index
    %c0_32 = arith.constant 0 : index
    %48 = vector.load %arg4[%c0_30, %c0_31, %c0_32] : memref<4x128x32xbf16, #tpu.memory_space<vmem>>, vector<1x128x32xbf16>
    %49 = vector.shape_cast %48 : vector<1x128x32xbf16> to vector<128x32xbf16>
    %cst_33 = arith.constant dense<0.000000e+00> : vector<8x32xf32>
    %50 = tpu.matmul %2, %49, %cst_33 {dimension_numbers = #tpu.dot_dimension_numbers<[1], [0], [0], [1], [0, 0, 1, 1], [], []>} : vector<8x128xbf16>, vector<128x32xbf16>, vector<8x32xf32> -> vector<8x32xf32>
    %51 = vector.extract_strided_slice %34 {offsets = [4, 0], sizes = [1, 32], strides = [1, 1]} : vector<12x32xf32> to vector<1x32xf32>
    %52 = vector.broadcast %51 : vector<1x32xf32> to vector<8x32xf32>
    %53 = arith.addf %50, %52 : vector<8x32xf32>
    %c0_34 = arith.constant 0 : index
    %c0_35 = arith.constant 0 : index
    %c0_36 = arith.constant 0 : index
    %54 = vector.load %arg5[%c0_34, %c0_35, %c0_36] : memref<4x128x32xbf16, #tpu.memory_space<vmem>>, vector<1x128x32xbf16>
    %55 = vector.shape_cast %54 : vector<1x128x32xbf16> to vector<128x32xbf16>
    %cst_37 = arith.constant dense<0.000000e+00> : vector<8x32xf32>
    %56 = tpu.matmul %2, %55, %cst_37 {dimension_numbers = #tpu.dot_dimension_numbers<[1], [0], [0], [1], [0, 0, 1, 1], [], []>} : vector<8x128xbf16>, vector<128x32xbf16>, vector<8x32xf32> -> vector<8x32xf32>
    %57 = vector.extract_strided_slice %34 {offsets = [8, 0], sizes = [1, 32], strides = [1, 1]} : vector<12x32xf32> to vector<1x32xf32>
    %58 = vector.broadcast %57 : vector<1x32xf32> to vector<8x32xf32>
    %59 = arith.addf %56, %58 : vector<8x32xf32>
    %cst_38 = arith.constant 0.176776692 : f32
    %60 = vector.broadcast %cst_38 : f32 to vector<8x32xf32>
    %61 = arith.mulf %47, %60 : vector<8x32xf32>
    %62 = tpu.transpose %53, [1, 0] : vector<8x32xf32> -> vector<32x8xf32>
    %cst_39 = arith.constant dense<0.000000e+00> : vector<8x8xf32>
    %63 = tpu.matmul %61, %62, %cst_39 {dimension_numbers = #tpu.dot_dimension_numbers<[1], [0], [0], [1], [0, 0, 1, 1], [], []>} : vector<8x32xf32>, vector<32x8xf32>, vector<8x8xf32> -> vector<8x8xf32>
    %64 = arith.addf %63, %40 : vector<8x8xf32>
    %cst_40 = arith.constant dense<0xFF800000> : vector<8xf32>
    %65 = vector.multi_reduction <maximumf>, %64, %cst_40 [1] : vector<8x8xf32> to vector<8xf32>
    %66 = vector.shape_cast %65 : vector<8xf32> to vector<8x1xf32>
    %67 = vector.broadcast %66 : vector<8x1xf32> to vector<8x8xf32>
    %68 = arith.subf %64, %67 : vector<8x8xf32>
    %69 = math.exp %68 : vector<8x8xf32>
    %cst_41 = arith.constant dense<0.000000e+00> : vector<8xf32>
    %70 = vector.multi_reduction <add>, %69, %cst_41 [1] : vector<8x8xf32> to vector<8xf32>
    %71 = vector.shape_cast %70 : vector<8xf32> to vector<8x1xf32>
    %72 = tpu.reciprocal %71 {approx = true} : vector<8x1xf32> -> vector<8x1xf32>
    %73 = vector.broadcast %72 : vector<8x1xf32> to vector<8x8xf32>
    %74 = arith.mulf %69, %73 : vector<8x8xf32>
    %cst_42 = arith.constant dense<0.000000e+00> : vector<8x32xf32>
    %75 = tpu.matmul %74, %59, %cst_42 {dimension_numbers = #tpu.dot_dimension_numbers<[1], [0], [0], [1], [0, 0, 1, 1], [], []>} : vector<8x8xf32>, vector<8x32xf32>, vector<8x32xf32> -> vector<8x32xf32>
    %c0_43 = arith.constant 0 : index
    %c0_44 = arith.constant 0 : index
    %c0_45 = arith.constant 0 : index
    %76 = vector.load %arg6[%c0_43, %c0_44, %c0_45] : memref<4x32x128xbf16, #tpu.memory_space<vmem>>, vector<1x32x128xbf16>
    %77 = vector.shape_cast %76 : vector<1x32x128xbf16> to vector<32x128xbf16>
    %78 = arith.truncf %75 : vector<8x32xf32> to vector<8x32xbf16>
    %cst_46 = arith.constant dense<0.000000e+00> : vector<8x128xf32>
    %79 = tpu.matmul %78, %77, %cst_46 {dimension_numbers = #tpu.dot_dimension_numbers<[1], [0], [0], [1], [0, 0, 1, 1], [], []>} : vector<8x32xbf16>, vector<32x128xbf16>, vector<8x128xf32> -> vector<8x128xf32>
    %80 = arith.addf %41, %79 : vector<8x128xf32>
    %c1_47 = arith.constant 1 : index
    %c0_48 = arith.constant 0 : index
    %c0_49 = arith.constant 0 : index
    %81 = vector.load %arg3[%c1_47, %c0_48, %c0_49] : memref<4x128x32xbf16, #tpu.memory_space<vmem>>, vector<1x128x32xbf16>
    %82 = vector.shape_cast %81 : vector<1x128x32xbf16> to vector<128x32xbf16>
    %cst_50 = arith.constant dense<0.000000e+00> : vector<8x32xf32>
    %83 = tpu.matmul %2, %82, %cst_50 {dimension_numbers = #tpu.dot_dimension_numbers<[1], [0], [0], [1], [0, 0, 1, 1], [], []>} : vector<8x128xbf16>, vector<128x32xbf16>, vector<8x32xf32> -> vector<8x32xf32>
    %84 = vector.extract_strided_slice %34 {offsets = [1, 0], sizes = [1, 32], strides = [1, 1]} : vector<12x32xf32> to vector<1x32xf32>
    %85 = vector.broadcast %84 : vector<1x32xf32> to vector<8x32xf32>
    %86 = arith.addf %83, %85 : vector<8x32xf32>
    %c1_51 = arith.constant 1 : index
    %c0_52 = arith.constant 0 : index
    %c0_53 = arith.constant 0 : index
    %87 = vector.load %arg4[%c1_51, %c0_52, %c0_53] : memref<4x128x32xbf16, #tpu.memory_space<vmem>>, vector<1x128x32xbf16>
    %88 = vector.shape_cast %87 : vector<1x128x32xbf16> to vector<128x32xbf16>
    %cst_54 = arith.constant dense<0.000000e+00> : vector<8x32xf32>
    %89 = tpu.matmul %2, %88, %cst_54 {dimension_numbers = #tpu.dot_dimension_numbers<[1], [0], [0], [1], [0, 0, 1, 1], [], []>} : vector<8x128xbf16>, vector<128x32xbf16>, vector<8x32xf32> -> vector<8x32xf32>
    %90 = vector.extract_strided_slice %34 {offsets = [5, 0], sizes = [1, 32], strides = [1, 1]} : vector<12x32xf32> to vector<1x32xf32>
    %91 = vector.broadcast %90 : vector<1x32xf32> to vector<8x32xf32>
    %92 = arith.addf %89, %91 : vector<8x32xf32>
    %c1_55 = arith.constant 1 : index
    %c0_56 = arith.constant 0 : index
    %c0_57 = arith.constant 0 : index
    %93 = vector.load %arg5[%c1_55, %c0_56, %c0_57] : memref<4x128x32xbf16, #tpu.memory_space<vmem>>, vector<1x128x32xbf16>
    %94 = vector.shape_cast %93 : vector<1x128x32xbf16> to vector<128x32xbf16>
    %cst_58 = arith.constant dense<0.000000e+00> : vector<8x32xf32>
    %95 = tpu.matmul %2, %94, %cst_58 {dimension_numbers = #tpu.dot_dimension_numbers<[1], [0], [0], [1], [0, 0, 1, 1], [], []>} : vector<8x128xbf16>, vector<128x32xbf16>, vector<8x32xf32> -> vector<8x32xf32>
    %96 = vector.extract_strided_slice %34 {offsets = [9, 0], sizes = [1, 32], strides = [1, 1]} : vector<12x32xf32> to vector<1x32xf32>
    %97 = vector.broadcast %96 : vector<1x32xf32> to vector<8x32xf32>
    %98 = arith.addf %95, %97 : vector<8x32xf32>
    %cst_59 = arith.constant 0.176776692 : f32
    %99 = vector.broadcast %cst_59 : f32 to vector<8x32xf32>
    %100 = arith.mulf %86, %99 : vector<8x32xf32>
    %101 = tpu.transpose %92, [1, 0] : vector<8x32xf32> -> vector<32x8xf32>
    %cst_60 = arith.constant dense<0.000000e+00> : vector<8x8xf32>
    %102 = tpu.matmul %100, %101, %cst_60 {dimension_numbers = #tpu.dot_dimension_numbers<[1], [0], [0], [1], [0, 0, 1, 1], [], []>} : vector<8x32xf32>, vector<32x8xf32>, vector<8x8xf32> -> vector<8x8xf32>
    %103 = arith.addf %102, %40 : vector<8x8xf32>
    %cst_61 = arith.constant dense<0xFF800000> : vector<8xf32>
    %104 = vector.multi_reduction <maximumf>, %103, %cst_61 [1] : vector<8x8xf32> to vector<8xf32>
    %105 = vector.shape_cast %104 : vector<8xf32> to vector<8x1xf32>
    %106 = vector.broadcast %105 : vector<8x1xf32> to vector<8x8xf32>
    %107 = arith.subf %103, %106 : vector<8x8xf32>
    %108 = math.exp %107 : vector<8x8xf32>
    %cst_62 = arith.constant dense<0.000000e+00> : vector<8xf32>
    %109 = vector.multi_reduction <add>, %108, %cst_62 [1] : vector<8x8xf32> to vector<8xf32>
    %110 = vector.shape_cast %109 : vector<8xf32> to vector<8x1xf32>
    %111 = tpu.reciprocal %110 {approx = true} : vector<8x1xf32> -> vector<8x1xf32>
    %112 = vector.broadcast %111 : vector<8x1xf32> to vector<8x8xf32>
    %113 = arith.mulf %108, %112 : vector<8x8xf32>
    %cst_63 = arith.constant dense<0.000000e+00> : vector<8x32xf32>
    %114 = tpu.matmul %113, %98, %cst_63 {dimension_numbers = #tpu.dot_dimension_numbers<[1], [0], [0], [1], [0, 0, 1, 1], [], []>} : vector<8x8xf32>, vector<8x32xf32>, vector<8x32xf32> -> vector<8x32xf32>
    %c1_64 = arith.constant 1 : index
    %c0_65 = arith.constant 0 : index
    %c0_66 = arith.constant 0 : index
    %115 = vector.load %arg6[%c1_64, %c0_65, %c0_66] : memref<4x32x128xbf16, #tpu.memory_space<vmem>>, vector<1x32x128xbf16>
    %116 = vector.shape_cast %115 : vector<1x32x128xbf16> to vector<32x128xbf16>
    %117 = arith.truncf %114 : vector<8x32xf32> to vector<8x32xbf16>
    %cst_67 = arith.constant dense<0.000000e+00> : vector<8x128xf32>
    %118 = tpu.matmul %117, %116, %cst_67 {dimension_numbers = #tpu.dot_dimension_numbers<[1], [0], [0], [1], [0, 0, 1, 1], [], []>} : vector<8x32xbf16>, vector<32x128xbf16>, vector<8x128xf32> -> vector<8x128xf32>
    %119 = arith.addf %80, %118 : vector<8x128xf32>
    %c2_68 = arith.constant 2 : index
    %c0_69 = arith.constant 0 : index
    %c0_70 = arith.constant 0 : index
    %120 = vector.load %arg3[%c2_68, %c0_69, %c0_70] : memref<4x128x32xbf16, #tpu.memory_space<vmem>>, vector<1x128x32xbf16>
    %121 = vector.shape_cast %120 : vector<1x128x32xbf16> to vector<128x32xbf16>
    %cst_71 = arith.constant dense<0.000000e+00> : vector<8x32xf32>
    %122 = tpu.matmul %2, %121, %cst_71 {dimension_numbers = #tpu.dot_dimension_numbers<[1], [0], [0], [1], [0, 0, 1, 1], [], []>} : vector<8x128xbf16>, vector<128x32xbf16>, vector<8x32xf32> -> vector<8x32xf32>
    %123 = vector.extract_strided_slice %34 {offsets = [2, 0], sizes = [1, 32], strides = [1, 1]} : vector<12x32xf32> to vector<1x32xf32>
    %124 = vector.broadcast %123 : vector<1x32xf32> to vector<8x32xf32>
    %125 = arith.addf %122, %124 : vector<8x32xf32>
    %c2_72 = arith.constant 2 : index
    %c0_73 = arith.constant 0 : index
    %c0_74 = arith.constant 0 : index
    %126 = vector.load %arg4[%c2_72, %c0_73, %c0_74] : memref<4x128x32xbf16, #tpu.memory_space<vmem>>, vector<1x128x32xbf16>
    %127 = vector.shape_cast %126 : vector<1x128x32xbf16> to vector<128x32xbf16>
    %cst_75 = arith.constant dense<0.000000e+00> : vector<8x32xf32>
    %128 = tpu.matmul %2, %127, %cst_75 {dimension_numbers = #tpu.dot_dimension_numbers<[1], [0], [0], [1], [0, 0, 1, 1], [], []>} : vector<8x128xbf16>, vector<128x32xbf16>, vector<8x32xf32> -> vector<8x32xf32>
    %129 = vector.extract_strided_slice %34 {offsets = [6, 0], sizes = [1, 32], strides = [1, 1]} : vector<12x32xf32> to vector<1x32xf32>
    %130 = vector.broadcast %129 : vector<1x32xf32> to vector<8x32xf32>
    %131 = arith.addf %128, %130 : vector<8x32xf32>
    %c2_76 = arith.constant 2 : index
    %c0_77 = arith.constant 0 : index
    %c0_78 = arith.constant 0 : index
    %132 = vector.load %arg5[%c2_76, %c0_77, %c0_78] : memref<4x128x32xbf16, #tpu.memory_space<vmem>>, vector<1x128x32xbf16>
    %133 = vector.shape_cast %132 : vector<1x128x32xbf16> to vector<128x32xbf16>
    %cst_79 = arith.constant dense<0.000000e+00> : vector<8x32xf32>
    %134 = tpu.matmul %2, %133, %cst_79 {dimension_numbers = #tpu.dot_dimension_numbers<[1], [0], [0], [1], [0, 0, 1, 1], [], []>} : vector<8x128xbf16>, vector<128x32xbf16>, vector<8x32xf32> -> vector<8x32xf32>
    %135 = vector.extract_strided_slice %34 {offsets = [10, 0], sizes = [1, 32], strides = [1, 1]} : vector<12x32xf32> to vector<1x32xf32>
    %136 = vector.broadcast %135 : vector<1x32xf32> to vector<8x32xf32>
    %137 = arith.addf %134, %136 : vector<8x32xf32>
    %cst_80 = arith.constant 0.176776692 : f32
    %138 = vector.broadcast %cst_80 : f32 to vector<8x32xf32>
    %139 = arith.mulf %125, %138 : vector<8x32xf32>
    %140 = tpu.transpose %131, [1, 0] : vector<8x32xf32> -> vector<32x8xf32>
    %cst_81 = arith.constant dense<0.000000e+00> : vector<8x8xf32>
    %141 = tpu.matmul %139, %140, %cst_81 {dimension_numbers = #tpu.dot_dimension_numbers<[1], [0], [0], [1], [0, 0, 1, 1], [], []>} : vector<8x32xf32>, vector<32x8xf32>, vector<8x8xf32> -> vector<8x8xf32>
    %142 = arith.addf %141, %40 : vector<8x8xf32>
    %cst_82 = arith.constant dense<0xFF800000> : vector<8xf32>
    %143 = vector.multi_reduction <maximumf>, %142, %cst_82 [1] : vector<8x8xf32> to vector<8xf32>
    %144 = vector.shape_cast %143 : vector<8xf32> to vector<8x1xf32>
    %145 = vector.broadcast %144 : vector<8x1xf32> to vector<8x8xf32>
    %146 = arith.subf %142, %145 : vector<8x8xf32>
    %147 = math.exp %146 : vector<8x8xf32>
    %cst_83 = arith.constant dense<0.000000e+00> : vector<8xf32>
    %148 = vector.multi_reduction <add>, %147, %cst_83 [1] : vector<8x8xf32> to vector<8xf32>
    %149 = vector.shape_cast %148 : vector<8xf32> to vector<8x1xf32>
    %150 = tpu.reciprocal %149 {approx = true} : vector<8x1xf32> -> vector<8x1xf32>
    %151 = vector.broadcast %150 : vector<8x1xf32> to vector<8x8xf32>
    %152 = arith.mulf %147, %151 : vector<8x8xf32>
    %cst_84 = arith.constant dense<0.000000e+00> : vector<8x32xf32>
    %153 = tpu.matmul %152, %137, %cst_84 {dimension_numbers = #tpu.dot_dimension_numbers<[1], [0], [0], [1], [0, 0, 1, 1], [], []>} : vector<8x8xf32>, vector<8x32xf32>, vector<8x32xf32> -> vector<8x32xf32>
    %c2_85 = arith.constant 2 : index
    %c0_86 = arith.constant 0 : index
    %c0_87 = arith.constant 0 : index
    %154 = vector.load %arg6[%c2_85, %c0_86, %c0_87] : memref<4x32x128xbf16, #tpu.memory_space<vmem>>, vector<1x32x128xbf16>
    %155 = vector.shape_cast %154 : vector<1x32x128xbf16> to vector<32x128xbf16>
    %156 = arith.truncf %153 : vector<8x32xf32> to vector<8x32xbf16>
    %cst_88 = arith.constant dense<0.000000e+00> : vector<8x128xf32>
    %157 = tpu.matmul %156, %155, %cst_88 {dimension_numbers = #tpu.dot_dimension_numbers<[1], [0], [0], [1], [0, 0, 1, 1], [], []>} : vector<8x32xbf16>, vector<32x128xbf16>, vector<8x128xf32> -> vector<8x128xf32>
    %158 = arith.addf %119, %157 : vector<8x128xf32>
    %c3 = arith.constant 3 : index
    %c0_89 = arith.constant 0 : index
    %c0_90 = arith.constant 0 : index
    %159 = vector.load %arg3[%c3, %c0_89, %c0_90] : memref<4x128x32xbf16, #tpu.memory_space<vmem>>, vector<1x128x32xbf16>
    %160 = vector.shape_cast %159 : vector<1x128x32xbf16> to vector<128x32xbf16>
    %cst_91 = arith.constant dense<0.000000e+00> : vector<8x32xf32>
    %161 = tpu.matmul %2, %160, %cst_91 {dimension_numbers = #tpu.dot_dimension_numbers<[1], [0], [0], [1], [0, 0, 1, 1], [], []>} : vector<8x128xbf16>, vector<128x32xbf16>, vector<8x32xf32> -> vector<8x32xf32>
    %162 = vector.extract_strided_slice %34 {offsets = [3, 0], sizes = [1, 32], strides = [1, 1]} : vector<12x32xf32> to vector<1x32xf32>
    %163 = vector.broadcast %162 : vector<1x32xf32> to vector<8x32xf32>
    %164 = arith.addf %161, %163 : vector<8x32xf32>
    %c3_92 = arith.constant 3 : index
    %c0_93 = arith.constant 0 : index
    %c0_94 = arith.constant 0 : index
    %165 = vector.load %arg4[%c3_92, %c0_93, %c0_94] : memref<4x128x32xbf16, #tpu.memory_space<vmem>>, vector<1x128x32xbf16>
    %166 = vector.shape_cast %165 : vector<1x128x32xbf16> to vector<128x32xbf16>
    %cst_95 = arith.constant dense<0.000000e+00> : vector<8x32xf32>
    %167 = tpu.matmul %2, %166, %cst_95 {dimension_numbers = #tpu.dot_dimension_numbers<[1], [0], [0], [1], [0, 0, 1, 1], [], []>} : vector<8x128xbf16>, vector<128x32xbf16>, vector<8x32xf32> -> vector<8x32xf32>
    %168 = vector.extract_strided_slice %34 {offsets = [7, 0], sizes = [1, 32], strides = [1, 1]} : vector<12x32xf32> to vector<1x32xf32>
    %169 = vector.broadcast %168 : vector<1x32xf32> to vector<8x32xf32>
    %170 = arith.addf %167, %169 : vector<8x32xf32>
    %c3_96 = arith.constant 3 : index
    %c0_97 = arith.constant 0 : index
    %c0_98 = arith.constant 0 : index
    %171 = vector.load %arg5[%c3_96, %c0_97, %c0_98] : memref<4x128x32xbf16, #tpu.memory_space<vmem>>, vector<1x128x32xbf16>
    %172 = vector.shape_cast %171 : vector<1x128x32xbf16> to vector<128x32xbf16>
    %cst_99 = arith.constant dense<0.000000e+00> : vector<8x32xf32>
    %173 = tpu.matmul %2, %172, %cst_99 {dimension_numbers = #tpu.dot_dimension_numbers<[1], [0], [0], [1], [0, 0, 1, 1], [], []>} : vector<8x128xbf16>, vector<128x32xbf16>, vector<8x32xf32> -> vector<8x32xf32>
    %174 = vector.extract_strided_slice %34 {offsets = [11, 0], sizes = [1, 32], strides = [1, 1]} : vector<12x32xf32> to vector<1x32xf32>
    %175 = vector.broadcast %174 : vector<1x32xf32> to vector<8x32xf32>
    %176 = arith.addf %173, %175 : vector<8x32xf32>
    %cst_100 = arith.constant 0.176776692 : f32
    %177 = vector.broadcast %cst_100 : f32 to vector<8x32xf32>
    %178 = arith.mulf %164, %177 : vector<8x32xf32>
    %179 = tpu.transpose %170, [1, 0] : vector<8x32xf32> -> vector<32x8xf32>
    %cst_101 = arith.constant dense<0.000000e+00> : vector<8x8xf32>
    %180 = tpu.matmul %178, %179, %cst_101 {dimension_numbers = #tpu.dot_dimension_numbers<[1], [0], [0], [1], [0, 0, 1, 1], [], []>} : vector<8x32xf32>, vector<32x8xf32>, vector<8x8xf32> -> vector<8x8xf32>
    %181 = arith.addf %180, %40 : vector<8x8xf32>
    %cst_102 = arith.constant dense<0xFF800000> : vector<8xf32>
    %182 = vector.multi_reduction <maximumf>, %181, %cst_102 [1] : vector<8x8xf32> to vector<8xf32>
    %183 = vector.shape_cast %182 : vector<8xf32> to vector<8x1xf32>
    %184 = vector.broadcast %183 : vector<8x1xf32> to vector<8x8xf32>
    %185 = arith.subf %181, %184 : vector<8x8xf32>
    %186 = math.exp %185 : vector<8x8xf32>
    %cst_103 = arith.constant dense<0.000000e+00> : vector<8xf32>
    %187 = vector.multi_reduction <add>, %186, %cst_103 [1] : vector<8x8xf32> to vector<8xf32>
    %188 = vector.shape_cast %187 : vector<8xf32> to vector<8x1xf32>
    %189 = tpu.reciprocal %188 {approx = true} : vector<8x1xf32> -> vector<8x1xf32>
    %190 = vector.broadcast %189 : vector<8x1xf32> to vector<8x8xf32>
    %191 = arith.mulf %186, %190 : vector<8x8xf32>
    %cst_104 = arith.constant dense<0.000000e+00> : vector<8x32xf32>
    %192 = tpu.matmul %191, %176, %cst_104 {dimension_numbers = #tpu.dot_dimension_numbers<[1], [0], [0], [1], [0, 0, 1, 1], [], []>} : vector<8x8xf32>, vector<8x32xf32>, vector<8x32xf32> -> vector<8x32xf32>
    %c3_105 = arith.constant 3 : index
    %c0_106 = arith.constant 0 : index
    %c0_107 = arith.constant 0 : index
    %193 = vector.load %arg6[%c3_105, %c0_106, %c0_107] : memref<4x32x128xbf16, #tpu.memory_space<vmem>>, vector<1x32x128xbf16>
    %194 = vector.shape_cast %193 : vector<1x32x128xbf16> to vector<32x128xbf16>
    %195 = arith.truncf %192 : vector<8x32xf32> to vector<8x32xbf16>
    %cst_108 = arith.constant dense<0.000000e+00> : vector<8x128xf32>
    %196 = tpu.matmul %195, %194, %cst_108 {dimension_numbers = #tpu.dot_dimension_numbers<[1], [0], [0], [1], [0, 0, 1, 1], [], []>} : vector<8x32xbf16>, vector<32x128xbf16>, vector<8x128xf32> -> vector<8x128xf32>
    %197 = arith.addf %158, %196 : vector<8x128xf32>
    %198 = vector.extract_strided_slice %3 {offsets = [3, 0], sizes = [1, 128], strides = [1, 1]} : vector<10x128xf32> to vector<1x128xf32>
    %199 = vector.broadcast %198 : vector<1x128xf32> to vector<8x128xf32>
    %200 = arith.addf %197, %199 : vector<8x128xf32>
    %201 = arith.addf %1, %200 : vector<8x128xf32>
    %202 = vector.extract_strided_slice %3 {offsets = [4, 0], sizes = [1, 128], strides = [1, 1]} : vector<10x128xf32> to vector<1x128xf32>
    %203 = vector.extract_strided_slice %3 {offsets = [5, 0], sizes = [1, 128], strides = [1, 1]} : vector<10x128xf32> to vector<1x128xf32>
    %cst_109 = arith.constant dense<0.000000e+00> : vector<8xf32>
    %204 = vector.multi_reduction <add>, %201, %cst_109 [1] : vector<8x128xf32> to vector<8xf32>
    %205 = vector.shape_cast %204 : vector<8xf32> to vector<8x1xf32>
    %cst_110 = arith.constant 1.280000e+02 : f32
    %206 = vector.broadcast %cst_110 : f32 to vector<8x1xf32>
    %207 = arith.divf %205, %206 : vector<8x1xf32>
    %208 = vector.broadcast %207 : vector<8x1xf32> to vector<8x128xf32>
    %209 = arith.subf %201, %208 : vector<8x128xf32>
    %210 = arith.mulf %209, %209 : vector<8x128xf32>
    %cst_111 = arith.constant dense<0.000000e+00> : vector<8xf32>
    %211 = vector.multi_reduction <add>, %210, %cst_111 [1] : vector<8x128xf32> to vector<8xf32>
    %212 = vector.shape_cast %211 : vector<8xf32> to vector<8x1xf32>
    %cst_112 = arith.constant 1.280000e+02 : f32
    %213 = vector.broadcast %cst_112 : f32 to vector<8x1xf32>
    %214 = arith.divf %212, %213 : vector<8x1xf32>
    %215 = vector.broadcast %207 : vector<8x1xf32> to vector<8x128xf32>
    %216 = arith.subf %201, %215 : vector<8x128xf32>
    %cst_113 = arith.constant 9.99999974E-6 : f32
    %217 = vector.broadcast %cst_113 : f32 to vector<8x1xf32>
    %218 = arith.addf %214, %217 : vector<8x1xf32>
    %219 = math.rsqrt %218 : vector<8x1xf32>
    %220 = vector.broadcast %219 : vector<8x1xf32> to vector<8x128xf32>
    %221 = arith.mulf %216, %220 : vector<8x128xf32>
    %222 = vector.broadcast %202 : vector<1x128xf32> to vector<8x128xf32>
    %223 = arith.mulf %221, %222 : vector<8x128xf32>
    %224 = vector.broadcast %203 : vector<1x128xf32> to vector<8x128xf32>
    %225 = arith.addf %223, %224 : vector<8x128xf32>
    %c0_114 = arith.constant 0 : index
    %c0_115 = arith.constant 0 : index
    %226 = vector.load %arg7[%c0_114, %c0_115] : memref<128x512xbf16, #tpu.memory_space<vmem>>, vector<128x512xbf16>
    %227 = arith.truncf %225 : vector<8x128xf32> to vector<8x128xbf16>
    %cst_116 = arith.constant dense<0.000000e+00> : vector<8x512xf32>
    %228 = tpu.matmul %227, %226, %cst_116 {dimension_numbers = #tpu.dot_dimension_numbers<[1], [0], [0], [1], [0, 0, 1, 1], [], []>} : vector<8x128xbf16>, vector<128x512xbf16>, vector<8x512xf32> -> vector<8x512xf32>
    %c0_117 = arith.constant 0 : index
    %c0_118 = arith.constant 0 : index
    %229 = vector.load %arg13[%c0_117, %c0_118] : memref<1x512xf32, #tpu.memory_space<vmem>>, vector<1x512xf32>
    %230 = vector.broadcast %229 : vector<1x512xf32> to vector<8x512xf32>
    %231 = arith.addf %228, %230 : vector<8x512xf32>
    %cst_119 = arith.constant 0.000000e+00 : f32
    %232 = vector.broadcast %cst_119 : f32 to vector<8x512xf32>
    %233 = arith.maximumf %231, %232 : vector<8x512xf32>
    %c0_120 = arith.constant 0 : index
    %c0_121 = arith.constant 0 : index
    %234 = vector.load %arg8[%c0_120, %c0_121] : memref<512x128xbf16, #tpu.memory_space<vmem>>, vector<512x128xbf16>
    %235 = arith.truncf %233 : vector<8x512xf32> to vector<8x512xbf16>
    %cst_122 = arith.constant dense<0.000000e+00> : vector<8x128xf32>
    %236 = tpu.matmul %235, %234, %cst_122 {dimension_numbers = #tpu.dot_dimension_numbers<[1], [0], [0], [1], [0, 0, 1, 1], [], []>} : vector<8x512xbf16>, vector<512x128xbf16>, vector<8x128xf32> -> vector<8x128xf32>
    %237 = vector.extract_strided_slice %3 {offsets = [6, 0], sizes = [1, 128], strides = [1, 1]} : vector<10x128xf32> to vector<1x128xf32>
    %238 = vector.broadcast %237 : vector<1x128xf32> to vector<8x128xf32>
    %239 = arith.addf %236, %238 : vector<8x128xf32>
    %240 = arith.addf %225, %239 : vector<8x128xf32>
    %241 = vector.extract_strided_slice %3 {offsets = [7, 0], sizes = [1, 128], strides = [1, 1]} : vector<10x128xf32> to vector<1x128xf32>
    %242 = vector.extract_strided_slice %3 {offsets = [8, 0], sizes = [1, 128], strides = [1, 1]} : vector<10x128xf32> to vector<1x128xf32>
    %cst_123 = arith.constant dense<0.000000e+00> : vector<8xf32>
    %243 = vector.multi_reduction <add>, %240, %cst_123 [1] : vector<8x128xf32> to vector<8xf32>
    %244 = vector.shape_cast %243 : vector<8xf32> to vector<8x1xf32>
    %cst_124 = arith.constant 1.280000e+02 : f32
    %245 = vector.broadcast %cst_124 : f32 to vector<8x1xf32>
    %246 = arith.divf %244, %245 : vector<8x1xf32>
    %247 = vector.broadcast %246 : vector<8x1xf32> to vector<8x128xf32>
    %248 = arith.subf %240, %247 : vector<8x128xf32>
    %249 = arith.mulf %248, %248 : vector<8x128xf32>
    %cst_125 = arith.constant dense<0.000000e+00> : vector<8xf32>
    %250 = vector.multi_reduction <add>, %249, %cst_125 [1] : vector<8x128xf32> to vector<8xf32>
    %251 = vector.shape_cast %250 : vector<8xf32> to vector<8x1xf32>
    %cst_126 = arith.constant 1.280000e+02 : f32
    %252 = vector.broadcast %cst_126 : f32 to vector<8x1xf32>
    %253 = arith.divf %251, %252 : vector<8x1xf32>
    %254 = vector.broadcast %246 : vector<8x1xf32> to vector<8x128xf32>
    %255 = arith.subf %240, %254 : vector<8x128xf32>
    %cst_127 = arith.constant 9.99999974E-6 : f32
    %256 = vector.broadcast %cst_127 : f32 to vector<8x1xf32>
    %257 = arith.addf %253, %256 : vector<8x1xf32>
    %258 = math.rsqrt %257 : vector<8x1xf32>
    %259 = vector.broadcast %258 : vector<8x1xf32> to vector<8x128xf32>
    %260 = arith.mulf %255, %259 : vector<8x128xf32>
    %261 = vector.broadcast %241 : vector<1x128xf32> to vector<8x128xf32>
    %262 = arith.mulf %260, %261 : vector<8x128xf32>
    %263 = vector.broadcast %242 : vector<1x128xf32> to vector<8x128xf32>
    %264 = arith.addf %262, %263 : vector<8x128xf32>
    %c0_128 = arith.constant 0 : index
    %c0_129 = arith.constant 0 : index
    %c0_130 = arith.constant 0 : index
    %265 = vector.load %arg16[%c0_128, %c0_129, %c0_130] : memref<1x8x128xf32, #tpu.memory_space<vmem>>, vector<1x8x128xf32>
    %266 = vector.shape_cast %265 : vector<1x8x128xf32> to vector<8x128xf32>
    %267 = vector.shape_cast %264 : vector<8x128xf32> to vector<1x8x128xf32>
    tpu.vector_store %arg16[%c0_128, %c0_129, %c0_130], %267 {strides = array<i32>} : memref<1x8x128xf32, #tpu.memory_space<vmem>>, vector<1x8x128xf32>,
    %c0_131 = arith.constant 0 : index
    %c0_132 = arith.constant 0 : index
    %268 = vector.load %arg9[%c0_131, %c0_132] : memref<128x128xbf16, #tpu.memory_space<vmem>>, vector<128x128xbf16>
    %269 = arith.truncf %264 : vector<8x128xf32> to vector<8x128xbf16>
    %cst_133 = arith.constant dense<0.000000e+00> : vector<8x128xf32>
    %270 = tpu.matmul %269, %268, %cst_133 {dimension_numbers = #tpu.dot_dimension_numbers<[1], [0], [0], [1], [0, 0, 1, 1], [], []>} : vector<8x128xbf16>, vector<128x128xbf16>, vector<8x128xf32> -> vector<8x128xf32>
    %271 = vector.extract_strided_slice %3 {offsets = [9, 0], sizes = [1, 128], strides = [1, 1]} : vector<10x128xf32> to vector<1x128xf32>
    %272 = vector.broadcast %271 : vector<1x128xf32> to vector<8x128xf32>
    %273 = arith.addf %270, %272 : vector<8x128xf32>
    %c0_134 = arith.constant 0 : index
    %c0_135 = arith.constant 0 : index
    %c128 = arith.constant 128 : index
    %274 = vector.load %arg17[%c0_134, %c0_135, %c128] : memref<1x8x512xf32, #tpu.memory_space<vmem>>, vector<1x8x128xf32>
    %275 = vector.shape_cast %274 : vector<1x8x128xf32> to vector<8x128xf32>
    %276 = vector.shape_cast %273 : vector<8x128xf32> to vector<1x8x128xf32>
    tpu.vector_store %arg17[%c0_134, %c0_135, %c128], %276 {strides = array<i32>} : memref<1x8x512xf32, #tpu.memory_space<vmem>>, vector<1x8x128xf32>,
    %c0_136 = arith.constant 0 : index
    %c0_137 = arith.constant 0 : index
    %277 = vector.load %arg10[%c0_136, %c0_137] : memref<128x1024xbf16, #tpu.memory_space<vmem>>, vector<128x1024xbf16>
    %cst_138 = arith.constant dense<0.000000e+00> : vector<8x1024xf32>
    %278 = tpu.matmul %2, %277, %cst_138 {dimension_numbers = #tpu.dot_dimension_numbers<[1], [0], [0], [1], [0, 0, 1, 1], [], []>} : vector<8x128xbf16>, vector<128x1024xbf16>, vector<8x1024xf32> -> vector<8x1024xf32>
    %c0_139 = arith.constant 0 : index
    %c0_140 = arith.constant 0 : index
    %279 = vector.load %arg14[%c0_139, %c0_140] : memref<1x1024xf32, #tpu.memory_space<vmem>>, vector<1x1024xf32>
    %280 = vector.broadcast %279 : vector<1x1024xf32> to vector<8x1024xf32>
    %281 = arith.addf %278, %280 : vector<8x1024xf32>
    %282 = vector.extract_strided_slice %281 {offsets = [0, 0], sizes = [8, 512], strides = [1, 1]} : vector<8x1024xf32> to vector<8x512xf32>
    %283 = vector.extract_strided_slice %282 {offsets = [0, 0], sizes = [8, 128], strides = [1, 1]} : vector<8x512xf32> to vector<8x128xf32>
    %284 = arith.negf %283 : vector<8x128xf32>
    %285 = math.exp %284 : vector<8x128xf32>
    %cst_141 = arith.constant 1.000000e+00 : f32
    %286 = vector.broadcast %cst_141 : f32 to vector<8x128xf32>
    %287 = arith.addf %286, %285 : vector<8x128xf32>
    %288 = arith.divf %286, %287 : vector<8x128xf32>
    %289 = vector.extract_strided_slice %282 {offsets = [0, 256], sizes = [8, 128], strides = [1, 1]} : vector<8x512xf32> to vector<8x128xf32>
    %290 = math.tanh %289 : vector<8x128xf32>
    %291 = vector.extract_strided_slice %282 {offsets = [0, 384], sizes = [8, 128], strides = [1, 1]} : vector<8x512xf32> to vector<8x128xf32>
    %292 = arith.negf %291 : vector<8x128xf32>
    %293 = math.exp %292 : vector<8x128xf32>
    %cst_142 = arith.constant 1.000000e+00 : f32
    %294 = vector.broadcast %cst_142 : f32 to vector<8x128xf32>
    %295 = arith.addf %294, %293 : vector<8x128xf32>
    %296 = arith.divf %294, %295 : vector<8x128xf32>
    %297 = arith.mulf %288, %290 : vector<8x128xf32>
    %298 = math.tanh %297 : vector<8x128xf32>
    %299 = arith.mulf %296, %298 : vector<8x128xf32>
    %c0_143 = arith.constant 0 : index
    %c0_144 = arith.constant 0 : index
    %c256 = arith.constant 256 : index
    %300 = vector.load %arg17[%c0_143, %c0_144, %c256] : memref<1x8x512xf32, #tpu.memory_space<vmem>>, vector<1x8x128xf32>
    %301 = vector.shape_cast %300 : vector<1x8x128xf32> to vector<8x128xf32>
    %302 = vector.shape_cast %299 : vector<8x128xf32> to vector<1x8x128xf32>
    tpu.vector_store %arg17[%c0_143, %c0_144, %c256], %302 {strides = array<i32>} : memref<1x8x512xf32, #tpu.memory_space<vmem>>, vector<1x8x128xf32>,
    %303 = vector.extract_strided_slice %281 {offsets = [0, 512], sizes = [8, 512], strides = [1, 1]} : vector<8x1024xf32> to vector<8x512xf32>
    %304 = vector.extract_strided_slice %303 {offsets = [0, 0], sizes = [8, 128], strides = [1, 1]} : vector<8x512xf32> to vector<8x128xf32>
    %305 = arith.negf %304 : vector<8x128xf32>
    %306 = math.exp %305 : vector<8x128xf32>
    %cst_145 = arith.constant 1.000000e+00 : f32
    %307 = vector.broadcast %cst_145 : f32 to vector<8x128xf32>
    %308 = arith.addf %307, %306 : vector<8x128xf32>
    %309 = arith.divf %307, %308 : vector<8x128xf32>
    %310 = vector.extract_strided_slice %303 {offsets = [0, 256], sizes = [8, 128], strides = [1, 1]} : vector<8x512xf32> to vector<8x128xf32>
    %311 = math.tanh %310 : vector<8x128xf32>
    %312 = vector.extract_strided_slice %303 {offsets = [0, 384], sizes = [8, 128], strides = [1, 1]} : vector<8x512xf32> to vector<8x128xf32>
    %313 = arith.negf %312 : vector<8x128xf32>
    %314 = math.exp %313 : vector<8x128xf32>
    %cst_146 = arith.constant 1.000000e+00 : f32
    %315 = vector.broadcast %cst_146 : f32 to vector<8x128xf32>
    %316 = arith.addf %315, %314 : vector<8x128xf32>
    %317 = arith.divf %315, %316 : vector<8x128xf32>
    %318 = arith.mulf %309, %311 : vector<8x128xf32>
    %319 = math.tanh %318 : vector<8x128xf32>
    %320 = arith.mulf %317, %319 : vector<8x128xf32>
    %c0_147 = arith.constant 0 : index
    %c0_148 = arith.constant 0 : index
    %c384 = arith.constant 384 : index
    %321 = vector.load %arg17[%c0_147, %c0_148, %c384] : memref<1x8x512xf32, #tpu.memory_space<vmem>>, vector<1x8x128xf32>
    %322 = vector.shape_cast %321 : vector<1x8x128xf32> to vector<8x128xf32>
    %323 = vector.shape_cast %320 : vector<8x128xf32> to vector<1x8x128xf32>
    tpu.vector_store %arg17[%c0_147, %c0_148, %c384], %323 {strides = array<i32>} : memref<1x8x512xf32, #tpu.memory_space<vmem>>, vector<1x8x128xf32>,
    return
  }
  func.func @transform_0(%arg0: i32) -> (i32, i32, i32) {
    %c0_i32 = arith.constant 0 : i32
    %c0_i32_0 = arith.constant 0 : i32
    %c0_i32_1 = arith.constant 0 : i32
    return %arg0, %c0_i32, %c0_i32_0 : i32, i32, i32
  }
  func.func @transform_1(%arg0: i32) -> (i32, i32, i32) {
    %c0_i32 = arith.constant 0 : i32
    %c0_i32_0 = arith.constant 0 : i32
    %c0_i32_1 = arith.constant 0 : i32
    %c0_i32_2 = arith.constant 0 : i32
    return %c0_i32, %c0_i32_0, %c0_i32_1 : i32, i32, i32
  }
  func.func @transform_2(%arg0: i32) -> (i32, i32, i32) {
    %c0_i32 = arith.constant 0 : i32
    %c0_i32_0 = arith.constant 0 : i32
    %c0_i32_1 = arith.constant 0 : i32
    %c0_i32_2 = arith.constant 0 : i32
    return %c0_i32, %c0_i32_0, %c0_i32_1 : i32, i32, i32
  }
  func.func @transform_3(%arg0: i32) -> (i32, i32, i32) {
    %c0_i32 = arith.constant 0 : i32
    %c0_i32_0 = arith.constant 0 : i32
    %c0_i32_1 = arith.constant 0 : i32
    %c0_i32_2 = arith.constant 0 : i32
    return %c0_i32, %c0_i32_0, %c0_i32_1 : i32, i32, i32
  }
  func.func @transform_4(%arg0: i32) -> (i32, i32, i32) {
    %c0_i32 = arith.constant 0 : i32
    %c0_i32_0 = arith.constant 0 : i32
    %c0_i32_1 = arith.constant 0 : i32
    %c0_i32_2 = arith.constant 0 : i32
    return %c0_i32, %c0_i32_0, %c0_i32_1 : i32, i32, i32
  }
  func.func @transform_5(%arg0: i32) -> (i32, i32, i32) {
    %c0_i32 = arith.constant 0 : i32
    %c0_i32_0 = arith.constant 0 : i32
    %c0_i32_1 = arith.constant 0 : i32
    %c0_i32_2 = arith.constant 0 : i32
    return %c0_i32, %c0_i32_0, %c0_i32_1 : i32, i32, i32
  }
  func.func @transform_6(%arg0: i32) -> (i32, i32) {
    %c0_i32 = arith.constant 0 : i32
    %c0_i32_0 = arith.constant 0 : i32
    %c0_i32_1 = arith.constant 0 : i32
    return %c0_i32, %c0_i32_0 : i32, i32
  }
  func.func @transform_7(%arg0: i32) -> (i32, i32) {
    %c0_i32 = arith.constant 0 : i32
    %c0_i32_0 = arith.constant 0 : i32
    %c0_i32_1 = arith.constant 0 : i32
    return %c0_i32, %c0_i32_0 : i32, i32
  }
  func.func @transform_8(%arg0: i32) -> (i32, i32) {
    %c0_i32 = arith.constant 0 : i32
    %c0_i32_0 = arith.constant 0 : i32
    %c0_i32_1 = arith.constant 0 : i32
    return %c0_i32, %c0_i32_0 : i32, i32
  }
  func.func @transform_9(%arg0: i32) -> (i32, i32) {
    %c0_i32 = arith.constant 0 : i32
    %c0_i32_0 = arith.constant 0 : i32
    %c0_i32_1 = arith.constant 0 : i32
    return %c0_i32, %c0_i32_0 : i32, i32
  }
  func.func @transform_10(%arg0: i32) -> (i32, i32) {
    %c0_i32 = arith.constant 0 : i32
    %c0_i32_0 = arith.constant 0 : i32
    %c0_i32_1 = arith.constant 0 : i32
    return %c0_i32, %c0_i32_0 : i32, i32
  }
  func.func @transform_11(%arg0: i32) -> (i32, i32) {
    %c0_i32 = arith.constant 0 : i32
    %c0_i32_0 = arith.constant 0 : i32
    %c0_i32_1 = arith.constant 0 : i32
    return %c0_i32, %c0_i32_0 : i32, i32
  }
  func.func @transform_12(%arg0: i32) -> (i32, i32) {
    %c0_i32 = arith.constant 0 : i32
    %c0_i32_0 = arith.constant 0 : i32
    %c0_i32_1 = arith.constant 0 : i32
    return %c0_i32, %c0_i32_0 : i32, i32
  }
  func.func @transform_13(%arg0: i32) -> (i32, i32) {
    %c0_i32 = arith.constant 0 : i32
    %c0_i32_0 = arith.constant 0 : i32
    %c0_i32_1 = arith.constant 0 : i32
    return %c0_i32, %c0_i32_0 : i32, i32
  }
  func.func @transform_14(%arg0: i32) -> (i32, i32, i32) {
    %c0_i32 = arith.constant 0 : i32
    %c0_i32_0 = arith.constant 0 : i32
    %c0_i32_1 = arith.constant 0 : i32
    return %arg0, %c0_i32, %c0_i32_0 : i32, i32, i32
  }
  func.func @transform_15(%arg0: i32) -> (i32, i32, i32) {
    %c0_i32 = arith.constant 0 : i32
    %c0_i32_0 = arith.constant 0 : i32
    %c0_i32_1 = arith.constant 0 : i32
    return %arg0, %c0_i32, %c0_i32_0 : i32, i32, i32
  }
  func.func @transform_16(%arg0: i32) -> (i32, i32, i32) {
    %c0_i32 = arith.constant 0 : i32
    %c0_i32_0 = arith.constant 0 : i32
    %c0_i32_1 = arith.constant 0 : i32
    return %arg0, %c0_i32, %c0_i32_0 : i32, i32, i32
  }
}

</mosaic_0001>

<bundles_post_ra>
// kernel: tpu_custom_call.1
= control target key start
LH: loop header
LB: loop body
LE: loop exit
PB: predicated region body
PF: predicated region fallthrough
CT: control target
= control target key end

     0   :  { %s6851_s0 = inlined_call_operand.hbm [shape: f32[1,8,128], index: 0, kind: input, shape index: {}]   ;;  %s6852_s1 = inlined_call_operand.vmem [shape: bf16[3,128,128], index: 1, kind: input, shape index: {}]   ;;  %s6853_s2 = inlined_call_operand.vmem [shape: bf16[4,128,32], index: 2, kind: input, shape index: {}]   ;;  %s6854_s3 = inlined_call_operand.vmem [shape: bf16[4,128,32], index: 3, kind: input, shape index: {}]   ;;  %s6855_s4 = inlined_call_operand.vmem [shape: bf16[4,128,32], index: 4, kind: input, shape index: {}]   ;;  %s6856_s5 = inlined_call_operand.hbm [shape: bf16[4,32,128], index: 5, kind: input, shape index: {}]   ;;  %s6857_s6 = inlined_call_operand.vmem [shape: bf16[128,512], index: 6, kind: input, shape index: {}]   ;;  %s6858_s7 = inlined_call_operand.hbm [shape: bf16[512,128], index: 7, kind: input, shape index: {}]   ;;  %s6859_s8 = inlined_call_operand.hbm [shape: bf16[128,128], index: 8, kind: input, shape index: {}]   ;;  %s6860_s9 = inlined_call_operand.vmem [shape: bf16[128,1024], index: 9, kind: input, shape index: {}]   ;;  %s6861_s10 = inlined_call_operand.vmem [shape: f32[10,128], index: 10, kind: input, shape index: {}]   ;;  %s6862_s11 = inlined_call_operand.hbm [shape: f32[12,32], index: 11, kind: input, shape index: {}]   ;;  %s6863_s12 = inlined_call_operand.vmem [shape: f32[1,512], index: 12, kind: input, shape index: {}]   ;;  %s6864_s13 = inlined_call_operand.hbm [shape: f32[1,1024], index: 13, kind: input, shape index: {}]   ;;  %s6865_s14 = inlined_call_operand.hbm [shape: f32[1,8,128], index: 14, kind: output, shape index: {0}]   ;;  %s6866_s15 = inlined_call_operand.hbm [shape: f32[1,8,128], index: 15, kind: output, shape index: {1}]   ;;  %s6867_s16 = inlined_call_operand.hbm [shape: f32[1,8,512], index: 16, kind: output, shape index: {2}]  }
   0x1   :  { %6868 = sst [smem:[#allocation23_spill]] %s6851_s0 }
   0x2   :  { %22 = vsyncpa [#allocation3], 0 }
   0x3   :  { %23 = vsyncpa [#allocation6], 0 }
   0x4   :  { %24 = vsyncpa [#allocation9], 0 }
   0x5   :  { %25 = vsyncpa [#allocation12], 0 }
   0x6   :  { %26 = vsyncpa [#allocation4], 0 }
   0x7   :  { %27 = vsyncpa [#allocation15], 0  ;;  %s5671_s21 = smov [#allocation5]  }
   0x8   :  { %s51_s22 = sshll.u32 %s5671_s21, 4  ;;  %s52_s22 = int_to_ptr.vmem [resolvable:$true] %s51_s22 }
   0x9   :  { %s5487_s23 = scalar_lea.vmem %s52_s22, 1024  ;;  %p5492_p1 = scmp.lt.s32.totalorder %s52_s22, %s52_s22 }
   0xa   :  { %p5488_p0 = scmp.ne.s32.totalorder %s52_s22, %s5487_s23  ;;  %p5493_p2 = scmp.lt.s32.totalorder %s5487_s23, %s5487_s23 }
   0xc   :  { %p5494_p3 = por %p5493_p2, %p5492_p1 }
   0xe   :  { %p5495_p4 = pnand %p5494_p3, %p5488_p0 }
  0x10   :  { %5498 = shalt.err (!%p5495_p4)
}
  0x11   :  { %s5672_s24 = smov 64   ;;  %s5673_s25 = smov 4  }
  0x12   :  { %57 = dma.hbm_to_vmem [thread:$0]  %s6856_s5, 1024, %s52_s22, [#allocation6], %s5672_s24, %s5672_s24, %s5673_s25  }
  0x13   :  { %s5674_s28 = smov [#allocation8]   ;;  %s5675_s30 = smov [#allocation2]  }
  0x14   :  { %s77_s29 = sshll.u32 %s5674_s28, 4  ;;  %s34_s0 = sshll.u32 %s5675_s30, 4  ;;  %s78_s29 = int_to_ptr.vmem [resolvable:$true] %s77_s29  ;;  %s35_s0 = int_to_ptr.vmem [resolvable:$true] %s34_s0 }
  0x15   :  { %s5507_s17 = scalar_lea.vmem %s78_s29, 1024  ;;  %p5512_p6 = scmp.lt.s32.totalorder %s78_s29, %s78_s29 }
  0x16   :  { %p5508_p5 = scmp.ne.s32.totalorder %s78_s29, %s5507_s17  ;;  %p5513_p7 = scmp.lt.s32.totalorder %s5507_s17, %s5507_s17 }
  0x18   :  { %p5514_p8 = por %p5513_p7, %p5512_p6 }
  0x1a   :  { %p5515_p9 = pnand %p5514_p8, %p5508_p5 }
  0x1c   :  { %5518 = shalt.err (!%p5515_p9)
}
  0x1d   :  { %83 = dma.hbm_to_vmem [thread:$0]  %s6859_s8, 1024, %s78_s29, [#allocation9], %s5672_s24, %s5672_s24, %s5673_s25  }
  0x1e   :  { %s5527_s5 = scalar_lea.vmem %s35_s0, 128  ;;  %p5532_p11 = scmp.lt.s32.totalorder %s35_s0, %s35_s0 }
  0x1f   :  { %p5528_p10 = scmp.ne.s32.totalorder %s35_s0, %s5527_s5  ;;  %p5533_p12 = scmp.lt.s32.totalorder %s5527_s5, %s5527_s5 }
  0x21   :  { %p5534_p13 = por %p5533_p12, %p5532_p11 }
  0x23   :  { %p5535_p0 = pnand %p5534_p13, %p5528_p10 }
  0x25   :  { %5538 = shalt.err (!%p5535_p0)
}
  0x26   :  { %s6869_s22 = sld [smem:[#allocation23_spill]]  ;;  %s5676_s23 = smov [#allocation7]  }
  0x27   :  { %s65_s26 = sshll.u32 %s5676_s23, 4  ;;  %s5677_s27 = smov [#allocation10]   ;;  %s66_s26 = int_to_ptr.vmem [resolvable:$true] %s65_s26 }
  0x28   :  { %s93_s28 = sshll.u32 %s5677_s27, 4  ;;  %s5547_s30 = scalar_lea.vmem %s66_s26, 4096  ;;  %s94_s28 = int_to_ptr.vmem [resolvable:$true] %s93_s28 }
  0x29   :  { %p5548_p1 = scmp.ne.s32.totalorder %s66_s26, %s5547_s30  ;;  %p5552_p2 = scmp.lt.s32.totalorder %s66_s26, %s66_s26 }
  0x2a   :  { %p5553_p3 = scmp.lt.s32.totalorder %s5547_s30, %s5547_s30 }
  0x2c   :  { %37 = dma.hbm_to_vmem [thread:$0]  %s6869_s22, 128, %s35_s0, [#allocation3]  }
  0x2d   :  { %p5554_p4 = por %p5553_p3, %p5552_p2 }
  0x2f   :  { %p5555_p5 = pnand %p5554_p4, %p5548_p1 }
  0x31   :  { %5558 = shalt.err (!%p5555_p5)
}
  0x32   :  { %71 = dma.hbm_to_vmem [thread:$0]  %s6858_s7, 4096, %s66_s26, [#allocation6], %s5672_s24, %s5672_s24, %s5673_s25  }
  0x33   :  { %s5567_s0 = scalar_lea.vmem %s94_s28, 256  ;;  %p5572_p7 = scmp.lt.s32.totalorder %s94_s28, %s94_s28 }
  0x34   :  { %p5568_p6 = scmp.ne.s32.totalorder %s94_s28, %s5567_s0  ;;  %p5573_p8 = scmp.lt.s32.totalorder %s5567_s0, %s5567_s0 }
  0x36   :  { %p5574_p9 = por %p5573_p8, %p5572_p7 }
  0x38   :  { %p5575_p10 = pnand %p5574_p9, %p5568_p6 }
  0x3a   :  { %5578 = shalt.err (!%p5575_p10)
}
  0x3b   :  { %s5678_s17 = smov 128   ;;  %s5679_s18 = smov 8  }
  0x3c   :  { %99 = dma.hbm_to_vmem [thread:$0]  %s6862_s11, 256, %s94_s28, [#allocation9], %s5678_s17, %s5678_s17, %s5679_s18  }
  0x3d   :  { %s5680_s20 = smov [#allocation11]  }
  0x3e   :  { %s108_s21 = sshll.u32 %s5680_s20, 4  ;;  %s109_s21 = int_to_ptr.vmem [resolvable:$true] %s108_s21 }
  0x3f   :  { %s5587_s22 = scalar_lea.vmem %s109_s21, 128  ;;  %p5592_p12 = scmp.lt.s32.totalorder %s109_s21, %s109_s21 }
  0x40   :  { %p5588_p11 = scmp.ne.s32.totalorder %s109_s21, %s5587_s22  ;;  %p5593_p13 = scmp.lt.s32.totalorder %s5587_s22, %s5587_s22 }
  0x42   :  { %p5594_p0 = por %p5593_p13, %p5592_p12 }
  0x44   :  { %p5595_p1 = pnand %p5594_p0, %p5588_p11 }
  0x46   :  { %5598 = shalt.err (!%p5595_p1)
}
  0x47   :  { %111 = dma.hbm_to_vmem [thread:$0]  %s6864_s13, 128, %s109_s21, [#allocation12]  }
  0x48   :  { %5659 = dma.done.wait [#allocation3], 128  }
  0x49   :  { %5660 = vsyncadd [#allocation3], 4294967168 }
  0x4a   :  { %5661 = dma.done.wait [#allocation6], 5120  }
  0x4b   :  { %5662 = vsyncadd [#allocation6], 4294962176 }
  0x4c   :  { %5663 = dma.done.wait [#allocation9], 1280  }
  0x4d   :  { %5664 = vsyncadd [#allocation9], 4294966016 }
  0x4e   :  { %5665 = dma.done.wait [#allocation12], 128  }
  0x4f   :  { %5666 = vsyncadd [#allocation12], 4294967168  ;;  %v5681_v0 = vmov 0.0   ;;  %vm5682_vm0 = vmmov 0   ;;  %v5217_v1 = vld [vmem:[%s6852_s1 + $0x78] sm:$0xff]   ;;  %v5218_v2 = vld [vmem:[%s6852_s1 + $0x70] sm:$0xff]   ;;  %v151_v35 = vlaneseq }
  0x50   :  { %4828 = vmatprep.subr.bf16.mxu1 %v5681_v0  ;;  %4844 = vmatprep.mubr.msk.bf16.mxu1 %vm5682_vm0, %v5681_v0  ;;  %v5219_v3 = vld [vmem:[%s6852_s1 + $0x68] sm:$0xff]   ;;  %v5225_v4 = vld [vmem:[%s6852_s1 + $0x38] sm:$0xff]   ;;  %v5220_v5 = vld [vmem:[%s6852_s1 + $0x60] sm:$0xff]   ;;  %vm798_vm1 = vcmask 261120   ;;  %vm875_vm3 = vcmask 64512   ;;  %s5685_s26 = smov [#allocation14]  }
  0x51   :  { %4808 = vmatprep.subr.bf16.mxu0 %v5681_v0  ;;  %4824 = vmatprep.mubr.msk.bf16.mxu0 %vm5682_vm0, %v5681_v0  ;;  %v5226_v6 = vld [vmem:[%s6852_s1 + $0x30] sm:$0xff]   ;;  %v5221_v7 = vld [vmem:[%s6852_s1 + $0x58] sm:$0xff]   ;;  %v5227_v8 = vld [vmem:[%s6852_s1 + $0x28] sm:$0xff]   ;;  %v5946_v36 = vshrl.u32 %v151_v35, 7 }
  0x52   :  { %4829 = vmatpush3.bf16.msra.mxu1 %v5217_v1  ;;  %4809 = vmatpush3.bf16.msra.mxu0 %v5225_v4  ;;  %v5222_v9 = vld [vmem:[%s6852_s1 + $0x50] sm:$0xff]   ;;  %v5228_v10 = vld [vmem:[%s6852_s1 + $0x20] sm:$0xff]   ;;  %v5223_v11 = vld [vmem:[%s6852_s1 + $0x48] sm:$0xff]  }
  0x53   :  { %4830 = vmatprep.subr.bf16.mxu1 %v5681_v0  ;;  %4810 = vmatprep.subr.bf16.mxu0 %v5681_v0  ;;  %v5229_v12 = vld [vmem:[%s6852_s1 + $0x18] sm:$0xff]   ;;  %v5224_v13 = vld [vmem:[%s6852_s1 + $0x40] sm:$0xff]   ;;  %v5230_v15 = vld [vmem:[%s6852_s1 + $0x10] sm:$0xff]   ;;  %v5949_v37 = vsub.s32 1, %v5946_v36  ;;  %v5993_v63 = vsub.s32 0, %v5946_v36  ;;  %v5996_v1 = vsub.s32 2, %v5946_v36 }
  0x54   :  { %v131_v14 = vld [vmem:[#allocation2] sm:$0xff]  ;;  %v5231_v17 = vld [vmem:[%s6852_s1 + $0x8] sm:$0xff]   ;;  %v5233_v19 = vld [vmem:[%s6852_s1 + $0xb8] sm:$0xff]  }
  0x55   :  { %v5860_v16 = vpack.c.bf16 %v131_v14, %v131_v14  ;;  %v5232_v18 = vld [vmem:[%s6852_s1] sm:$0xff]   ;;  %v5234_v20 = vld [vmem:[%s6852_s1 + $0xb0] sm:$0xff]   ;;  %v5235_v21 = vld [vmem:[%s6852_s1 + $0xa8] sm:$0xff]  }
  0x56   :  { %4831 = vmatpush3.bf16.msra.mxu1 %v5218_v2  ;;  %4811 = vmatpush3.bf16.msra.mxu0 %v5226_v6  ;;  %v5236_v22 = vld [vmem:[%s6852_s1 + $0xa0] sm:$0xff]   ;;  %v5237_v23 = vld [vmem:[%s6852_s1 + $0x98] sm:$0xff]   ;;  %v5238_v24 = vld [vmem:[%s6852_s1 + $0x90] sm:$0xff]  }
  0x57   :  { %4832 = vmatprep.subr.bf16.mxu1 %v5681_v0  ;;  %4812 = vmatprep.subr.bf16.mxu0 %v5681_v0  ;;  %v5239_v25 = vld [vmem:[%s6852_s1 + $0x88] sm:$0xff]   ;;  %v5240_v26 = vld [vmem:[%s6853_s2 + $0x38] sm:$0xff]   ;;  %v5241_v27 = vld [vmem:[%s6852_s1 + $0x80] sm:$0xff]  }
  0x58   :  { %v5242_v28 = vld [vmem:[%s6853_s2 + $0x30] sm:$0xff]   ;;  %v5244_v29 = vld [vmem:[%s6853_s2 + $0x28] sm:$0xff]   ;;  %v5246_v30 = vld [vmem:[%s6853_s2 + $0x20] sm:$0xff]  }
  0x59   :  { %v5248_v31 = vld [vmem:[%s6853_s2 + $0x18] sm:$0xff]   ;;  %v5250_v32 = vld [vmem:[%s6853_s2 + $0x10] sm:$0xff]   ;;  %v5252_v33 = vld [vmem:[%s6853_s2 + $0x8] sm:$0xff]  }
  0x5a   :  { %4833 = vmatpush3.bf16.msra.mxu1 %v5219_v3  ;;  %4813 = vmatpush3.bf16.msra.mxu0 %v5227_v8  ;;  %v5254_v34 = vld [vmem:[%s6853_s2] sm:$0xff]   ;;  %v5243_v45 = vld [vmem:[%s6854_s3 + $0x38] sm:$0xff]   ;;  %v5245_v48 = vld [vmem:[%s6854_s3 + $0x30] sm:$0xff]  }
  0x5b   :  { %4834 = vmatprep.subr.bf16.mxu1 %v5681_v0  ;;  %4814 = vmatprep.subr.bf16.mxu0 %v5681_v0  ;;  %v133_v38 = vld [vmem:[%s6861_s10] sm:$0xff]  ;;  %v5247_v51 = vld [vmem:[%s6854_s3 + $0x28] sm:$0xff]   ;;  %v5251_v55 = vld [vmem:[%s6854_s3 + $0x18] sm:$0xff]  }
  0x5c   :  { %v263_v39 = vrot.slane %v133_v38, %v5949_v37  ;;  %v5249_v54 = vld [vmem:[%s6854_s3 + $0x20] sm:$0xff]   ;;  %v5253_v56 = vld [vmem:[%s6854_s3 + $0x10] sm:$0xff]   ;;  %v5255_v57 = vld [vmem:[%s6854_s3 + $0x8] sm:$0xff]   ;;  %v154_v2 = vrot.slane %v133_v38, %v5993_v63  ;;  %v374_v3 = vrot.slane %v133_v38, %v5996_v1 }
  0x5d   :  { %v5256_v58 = vld [vmem:[%s6854_s3] sm:$0xff]  }
  0x5e   :  { %4835 = vmatpush3.bf16.msra.mxu1 %v5220_v5  ;;  %4815 = vmatpush3.bf16.msra.mxu0 %v5228_v10 }
  0x5f   :  { %4836 = vmatprep.subr.bf16.mxu1 %v5681_v0  ;;  %4816 = vmatprep.subr.bf16.mxu0 %v5681_v0 }
  0x62   :  { %4837 = vmatpush3.bf16.msra.mxu1 %v5221_v7  ;;  %4817 = vmatpush3.bf16.msra.mxu0 %v5229_v12  ;;  %v6000_v12 = vld [vmem:[#allocation10] sm:$0xff] }
  0x63   :  { %4838 = vmatprep.subr.bf16.mxu1 %v5681_v0  ;;  %4818 = vmatprep.subr.bf16.mxu0 %v5681_v0  ;;  %v492_v14 = vrot.slane %v6000_v12, %v5993_v63 }
  0x66   :  { %4839 = vmatpush3.bf16.msra.mxu1 %v5222_v9  ;;  %4819 = vmatpush3.bf16.msra.mxu0 %v5230_v15 }
  0x67   :  { %4840 = vmatprep.subr.bf16.mxu1 %v5681_v0  ;;  %4820 = vmatprep.subr.bf16.mxu0 %v5681_v0 }
  0x6a   :  { %4841 = vmatpush3.bf16.msra.mxu1 %v5223_v11  ;;  %4821 = vmatpush3.bf16.msra.mxu0 %v5231_v17 }
  0x6b   :  { %4842 = vmatprep.subr.bf16.mxu1 %v5681_v0  ;;  %4822 = vmatprep.subr.bf16.mxu0 %v5681_v0 }
  0x6e   :  { %4843 = vmatpush3.bf16.msra.mxu1 %v5224_v13  ;;  %4823 = vmatpush3.bf16.msra.mxu0 %v5232_v18  ;;  %v6003_v13 = vsub.s32 4, %v5946_v36 }
  0x6f   :  { %4868 = vmatprep.subr.bf16.mxu1 %v5681_v0  ;;  %4848 = vmatprep.subr.bf16.mxu0 %v5681_v0 }
  0x70   :  { %v600_v15 = vrot.slane %v6000_v12, %v6003_v13 }
  0x71   :  { %4845 = vmatmul.mubr.bf16.vlgmr.msra.gmra.mxu1 %v5860_v16  ;;  %4825 = vmatmul.mubr.bf16.vlgmr.msra.gmra.mxu0 %v5860_v16 }
  0x72   :  { %4884 = vmatprep.mubr.msk.bf16.mxu1 %vm5682_vm0, %v5681_v0  ;;  %4849 = vmatpush3.bf16.msra.mxu0 %v5233_v19 }
  0x73   :  { %4864 = vmatprep.mubr.msk.bf16.mxu0 %vm5682_vm0, %v5681_v0  ;;  %4850 = vmatprep.subr.bf16.mxu0 %v5681_v0 }
  0x74   :  { %4869 = vmatpush3.bf16.msra.mxu1 %v5240_v26  ;;  %v5259_v26 = vld [vmem:[%s6855_s4 + $0x28] sm:$0xff]  }
  0x75   :  { %4870 = vmatprep.subr.bf16.mxu1 %v5681_v0 }
  0x76   :  { %4851 = vmatpush3.bf16.msra.mxu0 %v5234_v20 }
  0x77   :  { %4852 = vmatprep.subr.bf16.mxu0 %v5681_v0 }
  0x78   :  { %4871 = vmatpush3.bf16.msra.mxu1 %v5242_v28  ;;  %v5261_v28 = vld [vmem:[%s6855_s4 + $0x18] sm:$0xff]  }
  0x79   :  { %4872 = vmatprep.subr.bf16.mxu1 %v5681_v0 }
  0x7a   :  { %4853 = vmatpush3.bf16.msra.mxu0 %v5235_v21 }
  0x7b   :  { %4854 = vmatprep.subr.bf16.mxu0 %v5681_v0 }
  0x7c   :  { %4873 = vmatpush3.bf16.msra.mxu1 %v5244_v29  ;;  %v5262_v29 = vld [vmem:[%s6855_s4 + $0x10] sm:$0xff]  }
  0x7d   :  { %4874 = vmatprep.subr.bf16.mxu1 %v5681_v0 }
  0x7e   :  { %4855 = vmatpush3.bf16.msra.mxu0 %v5236_v22 }
  0x7f   :  { %4856 = vmatprep.subr.bf16.mxu0 %v5681_v0 }
  0x80   :  { %4875 = vmatpush3.bf16.msra.mxu1 %v5246_v30  ;;  %v5263_v30 = vld [vmem:[%s6855_s4 + $0x8] sm:$0xff]  }
  0x81   :  { %4876 = vmatprep.subr.bf16.mxu1 %v5681_v0 }
  0x82   :  { %4857 = vmatpush3.bf16.msra.mxu0 %v5237_v23 }
  0x83   :  { %4858 = vmatprep.subr.bf16.mxu0 %v5681_v0 }
  0x84   :  { %4877 = vmatpush3.bf16.msra.mxu1 %v5248_v31  ;;  %v5264_v31 = vld [vmem:[%s6855_s4] sm:$0xff]  }
  0x85   :  { %4878 = vmatprep.subr.bf16.mxu1 %v5681_v0 }
  0x86   :  { %4859 = vmatpush3.bf16.msra.mxu0 %v5238_v24  ;;  %v5257_v24 = vld [vmem:[%s6855_s4 + $0x38] sm:$0xff]  }
  0x87   :  { %4860 = vmatprep.subr.bf16.mxu0 %v5681_v0 }
  0x88   :  { %4879 = vmatpush3.bf16.msra.mxu1 %v5250_v32  ;;  %v470_v32 = vand.u32 127, %v151_v35  ;;  %v6055_v35 = vld [vmem:[#allocation10 + $0x8] sm:$0xf] }
  0x89   :  { %4880 = vmatprep.subr.bf16.mxu1 %v5681_v0 }
  0x8a   :  { %4861 = vmatpush3.bf16.msra.mxu0 %v5239_v25  ;;  %v5258_v25 = vld [vmem:[%s6855_s4 + $0x30] sm:$0xff]   ;;  %vm471_vm2 = vcmp.lt.s32.totalorder %v470_v32, 2  ;;  %v5283_v32 = vld [vmem:[%s6855_s4 + $0x68] sm:$0xff]  }
  0x8b   :  { %4862 = vmatprep.subr.bf16.mxu0 %v5681_v0 }
  0x8c   :  { %4881 = vmatpush3.bf16.msra.mxu1 %v5252_v33  ;;  %v5683_v33 = vmov -1e+30  }
  0x8d   :  { %4882 = vmatprep.subr.bf16.mxu1 %v5681_v0 }
  0x8e   :  { %4863 = vmatpush3.bf16.msra.mxu0 %v5241_v27  ;;  %v5260_v27 = vld [vmem:[%s6855_s4 + $0x20] sm:$0xff]  }
  0x8f   :  { %4888 = vmatprep.subr.bf16.mxu0 %v5681_v0 }
  0x90   :  { %4883 = vmatpush3.bf16.msra.mxu1 %v5254_v34  ;;  %v6050_v34 = vsel %vm471_vm2, 0.0, %v5683_v33  ;;  %v5284_v33 = vld [vmem:[%s6855_s4 + $0x60] sm:$0xff]  }
  0x91   :  { %4908 = vmatprep.subr.bf16.mxu1 %v5681_v0 }
  0x93   :  { %4885 = vmatmul.mubr.bf16.vlgmr.msra.gmra.mxu1 %v5860_v16 }
  0x94   :  { %4924 = vmatprep.mubr.msk.bf16.mxu1 %vm5682_vm0, %v5681_v0  ;;  %4909 = vmatpush3.bf16.msra.mxu1 %v5257_v24 }
  0x95   :  { %4910 = vmatprep.subr.bf16.mxu1 %v5681_v0 }
  0x98   :  { %4911 = vmatpush3.bf16.msra.mxu1 %v5258_v25 }
  0x99   :  { %4912 = vmatprep.subr.bf16.mxu1 %v5681_v0 }
  0x9c   :  { %4913 = vmatpush3.bf16.msra.mxu1 %v5259_v26 }
  0x9d   :  { %4914 = vmatprep.subr.bf16.mxu1 %v5681_v0 }
  0xa0   :  { %4915 = vmatpush3.bf16.msra.mxu1 %v5260_v27 }
  0xa1   :  { %4916 = vmatprep.subr.bf16.mxu1 %v5681_v0 }
  0xa4   :  { %4917 = vmatpush3.bf16.msra.mxu1 %v5261_v28 }
  0xa5   :  { %4918 = vmatprep.subr.bf16.mxu1 %v5681_v0 }
  0xa8   :  { %4919 = vmatpush3.bf16.msra.mxu1 %v5262_v29 }
  0xa9   :  { %4920 = vmatprep.subr.bf16.mxu1 %v5681_v0 }
  0xac   :  { %4921 = vmatpush3.bf16.msra.mxu1 %v5263_v30  ;;  %v5281_v30 = vld [vmem:[%s6855_s4 + $0x78] sm:$0xff]  }
  0xad   :  { %4922 = vmatprep.subr.bf16.mxu1 %v5681_v0 }
  0xb0   :  { %4923 = vmatpush3.bf16.msra.mxu1 %v5264_v31  ;;  %v5282_v31 = vld [vmem:[%s6855_s4 + $0x70] sm:$0xff]  }
  0xb1   :  { %4958 = vmatprep.subr.bf16.mxu1 %v5681_v0 }
  0xb3   :  { %4925 = vmatmul.mubr.bf16.vlgmr.msra.gmra.mxu1 %v5860_v16 }
  0xb4   :  { %4974 = vmatprep.mubr.msk.bf16.mxu1 %vm5682_vm0, %v5681_v0 }
 0x131   :  { %v346_v40 = vpop.f32.mrf.mxu1  ;;  %v237_v49 = vpop.f32.mrf.mxu0 }
 0x132   :  { %v347_v41 = vadd.f32 %v346_v40, %v263_v39  ;;  %v238_v5 = vadd.f32 %v237_v49, %v154_v2  ;;  %v708_v49 = vrot.slane %v6055_v35, %v5993_v63  ;;  %v5267_v2 = vld [vmem:[%s6853_s2 + $0x78] sm:$0xff]  }
 0x133   :  { %v4846_v42 = vpop.f32.mrf.mxu1  ;;  %v4826_v50 = vpop.f32.mrf.mxu0 }
 0x134   :  { %v352_v43 = vmax.f32 %v347_v41, 0.0 }
 0x135   :  { %v349_v44 = vpop.f32.mrf.mxu1  ;;  %v240_v52 = vpop.f32.mrf.mxu0 }
 0x136   :  { %v370_v46 = vpack.c.bf16 %v352_v43, %v352_v43 }
 0x137   :  { %v4847_v47 = vpop.f32.mrf.mxu1  ;;  %v4827_v53 = vpop.f32.mrf.mxu0 }
 0x138   :  { %4865 = vmatmul.mubr.bf16.vlgmr.msra.gmra.mxu0 %v370_v46 }
 0x139   :  { %4889 = vmatpush3.bf16.msra.mxu0 %v5243_v45  ;;  %4904 = vmatprep.mubr.msk.bf16.mxu0 %vm5682_vm0, %v5681_v0 }
 0x13a   :  { %4890 = vmatprep.subr.bf16.mxu0 %v5681_v0 }
 0x13d   :  { %4891 = vmatpush3.bf16.msra.mxu0 %v5245_v48  ;;  %v5265_v48 = vld [vmem:[%s6854_s3 + $0x78] sm:$0xff]  }
 0x13e   :  { %4892 = vmatprep.subr.bf16.mxu0 %v5681_v0  ;;  %4959 = vmatpush3.bf16.msra.mxu1 %v5265_v48 }
 0x13f   :  { %4960 = vmatprep.subr.bf16.mxu1 %v5681_v0 }
 0x141   :  { %4893 = vmatpush3.bf16.msra.mxu0 %v5247_v51  ;;  %v5266_v51 = vld [vmem:[%s6854_s3 + $0x70] sm:$0xff]  }
 0x142   :  { %4894 = vmatprep.subr.bf16.mxu0 %v5681_v0  ;;  %4961 = vmatpush3.bf16.msra.mxu1 %v5266_v51  ;;  %v1203_v51 = vrot.slane %v6055_v35, %v5949_v37 }
 0x143   :  { %4962 = vmatprep.subr.bf16.mxu1 %v5681_v0 }
 0x145   :  { %4895 = vmatpush3.bf16.msra.mxu0 %v5249_v54 }
 0x146   :  { %4896 = vmatprep.subr.bf16.mxu0 %v5681_v0 }
 0x149   :  { %4897 = vmatpush3.bf16.msra.mxu0 %v5251_v55  ;;  %v5268_v55 = vld [vmem:[%s6854_s3 + $0x68] sm:$0xff]  }
 0x14a   :  { %4898 = vmatprep.subr.bf16.mxu0 %v5681_v0  ;;  %4963 = vmatpush3.bf16.msra.mxu1 %v5268_v55 }
 0x14b   :  { %4964 = vmatprep.subr.bf16.mxu1 %v5681_v0 }
 0x14d   :  { %4899 = vmatpush3.bf16.msra.mxu0 %v5253_v56  ;;  %v5270_v56 = vld [vmem:[%s6854_s3 + $0x60] sm:$0xff]  }
 0x14e   :  { %4900 = vmatprep.subr.bf16.mxu0 %v5681_v0  ;;  %4965 = vmatpush3.bf16.msra.mxu1 %v5270_v56 }
 0x14f   :  { %4966 = vmatprep.subr.bf16.mxu1 %v5681_v0 }
 0x151   :  { %4901 = vmatpush3.bf16.msra.mxu0 %v5255_v57  ;;  %v5272_v57 = vld [vmem:[%s6854_s3 + $0x58] sm:$0xff]  }
 0x152   :  { %4902 = vmatprep.subr.bf16.mxu0 %v5681_v0  ;;  %4967 = vmatpush3.bf16.msra.mxu1 %v5272_v57  ;;  %v5291_v57 = vld [vmem:[#allocation5 + $0x18] sm:$0xff]  }
 0x153   :  { %v575_v59 = vpop.f32.mrf.mxu1  ;;  %4968 = vmatprep.subr.bf16.mxu1 %v5681_v0 }
 0x154   :  { %v576_v17 = vadd.f32 %v575_v59, %v492_v14  ;;  %v5276_v59 = vld [vmem:[%s6854_s3 + $0x48] sm:$0xff]  }
 0x155   :  { %4903 = vmatpush3.bf16.msra.mxu0 %v5256_v58  ;;  %v4886_v60 = vpop.f32.mrf.mxu1  ;;  %v5274_v58 = vld [vmem:[%s6854_s3 + $0x50] sm:$0xff]  }
 0x156   :  { %4928 = vmatprep.subr.mxu0 %v5681_v0  ;;  %v797_v20 = vmul.f32 0.17677669, %v576_v17  ;;  %4969 = vmatpush3.bf16.msra.mxu1 %v5274_v58  ;;  %v5278_v60 = vld [vmem:[%s6854_s3 + $0x40] sm:$0xff]   ;;  %v5292_v58 = vld [vmem:[#allocation5 + $0x10] sm:$0xff]  }
 0x157   :  { %v578_v61 = vpop.f32.mrf.mxu1  ;;  %4970 = vmatprep.subr.bf16.mxu1 %v5681_v0 }
 0x158   :  { %4905 = vmatmul.mubr.bf16.vlgmr.msra.gmra.mxu0 %v5860_v16 }
 0x159   :  { %4930 = vmatprep.mubr.msk.f32.mxu0 %vm5682_vm0, %v5681_v0  ;;  %v4887_v62 = vpop.f32.mrf.mxu1 }
 0x15a   :  { %4971 = vmatpush3.bf16.msra.mxu1 %v5276_v59 }
 0x15b   :  { %4972 = vmatprep.subr.bf16.mxu1 %v5681_v0 }
 0x15e   :  { %4973 = vmatpush3.bf16.msra.mxu1 %v5278_v60 }
 0x15f   :  { %4998 = vmatprep.subr.mxu1 %v5681_v0 }
 0x161   :  { %4975 = vmatmul.mubr.bf16.vlgmr.msra.gmra.mxu1 %v5860_v16 }
 0x162   :  { %5000 = vmatprep.mubr.msk.f32.mxu1 %vm5682_vm0, %v5681_v0 }
 0x173   :  { %v791_v47 = vpop.f32.mrf.mxu1 }
 0x174   :  { %v792_v52 = vadd.f32 %v791_v47, %v708_v49 }
 0x175   :  { %v4926_v50 = vpop.f32.mrf.mxu1 }
 0x177   :  { %v794_v53 = vpop.f32.mrf.mxu1 }
 0x179   :  { %v4927_v54 = vpop.f32.mrf.mxu1 }
 0x1f8   :  { %v457_v4 = vpop.f32.mrf.mxu0 }
 0x1f9   :  { %v458_v6 = vadd.f32 %v457_v4, %v374_v3  ;;  %v5269_v4 = vld [vmem:[%s6853_s2 + $0x70] sm:$0xff]  }
 0x1fa   :  { %v4866_v7 = vpop.f32.mrf.mxu0 }
 0x1fb   :  { %v463_v8 = vadd.f32 %v458_v6, %v238_v5  ;;  %v5271_v5 = vld [vmem:[%s6853_s2 + $0x68] sm:$0xff]   ;;  %v5273_v6 = vld [vmem:[%s6853_s2 + $0x60] sm:$0xff]   ;;  %v5275_v7 = vld [vmem:[%s6853_s2 + $0x58] sm:$0xff]  }
 0x1fc   :  { %v460_v9 = vpop.f32.mrf.mxu0 }
 0x1fd   :  { %v465_v10 = vmax.f32 %v463_v8, 0.0  ;;  %464 = vst [vmem:[#allocation13] sm:$0xff] %v463_v8  ;;  %v5277_v8 = vld [vmem:[%s6853_s2 + $0x50] sm:$0xff]   ;;  %v5279_v9 = vld [vmem:[%s6853_s2 + $0x48] sm:$0xff]  }
 0x1fe   :  { %v4867_v11 = vpop.f32.mrf.mxu0 }
 0x1ff   :  { %466 = vst [vmem:[#allocation16] sm:$0xff] %v465_v10  ;;  %v5280_v10 = vld [vmem:[%s6853_s2 + $0x40] sm:$0xff]   ;;  %v1093_v11 = vsub.s32 5, %v5946_v36 }
 0x201   :  { %v1094_v14 = vrot.slane %v6000_v12, %v1093_v11 }
 0x218   :  { %v683_v18 = vpop.f32.mrf.mxu0 }
 0x219   :  { %v684_v19 = vadd.f32 %v683_v18, %v600_v15 }
 0x21a   :  { %v4906_v21 = vpop.f32.mrf.mxu0 }
 0x21b   :  { %4929 = vmatpush3.xpose.msk.msra.mxu0 %vm798_vm1, %v684_v19 }
 0x21c   :  { %v686_v22 = vpop.f32.mrf.mxu0  ;;  %4933 = vmatprep.subr.mxu0 %v5681_v0 }
 0x21e   :  { %v4907_v23 = vpop.f32.mrf.mxu0  ;;  %4931 = vmatmul.mubr.msk.f32.vlgmr.msra.gmra.mxu0 %vm798_vm1, %v797_v20 }
 0x21f   :  { %4935 = vmatprep.mubr.msk.f32.mxu0 %vm5682_vm0, %v5681_v0  ;;  %4934 = vmatpush3.msra.mxu0 %v792_v52  ;;  %v985_v23 = vrot.slane %v6000_v12, %v5949_v37 }
 0x220   :  { %4938 = vmatprep.subr.bf16.mxu0 %v5681_v0 }
 0x221   :  { %v1177_v15 = vpop.f32.mrf.mxu1 }
 0x222   :  { %v1178_v17 = vadd.f32 %v1177_v15, %v1094_v14  ;;  %v5307_v14 = vld [vmem:[%s6853_s2 + $0x80] sm:$0xff]  }
 0x223   :  { %v4976_v18 = vpop.f32.mrf.mxu1 }
 0x224   :  { %4999 = vmatpush3.xpose.msk.msra.mxu1 %vm798_vm1, %v1178_v17  ;;  %v5294_v17 = vld [vmem:[%s6854_s3 + $0xb8] sm:$0xff]  }
 0x225   :  { %v1180_v19 = vpop.f32.mrf.mxu1  ;;  %5003 = vmatprep.subr.mxu1 %v5681_v0 }
 0x227   :  { %v4977_v20 = vpop.f32.mrf.mxu1 }
 0x228   :  { %v5296_v20 = vld [vmem:[%s6854_s3 + $0xb0] sm:$0xff]  }
 0x2de   :  { %v871_v38 = vpop.f32.mrf.mxu0 }
 0x2df   :  { %v872_v39 = vadd.f32 %v871_v38, %v6050_v34  ;;  %v5285_v38 = vld [vmem:[%s6855_s4 + $0x58] sm:$0xff]  }
 0x2e0   :  { %v4932_v40 = vpop.f32.mrf.mxu0 }
 0x2e1   :  { %v876_v41 = vsel %vm875_vm3, %v872_v39, -inf  ;;  %v5287_v40 = vld [vmem:[%s6855_s4 + $0x48] sm:$0xff]  }
 0x2e2   :  { %877 = vmax.xlane.f32.xlu0 %v876_v41  ;;  %v5288_v41 = vld [vmem:[%s6855_s4 + $0x40] sm:$0xff]  }
 0x36b   :  { %v878_v42 = vpop.xlane.xlu0 %877 }
 0x36c   :  { %v879_v43 = vsub.f32 %v872_v39, %v878_v42  ;;  %v5286_v39 = vld [vmem:[%s6855_s4 + $0x50] sm:$0xff]  }
 0x36e   :  { %v880_v44 = vmul.f32 1.442695, %v879_v43 }
 0x370   :  { %5433 = vpow2.f32 %v880_v44 }
 0x37d   :  { %v5434_v45 = vpop.eup %5433 }
 0x37e   :  { %v882_v46 = vsel %vm875_vm3, %v5434_v45, 0.0 }
 0x37f   :  { %883 = vadd.xlane.f32.xlu0 %v882_v46 }
 0x408   :  { %v884_v61 = vpop.xlane.xlu0 %883 }
 0x409   :  { %5435 = vrcp.f32 %v884_v61  ;;  %v5289_v61 = vld [vmem:[#allocation5 + $0x8] sm:$0xff]  }
 0x416   :  { %v5436_v62 = vpop.eup %5435 }
 0x417   :  { %v886_v3 = vmul.f32 %v5436_v62, %v5434_v45 }
 0x419   :  { %4936 = vmatmul.mubr.msk.f32.vlgmr.msra.gmra.mxu0 %vm875_vm3, %v886_v3 }
 0x41a   :  { %4939 = vmatpush3.bf16.msra.mxu0 %v5267_v2  ;;  %4954 = vmatprep.mubr.msk.bf16.mxu0 %vm5682_vm0, %v5681_v0  ;;  %v5290_v2 = vld [vmem:[#allocation5] sm:$0xff]  }
 0x41b   :  { %4940 = vmatprep.subr.bf16.mxu0 %v5681_v0 }
 0x41e   :  { %4941 = vmatpush3.bf16.msra.mxu0 %v5269_v4  ;;  %v5293_v4 = vld [vmem:[%s6853_s2 + $0xb8] sm:$0xff]  }
 0x41f   :  { %4942 = vmatprep.subr.bf16.mxu0 %v5681_v0 }
 0x422   :  { %4943 = vmatpush3.bf16.msra.mxu0 %v5271_v5  ;;  %v5295_v5 = vld [vmem:[%s6853_s2 + $0xb0] sm:$0xff]  }
 0x423   :  { %4944 = vmatprep.subr.bf16.mxu0 %v5681_v0 }
 0x426   :  { %4945 = vmatpush3.bf16.msra.mxu0 %v5273_v6  ;;  %v5297_v6 = vld [vmem:[%s6853_s2 + $0xa8] sm:$0xff]  }
 0x427   :  { %4946 = vmatprep.subr.bf16.mxu0 %v5681_v0 }
 0x42a   :  { %4947 = vmatpush3.bf16.msra.mxu0 %v5275_v7  ;;  %v5299_v7 = vld [vmem:[%s6853_s2 + $0xa0] sm:$0xff]  }
 0x42b   :  { %4948 = vmatprep.subr.bf16.mxu0 %v5681_v0 }
 0x42e   :  { %4949 = vmatpush3.bf16.msra.mxu0 %v5277_v8  ;;  %v5301_v8 = vld [vmem:[%s6853_s2 + $0x98] sm:$0xff]  }
 0x42f   :  { %4950 = vmatprep.subr.bf16.mxu0 %v5681_v0 }
 0x432   :  { %4951 = vmatpush3.bf16.msra.mxu0 %v5279_v9  ;;  %v5303_v9 = vld [vmem:[%s6853_s2 + $0x90] sm:$0xff]  }
 0x433   :  { %4952 = vmatprep.subr.bf16.mxu0 %v5681_v0 }
 0x436   :  { %4953 = vmatpush3.bf16.msra.mxu0 %v5280_v10  ;;  %v5305_v10 = vld [vmem:[%s6853_s2 + $0x88] sm:$0xff]  }
 0x437   :  { %4978 = vmatprep.subr.bf16.mxu0 %v5681_v0 }
 0x439   :  { %4955 = vmatmul.mubr.bf16.vlgmr.msra.gmra.mxu0 %v5860_v16 }
 0x43a   :  { %4994 = vmatprep.mubr.msk.bf16.mxu0 %vm5682_vm0, %v5681_v0  ;;  %4979 = vmatpush3.bf16.msra.mxu0 %v5281_v30  ;;  %v5308_v30 = vld [vmem:[%s6854_s3 + $0x80] sm:$0xff]  }
 0x43b   :  { %4980 = vmatprep.subr.bf16.mxu0 %v5681_v0 }
 0x43e   :  { %4981 = vmatpush3.bf16.msra.mxu0 %v5282_v31 }
 0x43f   :  { %4982 = vmatprep.subr.bf16.mxu0 %v5681_v0 }
 0x442   :  { %4983 = vmatpush3.bf16.msra.mxu0 %v5283_v32 }
 0x443   :  { %4984 = vmatprep.subr.bf16.mxu0 %v5681_v0 }
 0x446   :  { %4985 = vmatpush3.bf16.msra.mxu0 %v5284_v33 }
 0x447   :  { %4986 = vmatprep.subr.bf16.mxu0 %v5681_v0 }
 0x44a   :  { %4987 = vmatpush3.bf16.msra.mxu0 %v5285_v38 }
 0x44b   :  { %4988 = vmatprep.subr.bf16.mxu0 %v5681_v0 }
 0x44e   :  { %4989 = vmatpush3.bf16.msra.mxu0 %v5286_v39 }
 0x44f   :  { %4990 = vmatprep.subr.bf16.mxu0 %v5681_v0 }
 0x452   :  { %4991 = vmatpush3.bf16.msra.mxu0 %v5287_v40 }
 0x453   :  { %4992 = vmatprep.subr.bf16.mxu0 %v5681_v0 }
 0x456   :  { %4993 = vmatpush3.bf16.msra.mxu0 %v5288_v41 }
 0x457   :  { %5008 = vmatprep.subr.bf16.mxu0 %v5681_v0 }
 0x459   :  { %4995 = vmatmul.mubr.bf16.vlgmr.msra.gmra.mxu0 %v5860_v16 }
 0x45a   :  { %5012 = vmatprep.mubr.msk.bf16.mxu0 %vm5682_vm0, %v5681_v0  ;;  %5009 = vmatpush3.bf16.msra.mxu0 %v5291_v57  ;;  %v5313_v57 = vld [vmem:[%s6855_s4 + $0x98] sm:$0xff]  }
 0x45b   :  { %5010 = vmatprep.subr.bf16.mxu0 %v5681_v0 }
 0x45e   :  { %5011 = vmatpush3.bf16.msra.mxu0 %v5292_v58  ;;  %v5314_v58 = vld [vmem:[%s6855_s4 + $0x90] sm:$0xff]  }
 0x45f   :  { %5044 = vmatprep.subr.bf16.mxu0 %v5681_v0 }
 0x4d9   :  { %v6139_v21 = vpop.f32.mrf.mxu0 }
 0x4da   :  { %v964_v3 = vpack.c.bf16 %v6139_v21, %v6139_v21 }
 0x4db   :  { %v4937_v22 = vpop.f32.mrf.mxu0 }
 0x4dc   :  { %v5298_v22 = vld [vmem:[%s6854_s3 + $0xa8] sm:$0xff]  }
 0x4f9   :  { %v1068_v24 = vpop.f32.mrf.mxu0 }
 0x4fa   :  { %v1069_v25 = vadd.f32 %v1068_v24, %v985_v23 }
 0x4fb   :  { %v4956_v26 = vpop.f32.mrf.mxu0 }
 0x4fc   :  { %v1292_v27 = vmul.f32 0.17677669, %v1069_v25  ;;  %v5300_v25 = vld [vmem:[%s6854_s3 + $0xa0] sm:$0xff]  }
 0x4fd   :  { %v1071_v28 = vpop.f32.mrf.mxu0 }
 0x4fe   :  { %5001 = vmatmul.mubr.msk.f32.vlgmr.msra.gmra.mxu1 %vm798_vm1, %v1292_v27  ;;  %v5302_v27 = vld [vmem:[%s6854_s3 + $0x98] sm:$0xff]   ;;  %v5304_v28 = vld [vmem:[%s6854_s3 + $0x90] sm:$0xff]  }
 0x4ff   :  { %v4957_v29 = vpop.f32.mrf.mxu0  ;;  %5005 = vmatprep.mubr.msk.f32.mxu1 %vm5682_vm0, %v5681_v0 }
 0x500   :  { %v5306_v29 = vld [vmem:[%s6854_s3 + $0x88] sm:$0xff]  }
 0x519   :  { %v1286_v52 = vpop.f32.mrf.mxu0 }
 0x51a   :  { %v1287_v53 = vadd.f32 %v1286_v52, %v1203_v51 }
 0x51b   :  { %v4996_v54 = vpop.f32.mrf.mxu0 }
 0x51c   :  { %5004 = vmatpush3.msra.mxu1 %v1287_v53  ;;  %v5309_v53 = vld [vmem:[%s6855_s4 + $0xb8] sm:$0xff]   ;;  %v5310_v54 = vld [vmem:[%s6855_s4 + $0xb0] sm:$0xff]  }
 0x51d   :  { %v1289_v55 = vpop.f32.mrf.mxu0  ;;  %5016 = vmatprep.subr.bf16.mxu1 %v5681_v0 }
 0x51e   :  { %v5311_v55 = vld [vmem:[%s6855_s4 + $0xa8] sm:$0xff]  }
 0x51f   :  { %v4997_v56 = vpop.f32.mrf.mxu0 }
 0x520   :  { %v5312_v56 = vld [vmem:[%s6855_s4 + $0xa0] sm:$0xff]  }
 0x5be   :  { %v1365_v42 = vpop.f32.mrf.mxu1 }
 0x5bf   :  { %v1366_v43 = vadd.f32 %v1365_v42, %v6050_v34 }
 0x5c0   :  { %v5002_v44 = vpop.f32.mrf.mxu1 }
 0x5c1   :  { %v1369_v45 = vsel %vm875_vm3, %v1366_v43, -inf  ;;  %v1589_v44 = vrot.slane %v6000_v12, %v5996_v1 }
 0x5c2   :  { %1370 = vmax.xlane.f32.xlu1 %v1369_v45 }
 0x64b   :  { %v1371_v46 = vpop.xlane.xlu1 %1370 }
 0x64c   :  { %v1372_v47 = vsub.f32 %v1366_v43, %v1371_v46  ;;  %v6277_v43 = vsub.s32 6, %v5946_v36 }
 0x64e   :  { %v1373_v48 = vmul.f32 1.442695, %v1372_v47  ;;  %v1698_v45 = vrot.slane %v6000_v12, %v6277_v43 }
 0x650   :  { %5437 = vpow2.f32 %v1373_v48 }
 0x65d   :  { %v5438_v49 = vpop.eup %5437 }
 0x65e   :  { %v1375_v50 = vsel %vm875_vm3, %v5438_v49, 0.0 }
 0x65f   :  { %1376 = vadd.xlane.f32.xlu1 %v1375_v50 }
 0x6e8   :  { %v1377_v59 = vpop.xlane.xlu1 %1376 }
 0x6e9   :  { %5439 = vrcp.f32 %v1377_v59  ;;  %v5315_v59 = vld [vmem:[%s6855_s4 + $0x88] sm:$0xff]  }
 0x6f6   :  { %v5440_v60 = vpop.eup %5439 }
 0x6f7   :  { %v1379_v62 = vmul.f32 %v5440_v60, %v5438_v49  ;;  %v5316_v60 = vld [vmem:[%s6855_s4 + $0x80] sm:$0xff]  }
 0x6f9   :  { %5006 = vmatmul.mubr.msk.f32.vlgmr.msra.gmra.mxu1 %vm875_vm3, %v1379_v62 }
 0x6fa   :  { %5017 = vmatpush3.bf16.msra.mxu1 %v5289_v61  ;;  %5020 = vmatprep.mubr.msk.bf16.mxu1 %vm5682_vm0, %v5681_v0 }
 0x6fb   :  { %5018 = vmatprep.subr.bf16.mxu1 %v5681_v0 }
 0x6fe   :  { %5019 = vmatpush3.bf16.msra.mxu1 %v5290_v2 }
 0x6ff   :  { %5024 = vmatprep.subr.bf16.mxu1 %v5681_v0 }
 0x701   :  { %5021 = vmatmul.mubr.msk.bf16.vlgmr.msra.gmra.mxu1 %vm798_vm1, %v964_v3 }
 0x702   :  { %5040 = vmatprep.mubr.msk.bf16.mxu1 %vm5682_vm0, %v5681_v0  ;;  %5025 = vmatpush3.bf16.msra.mxu1 %v5293_v4 }
 0x703   :  { %5026 = vmatprep.subr.bf16.mxu1 %v5681_v0 }
 0x706   :  { %5027 = vmatpush3.bf16.msra.mxu1 %v5295_v5 }
 0x707   :  { %5028 = vmatprep.subr.bf16.mxu1 %v5681_v0 }
 0x70a   :  { %5029 = vmatpush3.bf16.msra.mxu1 %v5297_v6 }
 0x70b   :  { %5030 = vmatprep.subr.bf16.mxu1 %v5681_v0 }
 0x70e   :  { %5031 = vmatpush3.bf16.msra.mxu1 %v5299_v7 }
 0x70f   :  { %5032 = vmatprep.subr.bf16.mxu1 %v5681_v0 }
 0x712   :  { %5033 = vmatpush3.bf16.msra.mxu1 %v5301_v8 }
 0x713   :  { %5034 = vmatprep.subr.bf16.mxu1 %v5681_v0 }
 0x716   :  { %5035 = vmatpush3.bf16.msra.mxu1 %v5303_v9  ;;  %v1807_v9 = vrot.slane %v6055_v35, %v5996_v1 }
 0x717   :  { %5036 = vmatprep.subr.bf16.mxu1 %v5681_v0 }
 0x71a   :  { %5037 = vmatpush3.bf16.msra.mxu1 %v5305_v10 }
 0x71b   :  { %5038 = vmatprep.subr.bf16.mxu1 %v5681_v0 }
 0x71e   :  { %5039 = vmatpush3.bf16.msra.mxu1 %v5307_v14 }
 0x71f   :  { %5064 = vmatprep.subr.bf16.mxu1 %v5681_v0 }
 0x721   :  { %5041 = vmatmul.mubr.bf16.vlgmr.msra.gmra.mxu1 %v5860_v16 }
 0x722   :  { %5080 = vmatprep.mubr.msk.bf16.mxu1 %vm5682_vm0, %v5681_v0  ;;  %5065 = vmatpush3.bf16.msra.mxu1 %v5309_v53 }
 0x723   :  { %5066 = vmatprep.subr.bf16.mxu1 %v5681_v0 }
 0x726   :  { %5067 = vmatpush3.bf16.msra.mxu1 %v5310_v54 }
 0x727   :  { %5068 = vmatprep.subr.bf16.mxu1 %v5681_v0 }
 0x72a   :  { %5069 = vmatpush3.bf16.msra.mxu1 %v5311_v55 }
 0x72b   :  { %5070 = vmatprep.subr.bf16.mxu1 %v5681_v0 }
 0x72e   :  { %5071 = vmatpush3.bf16.msra.mxu1 %v5312_v56 }
 0x72f   :  { %5072 = vmatprep.subr.bf16.mxu1 %v5681_v0 }
 0x732   :  { %5073 = vmatpush3.bf16.msra.mxu1 %v5313_v57 }
 0x733   :  { %5074 = vmatprep.subr.bf16.mxu1 %v5681_v0 }
 0x736   :  { %5075 = vmatpush3.bf16.msra.mxu1 %v5314_v58 }
 0x737   :  { %5076 = vmatprep.subr.bf16.mxu1 %v5681_v0 }
 0x73a   :  { %5077 = vmatpush3.bf16.msra.mxu1 %v5315_v59 }
 0x73b   :  { %5078 = vmatprep.subr.bf16.mxu1 %v5681_v0 }
 0x73e   :  { %5079 = vmatpush3.bf16.msra.mxu1 %v5316_v60 }
 0x73f   :  { %5122 = vmatprep.subr.bf16.mxu1 %v5681_v0 }
 0x741   :  { %5081 = vmatmul.mubr.bf16.vlgmr.msra.gmra.mxu1 %v5860_v16 }
 0x742   :  { %5138 = vmatprep.mubr.msk.bf16.mxu1 %vm5682_vm0, %v5681_v0 }
 0x7b9   :  { %v1449_v15 = vpop.f32.mrf.mxu1 }
 0x7ba   :  { %v1458_v18 = vpack.c.bf16 %v1449_v15, %v1449_v15 }
 0x7bb   :  { %v5007_v19 = vpop.f32.mrf.mxu1 }
 0x7bc   :  { %5013 = vmatmul.mubr.msk.bf16.vlgmr.msra.gmra.mxu0 %vm798_vm1, %v1458_v18  ;;  %v5318_v19 = vld [vmem:[%s6854_s3 + $0xf8] sm:$0xff]  }
 0x7bd   :  { %5045 = vmatpush3.bf16.msra.mxu0 %v5294_v17  ;;  %5060 = vmatprep.mubr.msk.bf16.mxu0 %vm5682_vm0, %v5681_v0 }
 0x7be   :  { %5046 = vmatprep.subr.bf16.mxu0 %v5681_v0  ;;  %5123 = vmatpush3.bf16.msra.mxu1 %v5318_v19 }
 0x7bf   :  { %5124 = vmatprep.subr.bf16.mxu1 %v5681_v0 }
 0x7c1   :  { %v6244_v21 = vpop.f32.mrf.mxu1  ;;  %5047 = vmatpush3.bf16.msra.mxu0 %v5296_v20 }
 0x7c2   :  { %5048 = vmatprep.subr.bf16.mxu0 %v5681_v0 }
 0x7c3   :  { %v5022_v23 = vpop.f32.mrf.mxu1 }
 0x7c4   :  { %v5317_v23 = vld [vmem:[#allocation5 + $0x28] sm:$0xff]  }
 0x7c5   :  { %v1566_v24 = vpop.f32.mrf.mxu1  ;;  %5049 = vmatpush3.bf16.msra.mxu0 %v5298_v22 }
 0x7c6   :  { %5050 = vmatprep.subr.bf16.mxu0 %v5681_v0 }
 0x7c7   :  { %v5023_v26 = vpop.f32.mrf.mxu1 }
 0x7c8   :  { %v5320_v26 = vld [vmem:[%s6854_s3 + $0xf0] sm:$0xff]  }
 0x7c9   :  { %5051 = vmatpush3.bf16.msra.mxu0 %v5300_v25  ;;  %v5319_v25 = vld [vmem:[#allocation5 + $0x20] sm:$0xff]   ;;  %5125 = vmatpush3.bf16.msra.mxu1 %v5320_v26 }
 0x7ca   :  { %5052 = vmatprep.subr.bf16.mxu0 %v5681_v0  ;;  %5126 = vmatprep.subr.bf16.mxu1 %v5681_v0 }
 0x7cd   :  { %5053 = vmatpush3.bf16.msra.mxu0 %v5302_v27  ;;  %v5322_v27 = vld [vmem:[%s6854_s3 + $0xe8] sm:$0xff]  }
 0x7ce   :  { %5054 = vmatprep.subr.bf16.mxu0 %v5681_v0  ;;  %5127 = vmatpush3.bf16.msra.mxu1 %v5322_v27 }
 0x7cf   :  { %5128 = vmatprep.subr.bf16.mxu1 %v5681_v0 }
 0x7d1   :  { %5055 = vmatpush3.bf16.msra.mxu0 %v5304_v28  ;;  %v5324_v28 = vld [vmem:[%s6854_s3 + $0xe0] sm:$0xff]  }
 0x7d2   :  { %5056 = vmatprep.subr.bf16.mxu0 %v5681_v0  ;;  %5129 = vmatpush3.bf16.msra.mxu1 %v5324_v28 }
 0x7d3   :  { %5130 = vmatprep.subr.bf16.mxu1 %v5681_v0 }
 0x7d5   :  { %5057 = vmatpush3.bf16.msra.mxu0 %v5306_v29  ;;  %v5326_v29 = vld [vmem:[%s6854_s3 + $0xd8] sm:$0xff]  }
 0x7d6   :  { %5058 = vmatprep.subr.bf16.mxu0 %v5681_v0  ;;  %5131 = vmatpush3.bf16.msra.mxu1 %v5326_v29 }
 0x7d7   :  { %5132 = vmatprep.subr.bf16.mxu1 %v5681_v0 }
 0x7d9   :  { %5059 = vmatpush3.bf16.msra.mxu0 %v5308_v30  ;;  %v5328_v30 = vld [vmem:[%s6854_s3 + $0xd0] sm:$0xff]  }
 0x7da   :  { %5084 = vmatprep.subr.mxu0 %v5681_v0  ;;  %5133 = vmatpush3.bf16.msra.mxu1 %v5328_v30 }
 0x7db   :  { %5134 = vmatprep.subr.bf16.mxu1 %v5681_v0 }
 0x7dc   :  { %5061 = vmatmul.mubr.bf16.vlgmr.msra.gmra.mxu0 %v5860_v16 }
 0x7dd   :  { %5086 = vmatprep.mubr.msk.f32.mxu0 %vm5682_vm0, %v5681_v0 }
 0x7e1   :  { %v1672_v31 = vpop.f32.mrf.mxu1 }
 0x7e2   :  { %v1673_v46 = vadd.f32 %v1672_v31, %v1589_v44  ;;  %v5330_v31 = vld [vmem:[%s6854_s3 + $0xc8] sm:$0xff]  }
 0x7e3   :  { %v5042_v32 = vpop.f32.mrf.mxu1  ;;  %5135 = vmatpush3.bf16.msra.mxu1 %v5330_v31  ;;  %v5325_v44 = vld [vmem:[%s6853_s2 + $0xe8] sm:$0xff]  }
 0x7e4   :  { %v1896_v49 = vmul.f32 0.17677669, %v1673_v46  ;;  %5136 = vmatprep.subr.bf16.mxu1 %v5681_v0  ;;  %v5332_v32 = vld [vmem:[%s6854_s3 + $0xc0] sm:$0xff]   ;;  %v5329_v46 = vld [vmem:[%s6853_s2 + $0xd8] sm:$0xff]  }
 0x7e5   :  { %v1675_v33 = vpop.f32.mrf.mxu1 }
 0x7e7   :  { %v5043_v38 = vpop.f32.mrf.mxu1  ;;  %5137 = vmatpush3.bf16.msra.mxu1 %v5332_v32 }
 0x7e8   :  { %5162 = vmatprep.subr.mxu1 %v5681_v0  ;;  %v5321_v38 = vld [vmem:[%s6853_s2 + $0xf8] sm:$0xff]  }
 0x7ea   :  { %5139 = vmatmul.mubr.bf16.vlgmr.msra.gmra.mxu1 %v5860_v16 }
 0x7eb   :  { %5164 = vmatprep.mubr.msk.f32.mxu1 %vm5682_vm0, %v5681_v0 }
 0x801   :  { %v1890_v10 = vpop.f32.mrf.mxu1 }
 0x802   :  { %v1891_v14 = vadd.f32 %v1890_v10, %v1807_v9  ;;  %v5337_v9 = vld [vmem:[%s6855_s4 + $0xe8] sm:$0xff]   ;;  %v5338_v10 = vld [vmem:[%s6855_s4 + $0xe0] sm:$0xff]  }
 0x803   :  { %v5082_v15 = vpop.f32.mrf.mxu1 }
 0x804   :  { %v5340_v15 = vld [vmem:[%s6855_s4 + $0xd0] sm:$0xff]  }
 0x805   :  { %v1893_v17 = vpop.f32.mrf.mxu1 }
 0x806   :  { %v5341_v17 = vld [vmem:[%s6855_s4 + $0xc8] sm:$0xff]  }
 0x807   :  { %v5083_v18 = vpop.f32.mrf.mxu1 }
 0x808   :  { %v5342_v18 = vld [vmem:[%s6855_s4 + $0xc0] sm:$0xff]  }
 0x87c   :  { %v6274_v39 = vpop.f32.mrf.mxu0 }
 0x87d   :  { %v1564_v57 = vadd.f32 %v6244_v21, %v6274_v39  ;;  %v5335_v39 = vld [vmem:[%s6855_s4 + $0xf8] sm:$0xff]  }
 0x87e   :  { %v5014_v40 = vpop.f32.mrf.mxu0 }
 0x880   :  { %v1511_v41 = vpop.f32.mrf.mxu0 }
 0x882   :  { %v5015_v42 = vpop.f32.mrf.mxu0 }
 0x883   :  { %v5323_v42 = vld [vmem:[%s6853_s2 + $0xf0] sm:$0xff]  }
 0x89c   :  { %v1781_v47 = vpop.f32.mrf.mxu0 }
 0x89d   :  { %v1782_v48 = vadd.f32 %v1781_v47, %v1698_v45  ;;  %v5327_v45 = vld [vmem:[%s6853_s2 + $0xe0] sm:$0xff]   ;;  %v5331_v47 = vld [vmem:[%s6853_s2 + $0xd0] sm:$0xff]  }
 0x89e   :  { %v5062_v50 = vpop.f32.mrf.mxu0 }
 0x89f   :  { %5085 = vmatpush3.xpose.msk.msra.mxu0 %vm798_vm1, %v1782_v48  ;;  %v5333_v48 = vld [vmem:[%s6853_s2 + $0xc8] sm:$0xff]   ;;  %v6408_v50 = vsub.s32 7, %v5946_v36 }
 0x8a0   :  { %v1784_v51 = vpop.f32.mrf.mxu0  ;;  %5089 = vmatprep.subr.mxu0 %v5681_v0 }
 0x8a1   :  { %v2248_v51 = vrot.slane %v6000_v12, %v6408_v50 }
 0x8a2   :  { %v5063_v52 = vpop.f32.mrf.mxu0  ;;  %5087 = vmatmul.mubr.msk.f32.vlgmr.msra.gmra.mxu0 %vm798_vm1, %v1896_v49  ;;  %v5334_v49 = vld [vmem:[%s6853_s2 + $0xc0] sm:$0xff]  }
 0x8a3   :  { %5091 = vmatprep.mubr.msk.f32.mxu0 %vm5682_vm0, %v5681_v0  ;;  %5090 = vmatpush3.msra.mxu0 %v1891_v14  ;;  %v5339_v14 = vld [vmem:[%s6855_s4 + $0xd8] sm:$0xff]  }
 0x8a4   :  { %5094 = vmatprep.subr.bf16.mxu0 %v5681_v0 }
 0x8aa   :  { %v2331_v52 = vpop.f32.mrf.mxu1 }
 0x8ab   :  { %v2332_v53 = vadd.f32 %v2331_v52, %v2248_v51 }
 0x8ac   :  { %v5140_v54 = vpop.f32.mrf.mxu1 }
 0x8ad   :  { %5163 = vmatpush3.xpose.msk.msra.mxu1 %vm798_vm1, %v2332_v53 }
 0x8ae   :  { %v2334_v55 = vpop.f32.mrf.mxu1  ;;  %5167 = vmatprep.subr.mxu1 %v5681_v0 }
 0x8af   :  { %v5478_v55 = vld [vmem:[#allocation2] sm:$0xff] }
 0x8b0   :  { %v5141_v56 = vpop.f32.mrf.mxu1 }
 0x962   :  { %v1969_v61 = vpop.f32.mrf.mxu0 }
 0x963   :  { %v1970_v62 = vadd.f32 %v1969_v61, %v6050_v34 }
 0x964   :  { %v5088_v2 = vpop.f32.mrf.mxu0 }
 0x965   :  { %v1973_v3 = vsel %vm875_vm3, %v1970_v62, -inf  ;;  %v6419_v2 = vsub.s32 3, %v5946_v36  ;;  %v5400_v36 = vld [vmem:[#allocation7 + $0xb0] sm:$0xff]  }
 0x966   :  { %1974 = vmax.xlane.f32.xlu0 %v1973_v3 }
 0x967   :  { %v2139_v3 = vrot.slane %v6000_v12, %v6419_v2  ;;  %v5336_v12 = vld [vmem:[%s6855_s4 + $0xf0] sm:$0xff]   ;;  %v2357_v29 = vrot.slane %v6055_v35, %v6419_v2  ;;  %v5344_v35 = vld [vmem:[#allocation5 + $0x30] sm:$0xff]  }
 0x9ef   :  { %v1975_v4 = vpop.xlane.xlu0 %1974 }
 0x9f0   :  { %v1976_v5 = vsub.f32 %v1970_v62, %v1975_v4 }
 0x9f2   :  { %v1977_v6 = vmul.f32 1.442695, %v1976_v5 }
 0x9f4   :  { %5441 = vpow2.f32 %v1977_v6 }
 0xa01   :  { %v5442_v7 = vpop.eup %5441 }
 0xa02   :  { %v1979_v8 = vsel %vm875_vm3, %v5442_v7, 0.0 }
 0xa03   :  { %1980 = vadd.xlane.f32.xlu1 %v1979_v8 }
 0xa8c   :  { %v1981_v20 = vpop.xlane.xlu1 %1980 }
 0xa8d   :  { %5443 = vrcp.f32 %v1981_v20 }
 0xa9a   :  { %v5444_v22 = vpop.eup %5443 }
 0xa9b   :  { %v1983_v24 = vmul.f32 %v5444_v22, %v5442_v7 }
 0xa9d   :  { %5092 = vmatmul.mubr.msk.f32.vlgmr.msra.gmra.mxu0 %vm875_vm3, %v1983_v24 }
 0xa9e   :  { %5095 = vmatpush3.bf16.msra.mxu0 %v5317_v23  ;;  %5098 = vmatprep.mubr.msk.bf16.mxu0 %vm5682_vm0, %v5681_v0 }
 0xa9f   :  { %5096 = vmatprep.subr.bf16.mxu0 %v5681_v0 }
 0xaa2   :  { %5097 = vmatpush3.bf16.msra.mxu0 %v5319_v25 }
 0xaa3   :  { %5102 = vmatprep.subr.bf16.mxu0 %v5681_v0 }
 0xb5d   :  { %v2053_v33 = vpop.f32.mrf.mxu0 }
 0xb5e   :  { %v2062_v40 = vpack.c.bf16 %v2053_v33, %v2053_v33 }
 0xb5f   :  { %v5093_v41 = vpop.f32.mrf.mxu0 }
 0xb60   :  { %5099 = vmatmul.mubr.msk.bf16.vlgmr.msra.gmra.mxu0 %vm798_vm1, %v2062_v40  ;;  %v5343_v41 = vld [vmem:[#allocation5 + $0x38] sm:$0xff]  }
 0xb61   :  { %5103 = vmatpush3.bf16.msra.mxu0 %v5321_v38  ;;  %5118 = vmatprep.mubr.msk.bf16.mxu0 %vm5682_vm0, %v5681_v0 }
 0xb62   :  { %5104 = vmatprep.subr.bf16.mxu0 %v5681_v0 }
 0xb65   :  { %5105 = vmatpush3.bf16.msra.mxu0 %v5323_v42 }
 0xb66   :  { %5106 = vmatprep.subr.bf16.mxu0 %v5681_v0 }
 0xb69   :  { %5107 = vmatpush3.bf16.msra.mxu0 %v5325_v44 }
 0xb6a   :  { %5108 = vmatprep.subr.bf16.mxu0 %v5681_v0 }
 0xb6d   :  { %5109 = vmatpush3.bf16.msra.mxu0 %v5327_v45 }
 0xb6e   :  { %5110 = vmatprep.subr.bf16.mxu0 %v5681_v0 }
 0xb71   :  { %5111 = vmatpush3.bf16.msra.mxu0 %v5329_v46 }
 0xb72   :  { %5112 = vmatprep.subr.bf16.mxu0 %v5681_v0 }
 0xb75   :  { %5113 = vmatpush3.bf16.msra.mxu0 %v5331_v47  ;;  %v6472_v47 = vld [vmem:[%s6861_s10] sm:$0xff] }
 0xb76   :  { %5114 = vmatprep.subr.bf16.mxu0 %v5681_v0 }
 0xb79   :  { %5115 = vmatpush3.bf16.msra.mxu0 %v5333_v48  ;;  %v2672_v48 = vrot.slane %v6472_v47, %v6419_v2 }
 0xb7a   :  { %5116 = vmatprep.subr.bf16.mxu0 %v5681_v0 }
 0xb7d   :  { %5117 = vmatpush3.bf16.msra.mxu0 %v5334_v49 }
 0xb7e   :  { %5142 = vmatprep.subr.bf16.mxu0 %v5681_v0 }
 0xb80   :  { %5119 = vmatmul.mubr.bf16.vlgmr.msra.gmra.mxu0 %v5860_v16 }
 0xb81   :  { %5158 = vmatprep.mubr.msk.bf16.mxu0 %vm5682_vm0, %v5681_v0  ;;  %5143 = vmatpush3.bf16.msra.mxu0 %v5335_v39  ;;  %v5359_v39 = vld [vmem:[%s6857_s6 + $0xa4] ss:$16 sps:$4 sm:$0xff]  }
 0xb82   :  { %5144 = vmatprep.subr.bf16.mxu0 %v5681_v0 }
 0xb85   :  { %5145 = vmatpush3.bf16.msra.mxu0 %v5336_v12  ;;  %v5362_v12 = vld [vmem:[%s6857_s6 + $0xac] ss:$16 sps:$4 sm:$0xff]  }
 0xb86   :  { %5146 = vmatprep.subr.bf16.mxu0 %v5681_v0 }
 0xb89   :  { %5147 = vmatpush3.bf16.msra.mxu0 %v5337_v9  ;;  %v5357_v9 = vld [vmem:[%s6857_s6 + $0xa0] ss:$16 sps:$4 sm:$0xff]  }
 0xb8a   :  { %5148 = vmatprep.subr.bf16.mxu0 %v5681_v0 }
 0xb8d   :  { %5149 = vmatpush3.bf16.msra.mxu0 %v5338_v10  ;;  %v5360_v10 = vld [vmem:[%s6857_s6 + $0xa8] ss:$16 sps:$4 sm:$0xff]  }
 0xb8e   :  { %5150 = vmatprep.subr.bf16.mxu0 %v5681_v0 }
 0xb91   :  { %5151 = vmatpush3.bf16.msra.mxu0 %v5339_v14  ;;  %v5363_v14 = vld [vmem:[%s6857_s6 + $0x80] ss:$16 sps:$4 sm:$0xff]  }
 0xb92   :  { %5152 = vmatprep.subr.bf16.mxu0 %v5681_v0 }
 0xb95   :  { %5153 = vmatpush3.bf16.msra.mxu0 %v5340_v15  ;;  %v5365_v15 = vld [vmem:[%s6857_s6 + $0x84] ss:$16 sps:$4 sm:$0xff]  }
 0xb96   :  { %5154 = vmatprep.subr.bf16.mxu0 %v5681_v0 }
 0xb99   :  { %5155 = vmatpush3.bf16.msra.mxu0 %v5341_v17  ;;  %v5366_v17 = vld [vmem:[%s6857_s6 + $0x88] ss:$16 sps:$4 sm:$0xff]  }
 0xb9a   :  { %5156 = vmatprep.subr.bf16.mxu0 %v5681_v0 }
 0xb9d   :  { %5157 = vmatpush3.bf16.msra.mxu0 %v5342_v18  ;;  %v5368_v18 = vld [vmem:[%s6857_s6 + $0x8c] ss:$16 sps:$4 sm:$0xff]  }
 0xba0   :  { %5159 = vmatmul.mubr.bf16.vlgmr.msra.gmra.mxu0 %v5860_v16 }
 0xc20   :  { %v2112_v58 = vpop.f32.mrf.mxu0 }
 0xc21   :  { %v6416_v59 = vadd.f32 %v2112_v58, %v1564_v57  ;;  %v5345_v58 = vld [vmem:[%s6857_s6 + $0xe0] ss:$16 sps:$4 sm:$0xff]  }
 0xc22   :  { %v5100_v60 = vpop.f32.mrf.mxu0 }
 0xc23   :  { %v5347_v60 = vld [vmem:[%s6857_s6 + $0xe4] ss:$16 sps:$4 sm:$0xff]  }
 0xc24   :  { %v2115_v61 = vpop.f32.mrf.mxu0 }
 0xc25   :  { %v5348_v61 = vld [vmem:[%s6857_s6 + $0xe8] ss:$16 sps:$4 sm:$0xff]  }
 0xc26   :  { %v5101_v62 = vpop.f32.mrf.mxu0 }
 0xc27   :  { %v5353_v62 = vld [vmem:[%s6857_s6 + $0xc4] ss:$16 sps:$4 sm:$0xff]  }
 0xc40   :  { %v2222_v4 = vpop.f32.mrf.mxu0 }
 0xc41   :  { %v2223_v5 = vadd.f32 %v2222_v4, %v2139_v3  ;;  %v5356_v3 = vld [vmem:[%s6857_s6 + $0xcc] ss:$16 sps:$4 sm:$0xff]   ;;  %v5351_v4 = vld [vmem:[%s6857_s6 + $0xc0] ss:$16 sps:$4 sm:$0xff]  }
 0xc42   :  { %v5120_v6 = vpop.f32.mrf.mxu0 }
 0xc43   :  { %v2446_v7 = vmul.f32 0.17677669, %v2223_v5  ;;  %v5354_v5 = vld [vmem:[%s6857_s6 + $0xc8] ss:$16 sps:$4 sm:$0xff]  }
 0xc44   :  { %v2225_v8 = vpop.f32.mrf.mxu0 }
 0xc45   :  { %5165 = vmatmul.mubr.msk.f32.vlgmr.msra.gmra.mxu1 %vm798_vm1, %v2446_v7 }
 0xc46   :  { %v5121_v21 = vpop.f32.mrf.mxu0  ;;  %5169 = vmatprep.mubr.msk.f32.mxu1 %vm5682_vm0, %v5681_v0 }
 0xc60   :  { %v2440_v30 = vpop.f32.mrf.mxu0 }
 0xc61   :  { %v2441_v31 = vadd.f32 %v2440_v30, %v2357_v29  ;;  %v5383_v29 = vld [vmem:[%s6857_s6 + $0x24] ss:$16 sps:$4 sm:$0xff]   ;;  %v5386_v30 = vld [vmem:[%s6857_s6 + $0x2c] ss:$16 sps:$4 sm:$0xff]  }
 0xc62   :  { %v5160_v32 = vpop.f32.mrf.mxu0 }
 0xc63   :  { %5168 = vmatpush3.msra.mxu1 %v2441_v31  ;;  %v5381_v31 = vld [vmem:[%s6857_s6 + $0x20] ss:$16 sps:$4 sm:$0xff]   ;;  %v5384_v32 = vld [vmem:[%s6857_s6 + $0x28] ss:$16 sps:$4 sm:$0xff]  }
 0xc64   :  { %v2443_v33 = vpop.f32.mrf.mxu0  ;;  %5172 = vmatprep.subr.bf16.mxu1 %v5681_v0 }
 0xc65   :  { %v5389_v33 = vld [vmem:[%s6857_s6 + $0x4] ss:$16 sps:$4 sm:$0xff]  }
 0xd05   :  { %v2519_v19 = vpop.f32.mrf.mxu1 }
 0xd06   :  { %v2520_v20 = vadd.f32 %v2519_v19, %v6050_v34  ;;  %v5161_v34 = vpop.f32.mrf.mxu0  ;;  %v5371_v19 = vld [vmem:[%s6857_s6 + $0x64] ss:$16 sps:$4 sm:$0xff]  }
 0xd07   :  { %v5166_v22 = vpop.f32.mrf.mxu1  ;;  %v5392_v34 = vld [vmem:[%s6857_s6 + $0xc] ss:$16 sps:$4 sm:$0xff]  }
 0xd08   :  { %v2523_v23 = vsel %vm875_vm3, %v2520_v20, -inf  ;;  %v5369_v22 = vld [vmem:[%s6857_s6 + $0x60] ss:$16 sps:$4 sm:$0xff]  }
 0xd09   :  { %2524 = vmax.xlane.f32.xlu0 %v2523_v23  ;;  %v5372_v23 = vld [vmem:[%s6857_s6 + $0x68] ss:$16 sps:$4 sm:$0xff]  }
 0xd92   :  { %v2525_v24 = vpop.xlane.xlu0 %2524 }
 0xd93   :  { %v2526_v25 = vsub.f32 %v2520_v20, %v2525_v24  ;;  %v5374_v20 = vld [vmem:[%s6857_s6 + $0x6c] ss:$16 sps:$4 sm:$0xff]   ;;  %v5377_v24 = vld [vmem:[%s6857_s6 + $0x44] ss:$16 sps:$4 sm:$0xff]  }
 0xd95   :  { %v2527_v26 = vmul.f32 1.442695, %v2526_v25  ;;  %v5380_v25 = vld [vmem:[%s6857_s6 + $0x4c] ss:$16 sps:$4 sm:$0xff]  }
 0xd97   :  { %5445 = vpow2.f32 %v2527_v26  ;;  %v5375_v26 = vld [vmem:[%s6857_s6 + $0x40] ss:$16 sps:$4 sm:$0xff]  }
 0xda4   :  { %v5446_v27 = vpop.eup %5445 }
 0xda5   :  { %v2529_v28 = vsel %vm875_vm3, %v5446_v27, 0.0 }
 0xda6   :  { %2530 = vadd.xlane.f32.xlu1 %v2529_v28  ;;  %v5378_v28 = vld [vmem:[%s6857_s6 + $0x48] ss:$16 sps:$4 sm:$0xff]  }
 0xe2f   :  { %v2531_v38 = vpop.xlane.xlu1 %2530 }
 0xe30   :  { %5447 = vrcp.f32 %v2531_v38  ;;  %v5387_v38 = vld [vmem:[%s6857_s6] ss:$16 sps:$4 sm:$0xff]  }
 0xe3d   :  { %v5448_v40 = vpop.eup %5447 }
 0xe3e   :  { %v2533_v42 = vmul.f32 %v5448_v40, %v5446_v27  ;;  %v5684_v27 = vmov 0   ;;  %v5390_v40 = vld [vmem:[%s6857_s6 + $0x8] ss:$16 sps:$4 sm:$0xff]  }
 0xe3f   :  { %2985 = vmatprep.mubr.bf16.mxu0 %v5684_v27 }
 0xe40   :  { %5170 = vmatmul.mubr.msk.f32.vlgmr.msra.gmra.mxu1 %vm875_vm3, %v2533_v42  ;;  %v5394_v42 = vld [vmem:[#allocation7 + $0xf8] sm:$0xff]  }
 0xe41   :  { %5173 = vmatpush3.bf16.msra.mxu1 %v5343_v41  ;;  %5176 = vmatprep.mubr.msk.bf16.mxu1 %vm5682_vm0, %v5681_v0  ;;  %v5393_v41 = vld [vmem:[#allocation7 + $0x78] sm:$0xff]  }
 0xe42   :  { %5174 = vmatprep.subr.bf16.mxu1 %v5681_v0 }
 0xe45   :  { %5175 = vmatpush3.bf16.msra.mxu1 %v5344_v35 }
 0xe46   :  { %2912 = vmatprep.subr.bf16.mxu1 %v5347_v60  ;;  %v5399_v60 = vld [vmem:[#allocation7 + $0x30] sm:$0xff]  }
 0xf00   :  { %v2603_v44 = vpop.f32.mrf.mxu1 }
 0xf01   :  { %v2612_v45 = vpack.c.bf16 %v2603_v44, %v2603_v44 }
 0xf02   :  { %v5171_v46 = vpop.f32.mrf.mxu1 }
 0xf03   :  { %5177 = vmatmul.mubr.msk.bf16.vlgmr.msra.gmra.mxu1 %vm798_vm1, %v2612_v45  ;;  %v2690_v46 = vrot.slane %v6472_v47, %v6003_v13 }
 0xf04   :  { %2913 = vmatpush1.bf16.msra.mxu1 %v5345_v58  ;;  %2944 = vmatprep.mubr.bf16.mxu1 %v5684_v27  ;;  %v5398_v58 = vld [vmem:[#allocation7 + $0xf0] sm:$0xff]  }
 0xf05   :  { %2914 = vmatprep.subr.bf16.mxu1 %v5353_v62  ;;  %v5404_v62 = vld [vmem:[#allocation7 + $0xa8] sm:$0xff]  }
 0xf08   :  { %2915 = vmatpush1.bf16.msra.mxu1 %v5351_v4  ;;  %v5406_v4 = vld [vmem:[#allocation7 + $0xe0] sm:$0xff]  }
 0xf09   :  { %2916 = vmatprep.subr.bf16.mxu1 %v5359_v39  ;;  %v5412_v39 = vld [vmem:[#allocation7 + $0x98] sm:$0xff]  }
 0xf0c   :  { %2917 = vmatpush1.bf16.msra.mxu1 %v5357_v9  ;;  %v5414_v9 = vld [vmem:[#allocation7 + $0xd0] sm:$0xff]  }
 0xf0d   :  { %2918 = vmatprep.subr.bf16.mxu1 %v5365_v15  ;;  %v5417_v15 = vld [vmem:[#allocation7 + $0x48] sm:$0xff]  }
 0xf10   :  { %2919 = vmatpush1.bf16.msra.mxu1 %v5363_v14  ;;  %v5416_v14 = vld [vmem:[#allocation7 + $0x90] sm:$0xff]  }
 0xf11   :  { %2920 = vmatprep.subr.bf16.mxu1 %v5371_v19  ;;  %v5420_v19 = vld [vmem:[#allocation7 + $0x88] sm:$0xff]  }
 0xf14   :  { %2921 = vmatpush1.bf16.msra.mxu1 %v5369_v22  ;;  %v5422_v22 = vld [vmem:[#allocation7 + $0xc0] sm:$0xff]  }
 0xf15   :  { %2922 = vmatprep.subr.bf16.mxu1 %v5377_v24  ;;  %v5424_v24 = vld [vmem:[#allocation7 + $0x80] sm:$0xff]  }
 0xf18   :  { %2923 = vmatpush1.bf16.msra.mxu1 %v5375_v26 }
 0xf19   :  { %2924 = vmatprep.subr.bf16.mxu1 %v5383_v29 }
 0xf1c   :  { %2925 = vmatpush1.bf16.msra.mxu1 %v5381_v31 }
 0xf1d   :  { %2926 = vmatprep.subr.bf16.mxu1 %v5389_v33 }
 0xf20   :  { %2927 = vmatpush1.bf16.msra.mxu1 %v5387_v38 }
 0xf21   :  { %4755 = vmatprep.subr.bf16.mxu1 %v5393_v41 }
 0xfc3   :  { %v2662_v49 = vpop.f32.mrf.mxu1 }
 0xfc4   :  { %v2668_v51 = vadd.f32 %v2662_v49, %v6416_v59  ;;  %v5350_v59 = vld [vmem:[%s6857_s6 + $0xec] ss:$16 sps:$4 sm:$0xff]   ;;  %v2695_v49 = vrot.slane %v6472_v47, %v1093_v11  ;;  %v5401_v11 = vld [vmem:[#allocation7 + $0x68] sm:$0xff]   ;;  %s5686_s6 = smov [#allocation13]  }
 0xfc5   :  { %v5178_v52 = vpop.f32.mrf.mxu1  ;;  %2953 = vmatprep.subr.bf16.mxu0 %v5350_v59  ;;  %v5403_v59 = vld [vmem:[#allocation7 + $0x28] sm:$0xff]   ;;  %s4093_s3 = sshll.u32 %s5686_s6, 4  ;;  %s4094_s3 = int_to_ptr.vmem [resolvable:$true] %s4093_s3 }
 0xfc6   :  { %v2673_v53 = vadd.f32 %v2672_v48, %v2668_v51  ;;  %2954 = vmatpush1.bf16.msra.mxu0 %v5348_v61  ;;  %v5402_v61 = vld [vmem:[#allocation7 + $0xe8] sm:$0xff]  }
 0xfc7   :  { %v2665_v54 = vpop.f32.mrf.mxu1  ;;  %2955 = vmatprep.subr.bf16.mxu0 %v5356_v3  ;;  %v5405_v3 = vld [vmem:[#allocation7 + $0x60] sm:$0xff]  }
 0xfc8   :  { %v2674_v56 = vadd.f32 %v5478_v55, %v2673_v53  ;;  %v5395_v54 = vld [vmem:[#allocation7 + $0x38] sm:$0xff]  }
 0xfc9   :  { %v5179_v57 = vpop.f32.mrf.mxu1  ;;  %v5396_v55 = vld [vmem:[#allocation7 + $0xb8] sm:$0xff]  }
 0xfca   :  { %2675 = vadd.xlane.f32.xlu0 %v2674_v56  ;;  %2956 = vmatpush1.bf16.msra.mxu0 %v5354_v5  ;;  %v5397_v57 = vld [vmem:[#allocation7 + $0x70] sm:$0xff]   ;;  %v5407_v5 = vld [vmem:[#allocation7 + $0x20] sm:$0xff]  }
 0xfcb   :  { %2957 = vmatprep.subr.bf16.mxu0 %v5362_v12  ;;  %v5413_v12 = vld [vmem:[#allocation7 + $0x50] sm:$0xff]  }
 0xfce   :  { %2958 = vmatpush1.bf16.msra.mxu0 %v5360_v10  ;;  %v5415_v10 = vld [vmem:[#allocation7 + $0x10] sm:$0xff]  }
 0xfcf   :  { %2959 = vmatprep.subr.bf16.mxu0 %v5368_v18  ;;  %v5419_v18 = vld [vmem:[#allocation7 + $0x8] sm:$0xff]  }
 0xfd2   :  { %2960 = vmatpush1.bf16.msra.mxu0 %v5366_v17  ;;  %v5418_v17 = vld [vmem:[#allocation7 + $0xc8] sm:$0xff]  }
 0xfd3   :  { %2961 = vmatprep.subr.bf16.mxu0 %v5374_v20  ;;  %v5421_v20 = vld [vmem:[#allocation7 + $0x40] sm:$0xff]  }
 0xfd6   :  { %2962 = vmatpush1.bf16.msra.mxu0 %v5372_v23  ;;  %v5423_v23 = vld [vmem:[#allocation7] sm:$0xff]  }
 0xfd7   :  { %2963 = vmatprep.subr.bf16.mxu0 %v5380_v25  ;;  %v2730_v25 = vld [vmem:[%s6863_s12] sm:$0xf] }
 0xfd8   :  { %v2735_v26 = vrot.slane %v2730_v25, %v5993_v63  ;;  %v2739_v29 = vrot.slane %v2730_v25, %v5949_v37 }
 0xfda   :  { %2964 = vmatpush1.bf16.msra.mxu0 %v5378_v28  ;;  %v2743_v28 = vrot.slane %v2730_v25, %v5996_v1 }
 0xfdb   :  { %2965 = vmatprep.subr.bf16.mxu0 %v5386_v30  ;;  %v2747_v30 = vrot.slane %v2730_v25, %v6419_v2  ;;  %v5429_v25 = vld [vmem:[#allocation8 + $0x18] sm:$0xff]  }
 0xfde   :  { %2966 = vmatpush1.bf16.msra.mxu0 %v5384_v32 }
 0xfdf   :  { %2967 = vmatprep.subr.bf16.mxu0 %v5392_v34 }
 0xfe2   :  { %2968 = vmatpush1.bf16.msra.mxu0 %v5390_v40 }
 0xfe3   :  { %4777 = vmatprep.subr.bf16.mxu0 %v5394_v42 }
0x1053   :  { %v2676_v6 = vpop.xlane.xlu0 %2675 }
0x1054   :  { %v2678_v7 = vmul.f32 0.0078125, %v2676_v6  ;;  %v5408_v6 = vld [vmem:[#allocation7 + $0xa0] sm:$0xff]  }
0x1056   :  { %v6501_v8 = vsub.f32 %v2674_v56, %v2678_v7  ;;  %v5409_v7 = vld [vmem:[#allocation7 + $0x58] sm:$0xff]  }
0x1058   :  { %v2680_v21 = vmul.f32 %v6501_v8, %v6501_v8 }
0x105a   :  { %2681 = vadd.xlane.f32.xlu1 %v2680_v21  ;;  %v5411_v21 = vld [vmem:[#allocation7 + $0x18] sm:$0xff]  }
0x10e3   :  { %v2682_v35 = vpop.xlane.xlu1 %2681 }
0x10e4   :  { %v2683_v44 = vmul.f32 0.0078125, %v2682_v35 }
0x10e6   :  { %v2684_v45 = vadd.f32 1e-05, %v2683_v44 }
0x10e8   :  { %5449 = vrsqrt.f32 %v2684_v45 }
0x10f5   :  { %v5450_v48 = vpop.eup %5449 }
0x10f6   :  { %v2686_v51 = vmul.f32 %v5450_v48, %v6501_v8  ;;  %v5410_v8 = vld [vmem:[#allocation7 + $0xd8] sm:$0xff]  }
0x10f8   :  { %v2691_v52 = vmul.f32 %v2690_v46, %v2686_v51 }
0x10fa   :  { %v6585_v53 = vadd.f32 %v2695_v49, %v2691_v52 }
0x10fc   :  { %v2729_v56 = vpack.c.bf16 %v6585_v53, %v6585_v53 }
0x10fe   :  { %2945 = vmatmul.mubr.bf16.vlgmr.msra.gmra.mxu1 %v2729_v56  ;;  %2986 = vmatmul.mubr.bf16.vlgmr.msra.gmra.mxu0 %v2729_v56 }
0x10ff   :  { %4756 = vmatpush3.bf16.msra.mxu1 %v5395_v54  ;;  %4778 = vmatpush3.bf16.msra.mxu0 %v5396_v55 }
0x1100   :  { %4757 = vmatprep.subr.bf16.mxu1 %v5397_v57  ;;  %4779 = vmatprep.subr.bf16.mxu0 %v5398_v58 }
0x1103   :  { %4758 = vmatpush3.bf16.msra.mxu1 %v5399_v60  ;;  %4780 = vmatpush3.bf16.msra.mxu0 %v5400_v36  ;;  %v3069_v36 = vrot.slane %v6472_v47, %v6277_v43 }
0x1104   :  { %4759 = vmatprep.subr.bf16.mxu1 %v5401_v11  ;;  %4781 = vmatprep.subr.bf16.mxu0 %v5402_v61 }
0x1107   :  { %4760 = vmatpush3.bf16.msra.mxu1 %v5403_v59  ;;  %4782 = vmatpush3.bf16.msra.mxu0 %v5404_v62 }
0x1108   :  { %4761 = vmatprep.subr.bf16.mxu1 %v5405_v3  ;;  %4783 = vmatprep.subr.bf16.mxu0 %v5406_v4 }
0x110b   :  { %4762 = vmatpush3.bf16.msra.mxu1 %v5407_v5  ;;  %4784 = vmatpush3.bf16.msra.mxu0 %v5408_v6 }
0x110c   :  { %4763 = vmatprep.subr.bf16.mxu1 %v5409_v7  ;;  %4785 = vmatprep.subr.bf16.mxu0 %v5410_v8 }
0x110f   :  { %4764 = vmatpush3.bf16.msra.mxu1 %v5411_v21  ;;  %4786 = vmatpush3.bf16.msra.mxu0 %v5412_v39  ;;  %v5425_v39 = vld [vmem:[#allocation8 + $0x38] sm:$0xff]  }
0x1110   :  { %4765 = vmatprep.subr.bf16.mxu1 %v5413_v12  ;;  %4787 = vmatprep.subr.bf16.mxu0 %v5414_v9  ;;  %v5426_v12 = vld [vmem:[#allocation8 + $0x30] sm:$0xff]  }
0x1113   :  { %4766 = vmatpush3.bf16.msra.mxu1 %v5415_v10  ;;  %4788 = vmatpush3.bf16.msra.mxu0 %v5416_v14 }
0x1114   :  { %4767 = vmatprep.subr.bf16.mxu1 %v5417_v15  ;;  %4789 = vmatprep.subr.bf16.mxu0 %v5418_v17  ;;  %v5427_v17 = vld [vmem:[#allocation8 + $0x28] sm:$0xff]  }
0x1117   :  { %4768 = vmatpush3.bf16.msra.mxu1 %v5419_v18  ;;  %4790 = vmatpush3.bf16.msra.mxu0 %v5420_v19  ;;  %v3535_v18 = vld [vmem:[%s6860_s9 + $0x1e0] sm:$0xff] }
0x1118   :  { %4769 = vmatprep.subr.bf16.mxu1 %v5421_v20  ;;  %4791 = vmatprep.subr.bf16.mxu0 %v5422_v22  ;;  %v5428_v20 = vld [vmem:[#allocation8 + $0x20] sm:$0xff]  }
0x111b   :  { %4770 = vmatpush3.bf16.msra.mxu1 %v5423_v23  ;;  %4792 = vmatpush3.bf16.msra.mxu0 %v5424_v24  ;;  %v3523_v23 = vld [vmem:[%s6860_s9 + $0x180] sm:$0xff] }
0x111c   :  { %5180 = vmatprep.subr.bf16.mxu1 %v5681_v0  ;;  %v3527_v24 = vld [vmem:[%s6860_s9 + $0x1a0] sm:$0xff] }
0x11be   :  { %v2946_v31 = vpop.f32.mrf.mxu1  ;;  %v2987_v32 = vpop.f32.mrf.mxu0 }
0x11bf   :  { %v2947_v33 = vadd.f32 %v2946_v31, %v2735_v26  ;;  %v2988_v34 = vadd.f32 %v2987_v32, %v2743_v28  ;;  %v4572_v26 = vcombine.low %v3523_v23, %v3527_v24  ;;  %v4573_v28 = vcombine.high %v3523_v23, %v3527_v24  ;;  %v6632_v32 = vld [vmem:[%s6860_s9 + $0x1c8] sm:$0xff]  ;;  %v3505_v23 = vld [vmem:[%s6860_s9 + $0xf0] sm:$0xff] }
0x11c0   :  { %v2948_v38 = vpop.f32.mrf.mxu1  ;;  %v2989_v40 = vpop.f32.mrf.mxu0 }
0x11c1   :  { %v2949_v41 = vadd.f32 %v2948_v38, %v2739_v29  ;;  %v2990_v42 = vadd.f32 %v2989_v40, %v2747_v30  ;;  %v2994_v35 = vmax.f32 %v2947_v33, 0.0  ;;  %v2996_v44 = vmax.f32 %v2988_v34, 0.0  ;;  %v3515_v29 = vld [vmem:[%s6860_s9 + $0x140] sm:$0xff]  ;;  %v6643_v38 = vld [vmem:[%s6860_s9 + $0x1e8] sm:$0xff] }
0x11c2   :  { %v2950_v45 = vpop.f32.mrf.mxu1  ;;  %v2991_v46 = vpop.f32.mrf.mxu0  ;;  %v3519_v30 = vld [vmem:[%s6860_s9 + $0x160] sm:$0xff]  ;;  %v4582_v40 = vcombine.low %v6632_v32, %v6643_v38 }
0x11c3   :  { %v2995_v48 = vmax.f32 %v2949_v41, 0.0  ;;  %v2997_v49 = vmax.f32 %v2990_v42, 0.0  ;;  %v3062_v56 = vpack.c.bf16 %v2994_v35, %v2994_v35  ;;  %v3064_v57 = vpack.c.bf16 %v2996_v44, %v2996_v44  ;;  %v3507_v33 = vld [vmem:[%s6860_s9 + $0x100] sm:$0xff]  ;;  %v5430_v41 = vld [vmem:[#allocation8 + $0x10] sm:$0xff]   ;;  %v5431_v44 = vld [vmem:[#allocation8 + $0x8] sm:$0xff]  }
0x11c4   :  { %v2951_v51 = vpop.f32.mrf.mxu1  ;;  %v2992_v52 = vpop.f32.mrf.mxu0  ;;  %v4565_v31 = vcombine.high %v3515_v29, %v3519_v30  ;;  %v3511_v34 = vld [vmem:[%s6860_s9 + $0x120] sm:$0xff]  ;;  %v4564_v42 = vcombine.low %v3515_v29, %v3519_v30  ;;  %v5432_v46 = vld [vmem:[#allocation8] sm:$0xff]  }
0x11c5   :  { %v3063_v54 = vpack.c.bf16 %v2995_v48, %v2995_v48  ;;  %v3065_v55 = vpack.c.bf16 %v2997_v49, %v2997_v49  ;;  %v4557_v35 = vcombine.high %v3507_v33, %v3511_v34  ;;  %v4556_v45 = vcombine.low %v3507_v33, %v3511_v34  ;;  %v3499_v48 = vld [vmem:[%s6860_s9 + $0xc0] sm:$0xff]  ;;  %v3489_v33 = vld [vmem:[%s6860_s9 + $0x70] sm:$0xff] }
0x11c6   :  { %v3503_v49 = vld [vmem:[%s6860_s9 + $0xe0] sm:$0xff]  ;;  %v4583_v51 = vcombine.high %v6632_v32, %v6643_v38  ;;  %v3500_v32 = vld [vmem:[%s6860_s9 + $0xc8] sm:$0xff] }
0x11c7   :  { %3294 = vmatprep.mubr.bf16.mxu1 %v3063_v54  ;;  %3334 = vmatprep.mubr.bf16.mxu0 %v3065_v55  ;;  %v4549_v52 = vcombine.high %v3499_v48, %v3503_v49  ;;  %v4548_v54 = vcombine.low %v3499_v48, %v3503_v49  ;;  %v3491_v55 = vld [vmem:[%s6860_s9 + $0x80] sm:$0xff]  ;;  %v3504_v38 = vld [vmem:[%s6860_s9 + $0xe8] sm:$0xff] }
0x11c8   :  { %3295 = vmatmul.mubr.bf16.vlgmr.msra.gmra.mxu1 %v3062_v56  ;;  %3335 = vmatmul.mubr.bf16.vlgmr.msra.gmra.mxu0 %v3064_v57  ;;  %v3495_v56 = vld [vmem:[%s6860_s9 + $0xa0] sm:$0xff] }
0x11c9   :  { %5196 = vmatprep.mubr.msk.bf16.mxu1 %vm5682_vm0, %v5681_v0  ;;  %3923 = vmatprep.mubr.bf16.mxu0 %v5684_v27  ;;  %v4541_v57 = vcombine.high %v3491_v55, %v3495_v56 }
0x11ca   :  { %5181 = vmatpush3.bf16.msra.mxu1 %v5425_v39 }
0x11cb   :  { %5182 = vmatprep.subr.bf16.mxu1 %v5681_v0 }
0x11ce   :  { %5183 = vmatpush3.bf16.msra.mxu1 %v5426_v12 }
0x11cf   :  { %5184 = vmatprep.subr.bf16.mxu1 %v5681_v0 }
0x11d2   :  { %5185 = vmatpush3.bf16.msra.mxu1 %v5427_v17 }
0x11d3   :  { %5186 = vmatprep.subr.bf16.mxu1 %v5681_v0 }
0x11d6   :  { %5187 = vmatpush3.bf16.msra.mxu1 %v5428_v20 }
0x11d7   :  { %5188 = vmatprep.subr.bf16.mxu1 %v5681_v0 }
0x11da   :  { %5189 = vmatpush3.bf16.msra.mxu1 %v5429_v25 }
0x11db   :  { %5190 = vmatprep.subr.bf16.mxu1 %v5681_v0 }
0x11de   :  { %5191 = vmatpush3.bf16.msra.mxu1 %v5430_v41 }
0x11df   :  { %5192 = vmatprep.subr.bf16.mxu1 %v5681_v0 }
0x11e2   :  { %5193 = vmatpush3.bf16.msra.mxu1 %v5431_v44 }
0x11e3   :  { %5194 = vmatprep.subr.bf16.mxu1 %v5681_v0  ;;  %v3483_v0 = vld [vmem:[%s6860_s9 + $0x40] sm:$0xff] }
0x11e6   :  { %5195 = vmatpush3.bf16.msra.mxu1 %v5432_v46 }
0x11e7   :  { %3931 = vmatprep.subr.bf16.mxu1 %v4583_v51  ;;  %v6730_v51 = vld [vmem:[%s6861_s10 + $0x8] sm:$0x3] }
0x1288   :  { %v4771_v58 = vpop.f32.mrf.mxu1  ;;  %v4793_v60 = vpop.f32.mrf.mxu0 }
0x128a   :  { %v4772_v11 = vpop.f32.mrf.mxu1  ;;  %v4794_v61 = vpop.f32.mrf.mxu0 }
0x128b   :  { %v4773_v59 = vadd.f32 %v4772_v11, %v4771_v58  ;;  %v4795_v5 = vadd.f32 %v4794_v61, %v4793_v60  ;;  %v4540_v58 = vcombine.low %v3491_v55, %v3495_v56  ;;  %v3487_v60 = vld [vmem:[%s6860_s9 + $0x60] sm:$0xff]  ;;  %v3362_v56 = vrot.slane %v6730_v51, %v5993_v63 }
0x128c   :  { %v4774_v62 = vpop.f32.mrf.mxu1  ;;  %v4796_v3 = vpop.f32.mrf.mxu0  ;;  %v4533_v11 = vcombine.high %v3483_v0, %v3487_v60  ;;  %v3475_v61 = vld [vmem:[%s6860_s9] sm:$0xff] }
0x128d   :  { %v3297_v4 = vadd.f32 %v4773_v59, %v3069_v36  ;;  %v4532_v36 = vcombine.low %v3483_v0, %v3487_v60  ;;  %v3479_v59 = vld [vmem:[%s6860_s9 + $0x20] sm:$0xff]  ;;  %v3528_v0 = vld [vmem:[%s6860_s9 + $0x1a8] sm:$0xff] }
0x128e   :  { %v4775_v6 = vpop.f32.mrf.mxu1  ;;  %v4797_v7 = vpop.f32.mrf.mxu0  ;;  %v4524_v62 = vcombine.low %v3475_v61, %v3479_v59  ;;  %v4525_v3 = vcombine.high %v3475_v61, %v3479_v59 }
0x128f   :  { %v3337_v8 = vadd.f32 %v4795_v5, %v3297_v4  ;;  %v3533_v4 = vld [vmem:[%s6860_s9 + $0x1d0] sm:$0xff] }
0x1290   :  { %v3537_v5 = vld [vmem:[%s6860_s9 + $0x1f0] sm:$0xff] }
0x1291   :  { %v3342_v21 = vadd.f32 %v3337_v8, %v6585_v53  ;;  %v3531_v53 = vld [vmem:[%s6860_s9 + $0x1c0] sm:$0xff]  ;;  %v4584_v6 = vcombine.low %v3533_v4, %v3537_v5  ;;  %v4585_v7 = vcombine.high %v3533_v4, %v3537_v5  ;;  %v3525_v8 = vld [vmem:[%s6860_s9 + $0x190] sm:$0xff] }
0x1292   :  { %v4581_v19 = vcombine.high %v3531_v53, %v3535_v18  ;;  %v4580_v22 = vcombine.low %v3531_v53, %v3535_v18  ;;  %v3509_v53 = vld [vmem:[%s6860_s9 + $0x110] sm:$0xff] }
0x1293   :  { %3343 = vadd.xlane.f32.xlu0 %v3342_v21  ;;  %v3513_v18 = vld [vmem:[%s6860_s9 + $0x130] sm:$0xff] }
0x1294   :  { %3891 = vmatprep.subr.bf16.mxu0 %v4581_v19  ;;  %v4560_v19 = vcombine.low %v3509_v53, %v3513_v18  ;;  %v4561_v20 = vcombine.high %v3509_v53, %v3513_v18  ;;  %v3480_v53 = vld [vmem:[%s6860_s9 + $0x28] sm:$0xff] }
0x1295   :  { %3892 = vmatpush1.bf16.msra.mxu0 %v4580_v22  ;;  %v3501_v22 = vld [vmem:[%s6860_s9 + $0xd0] sm:$0xff] }
0x1296   :  { %3893 = vmatprep.subr.bf16.mxu0 %v4573_v28  ;;  %v4552_v24 = vcombine.low %v3501_v22, %v3505_v23  ;;  %v4553_v25 = vcombine.high %v3501_v22, %v3505_v23  ;;  %v3497_v28 = vld [vmem:[%s6860_s9 + $0xb0] sm:$0xff]  ;;  %v3538_v22 = vld [vmem:[%s6860_s9 + $0x1f8] sm:$0xff] }
0x1299   :  { %3894 = vmatpush1.bf16.msra.mxu0 %v4572_v26  ;;  %v3493_v26 = vld [vmem:[%s6860_s9 + $0x90] sm:$0xff] }
0x129a   :  { %3895 = vmatprep.subr.bf16.mxu0 %v4565_v31  ;;  %v4544_v29 = vcombine.low %v3493_v26, %v3497_v28  ;;  %v4545_v30 = vcombine.high %v3493_v26, %v3497_v28  ;;  %v3485_v31 = vld [vmem:[%s6860_s9 + $0x50] sm:$0xff]  ;;  %v3530_v26 = vld [vmem:[%s6860_s9 + $0x1b8] sm:$0xff] }
0x129b   :  { %v4536_v34 = vcombine.low %v3485_v31, %v3489_v33  ;;  %v4537_v41 = vcombine.high %v3485_v31, %v3489_v33  ;;  %v3522_v31 = vld [vmem:[%s6860_s9 + $0x178] sm:$0xff] }
0x129d   :  { %3896 = vmatpush1.bf16.msra.mxu0 %v4564_v42  ;;  %v3477_v42 = vld [vmem:[%s6860_s9 + $0x10] sm:$0xff] }
0x129e   :  { %3897 = vmatprep.subr.bf16.mxu0 %v4557_v35  ;;  %v3481_v35 = vld [vmem:[%s6860_s9 + $0x30] sm:$0xff] }
0x129f   :  { %v4528_v44 = vcombine.low %v3477_v42, %v3481_v35 }
0x12a1   :  { %3898 = vmatpush1.bf16.msra.mxu0 %v4556_v45  ;;  %v4529_v45 = vcombine.high %v3477_v42, %v3481_v35  ;;  %v3514_v42 = vld [vmem:[%s6860_s9 + $0x138] sm:$0xff] }
0x12a2   :  { %3899 = vmatprep.subr.bf16.mxu0 %v4549_v52  ;;  %v3357_v52 = vrot.slane %v6472_v47, %v6408_v50  ;;  %v3516_v47 = vld [vmem:[%s6860_s9 + $0x148] sm:$0xff] }
0x12a5   :  { %3900 = vmatpush1.bf16.msra.mxu0 %v4548_v54 }
0x12a6   :  { %3901 = vmatprep.subr.bf16.mxu0 %v4541_v57 }
0x12a9   :  { %3902 = vmatpush1.bf16.msra.mxu0 %v4540_v58  ;;  %v3524_v58 = vld [vmem:[%s6860_s9 + $0x188] sm:$0xff] }
0x12aa   :  { %3903 = vmatprep.subr.bf16.mxu0 %v4533_v11  ;;  %v4575_v11 = vcombine.high %v3524_v58, %v3528_v0  ;;  %v4574_v61 = vcombine.low %v3524_v58, %v3528_v0 }
0x12ad   :  { %3904 = vmatpush1.bf16.msra.mxu0 %v4532_v36 }
0x12ae   :  { %3905 = vmatprep.subr.bf16.mxu0 %v4525_v3  ;;  %v3512_v3 = vld [vmem:[%s6860_s9 + $0x128] sm:$0xff] }
0x12b1   :  { %3906 = vmatpush1.bf16.msra.mxu0 %v4524_v62  ;;  %v3508_v62 = vld [vmem:[%s6860_s9 + $0x108] sm:$0xff] }
0x12b2   :  { %3972 = vmatprep.subr.bf16.mxu0 %v4585_v7  ;;  %v4559_v5 = vcombine.high %v3508_v62, %v3512_v3  ;;  %v3492_v7 = vld [vmem:[%s6860_s9 + $0x88] sm:$0xff] }
0x12b4   :  { %3924 = vmatmul.mubr.bf16.vlgmr.msra.gmra.mxu0 %v5860_v16 }
0x12b5   :  { %3973 = vmatpush1.bf16.msra.mxu0 %v4584_v6  ;;  %4004 = vmatprep.mubr.bf16.mxu0 %v5684_v27  ;;  %v4551_v6 = vcombine.high %v3500_v32, %v3504_v38 }
0x131c   :  { %v3344_v9 = vpop.xlane.xlu0 %3343 }
0x131d   :  { %v3345_v10 = vmul.f32 0.0078125, %v3344_v9  ;;  %v3517_v9 = vld [vmem:[%s6860_s9 + $0x150] sm:$0xff] }
0x131f   :  { %v6605_v14 = vsub.f32 %v3342_v21, %v3345_v10  ;;  %v3529_v21 = vld [vmem:[%s6860_s9 + $0x1b0] sm:$0xff] }
0x1320   :  { %v4576_v39 = vcombine.low %v3525_v8, %v3529_v21  ;;  %v4577_v12 = vcombine.high %v3525_v8, %v3529_v21  ;;  %v3521_v10 = vld [vmem:[%s6860_s9 + $0x170] sm:$0xff]  ;;  %v3496_v8 = vld [vmem:[%s6860_s9 + $0xa8] sm:$0xff]  ;;  %v4550_v21 = vcombine.low %v3500_v32, %v3504_v38 }
0x1321   :  { %v3347_v15 = vmul.f32 %v6605_v14, %v6605_v14  ;;  %v4569_v17 = vcombine.high %v3517_v9, %v3521_v10 }
0x1322   :  { %3974 = vmatprep.subr.bf16.mxu0 %v4577_v12  ;;  %v3484_v12 = vld [vmem:[%s6860_s9 + $0x48] sm:$0xff] }
0x1323   :  { %3348 = vadd.xlane.f32.xlu1 %v3347_v15  ;;  %3975 = vmatpush1.bf16.msra.mxu0 %v4576_v39  ;;  %v4568_v15 = vcombine.low %v3517_v9, %v3521_v10  ;;  %v4543_v39 = vcombine.high %v3492_v7, %v3496_v8  ;;  %v3488_v9 = vld [vmem:[%s6860_s9 + $0x68] sm:$0xff]  ;;  %v4542_v10 = vcombine.low %v3492_v7, %v3496_v8 }
0x1324   :  { %3976 = vmatprep.subr.bf16.mxu0 %v4569_v17  ;;  %v3476_v17 = vld [vmem:[%s6860_s9 + $0x8] sm:$0xff]  ;;  %v4534_v18 = vcombine.low %v3484_v12, %v3488_v9 }
0x1325   :  { %v4526_v23 = vcombine.low %v3476_v17, %v3480_v53 }
0x1327   :  { %3977 = vmatpush1.bf16.msra.mxu0 %v4568_v15  ;;  %v4535_v15 = vcombine.high %v3484_v12, %v3488_v9 }
0x1328   :  { %3978 = vmatprep.subr.bf16.mxu0 %v4561_v20  ;;  %v3534_v20 = vld [vmem:[%s6860_s9 + $0x1d8] sm:$0xff] }
0x1329   :  { %v4586_v28 = vcombine.low %v3534_v20, %v3538_v22 }
0x132b   :  { %3979 = vmatpush1.bf16.msra.mxu0 %v4560_v19  ;;  %v4527_v19 = vcombine.high %v3476_v17, %v3480_v53 }
0x132c   :  { %3980 = vmatprep.subr.bf16.mxu0 %v4553_v25  ;;  %v3526_v25 = vld [vmem:[%s6860_s9 + $0x198] sm:$0xff] }
0x132d   :  { %v4578_v33 = vcombine.low %v3526_v25, %v3530_v26 }
0x132f   :  { %3981 = vmatpush1.bf16.msra.mxu0 %v4552_v24  ;;  %v4587_v24 = vcombine.high %v3534_v20, %v3538_v22 }
0x1330   :  { %3982 = vmatprep.subr.bf16.mxu0 %v4545_v30  ;;  %v3518_v30 = vld [vmem:[%s6860_s9 + $0x158] sm:$0xff] }
0x1331   :  { %v4570_v35 = vcombine.low %v3518_v30, %v3522_v31 }
0x1333   :  { %3983 = vmatpush1.bf16.msra.mxu0 %v4544_v29  ;;  %v4579_v29 = vcombine.high %v3526_v25, %v3530_v26 }
0x1334   :  { %3984 = vmatprep.subr.bf16.mxu0 %v4537_v41  ;;  %v3510_v41 = vld [vmem:[%s6860_s9 + $0x118] sm:$0xff] }
0x1337   :  { %3985 = vmatpush1.bf16.msra.mxu0 %v4536_v34  ;;  %v4571_v34 = vcombine.high %v3518_v30, %v3522_v31 }
0x1338   :  { %3986 = vmatprep.subr.bf16.mxu0 %v4529_v45  ;;  %v3502_v45 = vld [vmem:[%s6860_s9 + $0xd8] sm:$0xff] }
0x133b   :  { %3987 = vmatpush1.bf16.msra.mxu0 %v4528_v44  ;;  %v4563_v44 = vcombine.high %v3510_v41, %v3514_v42 }
0x133e   :  { %4005 = vmatmul.mubr.bf16.vlgmr.msra.gmra.mxu0 %v5860_v16 }
0x13ac   :  { %v3349_v46 = vpop.xlane.xlu1 %3348 }
0x13ad   :  { %v3350_v48 = vmul.f32 0.0078125, %v3349_v46  ;;  %v4562_v46 = vcombine.low %v3510_v41, %v3514_v42 }
0x13af   :  { %v3351_v49 = vadd.f32 1e-05, %v3350_v48 }
0x13b1   :  { %5451 = vrsqrt.f32 %v3351_v49  ;;  %v3494_v49 = vld [vmem:[%s6860_s9 + $0x98] sm:$0xff] }
0x13be   :  { %v5452_v54 = vpop.eup %5451 }
0x13bf   :  { %v3353_v55 = vmul.f32 %v5452_v54, %v6605_v14  ;;  %v3520_v14 = vld [vmem:[%s6860_s9 + $0x168] sm:$0xff] }
0x13c0   :  { %v4567_v59 = vcombine.high %v3516_v47, %v3520_v14  ;;  %v4566_v4 = vcombine.low %v3516_v47, %v3520_v14 }
0x13c1   :  { %v3358_v57 = vmul.f32 %v3357_v52, %v3353_v55  ;;  %v3498_v52 = vld [vmem:[%s6860_s9 + $0xb8] sm:$0xff] }
0x13c2   :  { %v4547_v55 = vcombine.high %v3494_v49, %v3498_v52  ;;  %v4546_v58 = vcombine.low %v3494_v49, %v3498_v52 }
0x13c3   :  { %v3363_v60 = vadd.f32 %v3362_v56, %v3358_v57  ;;  %v3486_v56 = vld [vmem:[%s6860_s9 + $0x58] sm:$0xff] }
0x13c4   :  { %v3490_v57 = vld [vmem:[%s6860_s9 + $0x78] sm:$0xff] }
0x13c5   :  { %v3381_v36 = vpack.c.bf16 %v3363_v60, %v3363_v60  ;;  %3364 = vst [vmem:[#allocation14] sm:$0xff] %v3363_v60  ;;  %v4539_v0 = vcombine.high %v3486_v56, %v3490_v57  ;;  %v3478_v60 = vld [vmem:[%s6860_s9 + $0x18] sm:$0xff] }
0x13c7   :  { %5197 = vmatmul.mubr.bf16.vlgmr.msra.gmra.mxu1 %v3381_v36  ;;  %v3482_v36 = vld [vmem:[%s6860_s9 + $0x38] sm:$0xff] }
0x13c8   :  { %3932 = vmatpush1.bf16.msra.mxu1 %v4582_v40  ;;  %3963 = vmatprep.mubr.bf16.mxu1 %v5684_v27  ;;  %v4558_v40 = vcombine.low %v3508_v62, %v3512_v3  ;;  %v4531_v47 = vcombine.high %v3478_v60, %v3482_v36  ;;  %v4530_v14 = vcombine.low %v3478_v60, %v3482_v36 }
0x13c9   :  { %3933 = vmatprep.subr.bf16.mxu1 %v4575_v11  ;;  %v4538_v11 = vcombine.low %v3486_v56, %v3490_v57 }
0x13cc   :  { %3934 = vmatpush1.bf16.msra.mxu1 %v4574_v61  ;;  %v3925_v61 = vpop.f32.mrf.mxu0 }
0x13cd   :  { %3935 = vmatprep.subr.bf16.mxu1 %v4567_v59 }
0x13ce   :  { %v3927_v59 = vpop.f32.mrf.mxu0 }
0x13d0   :  { %3936 = vmatpush1.bf16.msra.mxu1 %v4566_v4  ;;  %v3928_v62 = vpop.f32.mrf.mxu0 }
0x13d1   :  { %3937 = vmatprep.subr.bf16.mxu1 %v4559_v5 }
0x13d2   :  { %v3929_v3 = vpop.f32.mrf.mxu0 }
0x13d4   :  { %3938 = vmatpush1.bf16.msra.mxu1 %v4558_v40 }
0x13d5   :  { %3939 = vmatprep.subr.bf16.mxu1 %v4551_v6 }
0x13d8   :  { %3940 = vmatpush1.bf16.msra.mxu1 %v4550_v21 }
0x13d9   :  { %3941 = vmatprep.subr.bf16.mxu1 %v4543_v39 }
0x13dc   :  { %3942 = vmatpush1.bf16.msra.mxu1 %v4542_v10 }
0x13dd   :  { %3943 = vmatprep.subr.bf16.mxu1 %v4535_v15 }
0x13e0   :  { %3944 = vmatpush1.bf16.msra.mxu1 %v4534_v18 }
0x13e1   :  { %3945 = vmatprep.subr.bf16.mxu1 %v4527_v19 }
0x13e4   :  { %3946 = vmatpush1.bf16.msra.mxu1 %v4526_v23 }
0x13e5   :  { %4012 = vmatprep.subr.bf16.mxu1 %v4587_v24 }
0x13e7   :  { %3964 = vmatmul.mubr.bf16.vlgmr.msra.gmra.mxu1 %v5860_v16 }
0x13e8   :  { %4013 = vmatpush1.bf16.msra.mxu1 %v4586_v28  ;;  %4044 = vmatprep.mubr.bf16.mxu1 %v5684_v27  ;;  %v3506_v27 = vld [vmem:[%s6860_s9 + $0xf8] sm:$0xff]  ;;  %s4103_s9 = sshll.u32 %s5685_s26, 4  ;;  %s4104_s9 = int_to_ptr.vmem [resolvable:$true] %s4103_s9 }
0x13e9   :  { %4014 = vmatprep.subr.bf16.mxu1 %v4579_v29  ;;  %v4555_v48 = vcombine.high %v3502_v45, %v3506_v27  ;;  %v4554_v54 = vcombine.low %v3502_v45, %v3506_v27  ;;  %s5599_s12 = scalar_lea.vmem %s4104_s9, 128  ;;  %p5604_p3 = scmp.lt.s32.totalorder %s4104_s9, %s4104_s9 }
0x13ea   :  { %p5600_p2 = scmp.ne.s32.totalorder %s4104_s9, %s5599_s12  ;;  %p5605_p4 = scmp.lt.s32.totalorder %s5599_s12, %s5599_s12 }
0x13ec   :  { %4015 = vmatpush1.bf16.msra.mxu1 %v4578_v33  ;;  %p5606_p5 = por %p5605_p4, %p5604_p3 }
0x13ed   :  { %4016 = vmatprep.subr.bf16.mxu1 %v4571_v34 }
0x13ee   :  { %p5607_p6 = pnand %p5606_p5, %p5600_p2 }
0x13f0   :  { %4017 = vmatpush1.bf16.msra.mxu1 %v4570_v35 }
0x13f1   :  { %4018 = vmatprep.subr.bf16.mxu1 %v4563_v44 }
0x13f4   :  { %4019 = vmatpush1.bf16.msra.mxu1 %v4562_v46 }
0x13f5   :  { %4020 = vmatprep.subr.bf16.mxu1 %v4555_v48 }
0x13f8   :  { %4021 = vmatpush1.bf16.msra.mxu1 %v4554_v54 }
0x13f9   :  { %4022 = vmatprep.subr.bf16.mxu1 %v4547_v55 }
0x13fc   :  { %4023 = vmatpush1.bf16.msra.mxu1 %v4546_v58 }
0x13fd   :  { %4024 = vmatprep.subr.bf16.mxu1 %v4539_v0 }
0x13fe   :  { %v4006_v4 = vpop.f32.mrf.mxu0 }
0x1400   :  { %4025 = vmatpush1.bf16.msra.mxu1 %v4538_v11  ;;  %v4008_v5 = vpop.f32.mrf.mxu0 }
0x1401   :  { %4026 = vmatprep.subr.bf16.mxu1 %v4531_v47 }
0x1402   :  { %v4009_v32 = vpop.f32.mrf.mxu0 }
0x1404   :  { %4027 = vmatpush1.bf16.msra.mxu1 %v4530_v14  ;;  %v4010_v38 = vpop.f32.mrf.mxu0 }
0x1407   :  { %4045 = vmatmul.mubr.bf16.vlgmr.msra.gmra.mxu1 %v5860_v16 }
0x1408   :  { %5610 = shalt.err (!%p5607_p6)
}
0x1409   :  { %4106 = dma.vmem_to_hbm [thread:$0]  %s4104_s9, 128, %s6866_s15, [#allocation15]  }
0x140a   :  { %s5619_s30 = scalar_lea.vmem %s4094_s3, 128  ;;  %p5624_p8 = scmp.lt.s32.totalorder %s4094_s3, %s4094_s3 }
0x140b   :  { %p5620_p7 = scmp.ne.s32.totalorder %s4094_s3, %s5619_s30  ;;  %p5625_p9 = scmp.lt.s32.totalorder %s5619_s30, %s5619_s30 }
0x140d   :  { %p5626_p10 = por %p5625_p9, %p5624_p8 }
0x140f   :  { %p5627_p11 = pnand %p5626_p10, %p5620_p7 }
0x1411   :  { %5630 = shalt.err (!%p5627_p11)
}
0x1412   :  { %4096 = dma.vmem_to_hbm [thread:$0]  %s4094_s3, 128, %s6865_s14, [#allocation4]   ;;  %v3385_v16 = vrot.slane %v6730_v51, %v5949_v37  ;;  %v3539_v40 = vld [vmem:[#allocation11] sm:$0xff] }
0x1413   :  { %v3544_v21 = vrot.slane %v3539_v40, %v5993_v63  ;;  %v3548_v17 = vrot.slane %v3539_v40, %v5996_v1  ;;  %v3552_v18 = vrot.slane %v3539_v40, %v6419_v2  ;;  %v3556_v20 = vrot.slane %v3539_v40, %v6003_v13  ;;  %s5687_s14 = smov [#allocation16]  }
0x1414   :  { %v3560_v33 = vrot.slane %v3539_v40, %v6277_v43  ;;  %v3564_v34 = vrot.slane %v3539_v40, %v6408_v50  ;;  %s4113_s15 = sshll.u32 %s5687_s14, 4  ;;  %s4114_s15 = int_to_ptr.vmem [resolvable:$true] %s4113_s15 }
0x1415   :  { %v3926_v9 = vadd.f32 %v3925_v61, %v3544_v21  ;;  %v4007_v25 = vadd.f32 %v4006_v4, %v3556_v20  ;;  %s5639_s4 = scalar_lea.vmem %s4114_s15, 512  ;;  %p5644_p13 = scmp.lt.s32.totalorder %s4114_s15, %s4114_s15 }
0x1416   :  { %p5640_p12 = scmp.ne.s32.totalorder %s4114_s15, %s5639_s4  ;;  %p5645_p0 = scmp.lt.s32.totalorder %s5639_s4, %s5639_s4 }
0x1417   :  { %v4588_v10 = vmul.f32 -1.442695, %v3926_v9  ;;  %v4590_v26 = vmul.f32 -1.442695, %v4007_v25 }
0x1418   :  { %p5646_p1 = por %p5645_p0, %p5644_p13 }
0x1419   :  { %5453 = vpow2.f32 %v4588_v10 }
0x141a   :  { %p5647_p2 = pnand %p5646_p1, %p5640_p12 }
0x1426   :  { %v5454_v15 = vpop.eup %5453 }
0x1427   :  { %v4056_v53 = vadd.f32 1.0, %v5454_v15 }
0x1429   :  { %5455 = vrcp.f32 %v4056_v53 }
0x1436   :  { %v5456_v28 = vpop.eup %5455 }
0x1487   :  { %v3468_v6 = vpop.f32.mrf.mxu1 }
0x1488   :  { %v3469_v7 = vadd.f32 %v3468_v6, %v3385_v16 }
0x1489   :  { %v5198_v8 = vpop.f32.mrf.mxu1 }
0x148a   :  { %3474 = vst [vmem:[#allocation16 + $0x8] sm:$0xff] %v3469_v7 }
0x148b   :  { %v3471_v39 = vpop.f32.mrf.mxu1 }
0x148d   :  { %v5199_v12 = vpop.f32.mrf.mxu1 }
0x14a7   :  { %v3965_v19 = vpop.f32.mrf.mxu1 }
0x14a8   :  { %v3966_v37 = vadd.f32 %v3965_v19, %v3548_v17 }
0x14a9   :  { %v3967_v51 = vpop.f32.mrf.mxu1 }
0x14aa   :  { %5457 = vtanh.f32 %v3966_v37  ;;  %v3968_v63 = vadd.f32 %v3967_v51, %v3552_v18 }
0x14ab   :  { %v3969_v22 = vpop.f32.mrf.mxu1 }
0x14ac   :  { %v4589_v23 = vmul.f32 -1.442695, %v3968_v63 }
0x14ad   :  { %v3970_v24 = vpop.f32.mrf.mxu1 }
0x14ae   :  { %5459 = vpow2.f32 %v4589_v23 }
0x14af   :  { %5461 = vpow2.f32 %v4590_v26 }
0x14b7   :  { %v5458_v1 = vpop.eup %5457 }
0x14b8   :  { %v4066_v29 = vmul.f32 %v5458_v1, %v5456_v28 }
0x14ba   :  { %5463 = vtanh.f32 %v4066_v29 }
0x14bb   :  { %v5460_v30 = vpop.eup %5459 }
0x14bc   :  { %v4063_v2 = vadd.f32 1.0, %v5460_v30  ;;  %v5462_v31 = vpop.eup %5461 }
0x14bd   :  { %v4073_v13 = vadd.f32 1.0, %v5462_v31 }
0x14be   :  { %5465 = vrcp.f32 %v4063_v2 }
0x14bf   :  { %5467 = vrcp.f32 %v4073_v13 }
0x14c7   :  { %v4046_v41 = vpop.f32.mrf.mxu1  ;;  %v5464_v44 = vpop.eup %5463 }
0x14c8   :  { %v4047_v42 = vadd.f32 %v4046_v41, %v3560_v33 }
0x14c9   :  { %v4048_v35 = vpop.f32.mrf.mxu1 }
0x14ca   :  { %5469 = vtanh.f32 %v4047_v42  ;;  %v4049_v45 = vadd.f32 %v4048_v35, %v3564_v34 }
0x14cb   :  { %v5466_v27 = vpop.eup %5465  ;;  %v4050_v46 = vpop.f32.mrf.mxu1 }
0x14cc   :  { %v4591_v48 = vmul.f32 -1.442695, %v4049_v45  ;;  %v4068_v49 = vmul.f32 %v5466_v27, %v5464_v44  ;;  %v5468_v54 = vpop.eup %5467 }
0x14cd   :  { %v4051_v52 = vpop.f32.mrf.mxu1 }
0x14ce   :  { %5471 = vpow2.f32 %v4591_v48  ;;  %4069 = vst [vmem:[#allocation16 + $0x10] sm:$0xff] %v4068_v49 }
0x14d7   :  { %v5470_v55 = vpop.eup %5469 }
0x14d8   :  { %v4083_v43 = vmul.f32 %v5470_v55, %v5468_v54 }
0x14da   :  { %5473 = vtanh.f32 %v4083_v43 }
0x14db   :  { %v5472_v56 = vpop.eup %5471 }
0x14dc   :  { %v4080_v57 = vadd.f32 1.0, %v5472_v56 }
0x14de   :  { %5475 = vrcp.f32 %v4080_v57 }
0x14e7   :  { %v5474_v50 = vpop.eup %5473 }
0x14eb   :  { %v5476_v58 = vpop.eup %5475 }
0x14ec   :  { %v4085_v0 = vmul.f32 %v5476_v58, %v5474_v50 }
0x14ee   :  { %4086 = vst [vmem:[#allocation16 + $0x18] sm:$0xff] %v4085_v0 }
0x14ef   :  { %5650 = shalt.err (!%p5647_p2)
}
0x14f0   :  { %4116 = dma.vmem_to_hbm [thread:$0]  %s4114_s15, 512, %s6867_s16, [#allocation15]  }
0x14f1   :  { %5667 = dma.done.wait [#allocation4], 128  }
0x14f2   :  { %5668 = vsyncadd [#allocation4], 4294967168 }
0x14f3   :  { %5669 = dma.done.wait [#allocation15], 640  }
0x14f4   :  { %5670 = vsyncadd [#allocation15], 4294966656 }
0x14f5   :  { %4126 = vsyncpa [#allocation3], 1 }
0x14f6   :  { %4127 = vsyncpa [#allocation6], 1 }
0x14f7   :  { %4128 = vsyncpa [#allocation9], 1 }
0x14f8   :  { %4129 = vsyncpa [#allocation12], 1 }
0x14f9   :  { %4130 = vsyncpa [#allocation4], 1 }
0x14fa   :  { %4131 = vsyncpa [#allocation15], 1 }

</bundles_post_ra>
